<compile_context>
chip_gen: v5e
topology: v5e:2x2
jax: 0.10.0
libtpu: 0.0.40
codegen_flags: <defaults>
</compile_context>

<pallas_src>
import functools
import math

import jax
import jax.numpy as jnp
from jax.experimental import pallas as pl
from jax.experimental.pallas import tpu as pltpu


_VMEM_LIMIT_BYTES = 32 * 1024 * 1024  # safe on v5e (16 MiB default) .. v7x (64 MiB phys)


def _compiler_params():
    return pltpu.CompilerParams(
        dimension_semantics=("parallel",),
        vmem_limit_bytes=_VMEM_LIMIT_BYTES,
    )


def _elu(y):
    # ELU(alpha=1): x if x > 0 else exp(x) - 1 ; exp(min(y,0)) is overflow-safe.
    return jnp.where(y > 0.0, y, jnp.exp(jnp.minimum(y, 0.0)) - 1.0)


# ----------------------------------------------------------------------------
# Kernel 1: fused GEMM + bias (+ ELU), tiled and pipelined over rows (M).
# ----------------------------------------------------------------------------
def _gemm_bias_act_kernel(x_ref, w_ref, b_ref, o_ref, *, apply_elu):
    y = jnp.dot(x_ref[...], w_ref[...], preferred_element_type=jnp.float32)
    y = y + b_ref[...]
    if apply_elu:
        y = _elu(y)
    o_ref[...] = y.astype(o_ref.dtype)


def pallas_linear(x, w, b, *, apply_elu, tile_m=512):
    """y = act(x @ w + b).  x:(M,K)  w:(K,N)  b:(N,).  Grid over M tiles."""
    M, K = x.shape
    Kw, N = w.shape
    assert K == Kw
    b2 = b.reshape(1, N).astype(jnp.float32)
    tm = tile_m if M > tile_m else M            # full block when M is small
    grid = (pl.cdiv(M, tm),)
    return pl.pallas_call(
        functools.partial(_gemm_bias_act_kernel, apply_elu=apply_elu),
        out_shape=jax.ShapeDtypeStruct((M, N), jnp.float32),
        grid=grid,
        in_specs=[
            pl.BlockSpec((tm, K), lambda i: (i, 0)),   # activations: tiled over M
            pl.BlockSpec((K, N), lambda i: (0, 0)),    # weights: resident
            pl.BlockSpec((1, N), lambda i: (0, 0)),    # bias: resident
        ],
        out_specs=pl.BlockSpec((tm, N), lambda i: (i, 0)),
        compiler_params=_compiler_params(),
    )(x, w, b2)


# ----------------------------------------------------------------------------
# Kernel 2: fused embeddings + dueling head.
#   feat -> [state_emb | adv_emb] GEMM -> ELU -> value (VPU reduce) /
#   advantage (MXU) -> dueling combine.  Only emb_state/emb_adv/q hit HBM.
# ----------------------------------------------------------------------------
def _fused_head_kernel(feat_ref, wemb_ref, bemb_ref, wv_ref, bv_ref,
                       wa_ref, ba_ref, emb_s_ref, emb_a_ref, q_ref, *, hidden):
    emb = jnp.dot(feat_ref[...], wemb_ref[...],
                  preferred_element_type=jnp.float32) + bemb_ref[...]   # (tb, 2H)
    emb_s = emb[:, :hidden]
    emb_a = emb[:, hidden:]
    # PyTorch returns the pre-ELU embeddings (ELU lives inside the streams).
    emb_s_ref[...] = emb_s.astype(emb_s_ref.dtype)
    emb_a_ref[...] = emb_a.astype(emb_a_ref.dtype)

    hs = _elu(emb_s)
    ha = _elu(emb_a)
    # Value head: N=1 matmul would waste a full MXU pass; use VPU mul + XLU reduce.
    v = jnp.sum(hs * wv_ref[...], axis=1, keepdims=True) + bv_ref[...]          # (tb, 1)
    a = jnp.dot(ha, wa_ref[...], preferred_element_type=jnp.float32) + ba_ref[...]  # (tb, A)
    a_mean = jnp.mean(a, axis=1, keepdims=True)
    q_ref[...] = (v + (a - a_mean)).astype(q_ref.dtype)


def pallas_dueling_head(feat, w_emb, b_emb, w_val, b_val, w_adv, b_adv,
                        *, hidden=256, tile_b=128):
    B, D = feat.shape
    A = w_adv.shape[1]
    tb = tile_b if B > tile_b else B
    grid = (pl.cdiv(B, tb),)
    b_emb2 = b_emb.reshape(1, 2 * hidden).astype(jnp.float32)
    wv2 = w_val.reshape(1, hidden).astype(jnp.float32)
    bv2 = b_val.reshape(1, 1).astype(jnp.float32)
    ba2 = b_adv.reshape(1, A).astype(jnp.float32)
    out_shapes = (
        jax.ShapeDtypeStruct((B, hidden), jnp.float32),   # emb_state (pre-ELU)
        jax.ShapeDtypeStruct((B, hidden), jnp.float32),   # emb_adv   (pre-ELU)
        jax.ShapeDtypeStruct((B, A), jnp.float32),        # qvalues
    )
    return pl.pallas_call(
        functools.partial(_fused_head_kernel, hidden=hidden),
        out_shape=out_shapes,
        grid=grid,
        in_specs=[
            pl.BlockSpec((tb, D), lambda i: (i, 0)),            # feat: tiled over batch
            pl.BlockSpec((D, 2 * hidden), lambda i: (0, 0)),    # [state|adv] emb weights
            pl.BlockSpec((1, 2 * hidden), lambda i: (0, 0)),
            pl.BlockSpec((1, hidden), lambda i: (0, 0)),        # value weight row
            pl.BlockSpec((1, 1), lambda i: (0, 0)),
            pl.BlockSpec((hidden, A), lambda i: (0, 0)),        # advantage weights
            pl.BlockSpec((1, A), lambda i: (0, 0)),
        ],
        out_specs=(
            pl.BlockSpec((tb, hidden), lambda i: (i, 0)),
            pl.BlockSpec((tb, hidden), lambda i: (i, 0)),
            pl.BlockSpec((tb, A), lambda i: (i, 0)),
        ),
        compiler_params=_compiler_params(),
    )(feat, w_emb, b_emb2, wv2, bv2, w_adv, ba2)


# ----------------------------------------------------------------------------
# Glue: im2col patch extraction (XLA slicing; GEMM compute stays in Pallas).
# ----------------------------------------------------------------------------
def im2col(x_nhwc, k, s):
    """x: (B,H,W,C) -> patches (B, Ho*Wo, k*k*C), (ki,kj,c)-ordered."""
    B, H, W, C = x_nhwc.shape
    Ho = (H - k) // s + 1
    Wo = (W - k) // s + 1
    cols = []
    for i in range(k):
        for j in range(k):
            cols.append(x_nhwc[:, i:i + s * Ho:s, j:j + s * Wo:s, :])
    p = jnp.stack(cols, axis=3)                       # (B, Ho, Wo, k*k, C)
    return p.reshape(B, Ho * Wo, k * k * C), Ho, Wo


def conv_as_gemm(x_nhwc, w_mat, b, *, k, s):
    """PyTorch-semantics valid Conv2d + ELU via im2col + tiled Pallas GEMM."""
    B = x_nhwc.shape[0]
    Cout = w_mat.shape[1]
    patches, Ho, Wo = im2col(x_nhwc, k, s)
    K = patches.shape[-1]
    y = pallas_linear(patches.reshape(B * Ho * Wo, K), w_mat, b, apply_elu=True)
    return y.reshape(B, Ho, Wo, Cout)


# ----------------------------------------------------------------------------
# Parameter construction (PyTorch layout) + one-time setup re-layout.
# ----------------------------------------------------------------------------
def _uniform(key, shape, fan_in):
    bound = 1.0 / math.sqrt(fan_in)
    return jax.random.uniform(key, shape, jnp.float32, -bound, bound)


def conv_output_hw(frame_size):
    h, w = frame_size
    for k, s in ((8, 4), (4, 2), (3, 1)):
        h = (h - k) // s + 1
        w = (w - k) // s + 1
    return h, w


def init_params(key, *, stack_size, frame_size, action_size):
    h_out, w_out = conv_output_hw(frame_size)
    out_dim = h_out * w_out * 64
    keys = jax.random.split(key, 14)
    p = {
        "conv1_w": _uniform(keys[0], (32, stack_size, 8, 8), stack_size * 64),
        "conv1_b": _uniform(keys[1], (32,), stack_size * 64),
        "conv2_w": _uniform(keys[2], (64, 32, 4, 4), 32 * 16),
        "conv2_b": _uniform(keys[3], (64,), 32 * 16),
        "conv3_w": _uniform(keys[4], (64, 64, 3, 3), 64 * 9),
        "conv3_b": _uniform(keys[5], (64,), 64 * 9),
        # Linear layers stored as (in, out), in-dim ordered like PyTorch's
        # CHW flatten of the conv3 activation.
        "state_emb_w": _uniform(keys[6], (out_dim, 256), out_dim),
        "state_emb_b": _uniform(keys[7], (256,), out_dim),
        "adv_emb_w": _uniform(keys[8], (out_dim, 256), out_dim),
        "adv_emb_b": _uniform(keys[9], (256,), out_dim),
        "value_w": _uniform(keys[10], (256, 1), 256),
        "value_b": _uniform(keys[11], (1,), 256),
        "adv_w": _uniform(keys[12], (256, action_size), 256),
        "adv_b": _uniform(keys[13], (action_size,), 256),
    }
    return p, (h_out, w_out)


def prepare_params(params, *, conv_out_hw):
    """One-time weight re-layouts; zero per-forward cost."""
    h3, w3 = conv_out_hw
    c3 = 64
    pp = {}
    # Conv weights (Cout, Cin, kH, kW) -> (kH*kW*Cin, Cout) matching im2col order.
    for name in ("conv1", "conv2", "conv3"):
        w = params[f"{name}_w"]
        cout = w.shape[0]
        pp[f"{name}_w"] = jnp.transpose(w, (2, 3, 1, 0)).reshape(-1, cout)
        pp[f"{name}_b"] = params[f"{name}_b"]
    # Permute embedding-weight rows from CHW-flatten to HWC-flatten order so the
    # forward can skip the NCHW transpose, and concat state/adv into one matrix.
    perm = (jnp.arange(c3)[None, None, :] * (h3 * w3)
            + jnp.arange(h3)[:, None, None] * w3
            + jnp.arange(w3)[None, :, None]).reshape(-1)
    w_state = params["state_emb_w"][perm]
    w_adv = params["adv_emb_w"][perm]
    pp["emb_w"] = jnp.concatenate([w_state, w_adv], axis=1)          # (out_dim, 512)
    pp["emb_b"] = jnp.concatenate([params["state_emb_b"], params["adv_emb_b"]])
    pp["value_w"] = params["value_w"]
    pp["value_b"] = params["value_b"]
    pp["adv_w"] = params["adv_w"]
    pp["adv_b"] = params["adv_b"]
    return pp


# ----------------------------------------------------------------------------
# Forward pass (matches AtariDuelingDQN.forward)
# ----------------------------------------------------------------------------
def atari_dueling_dqn_forward(pp, stacked_frames_nchw):
    B = stacked_frames_nchw.shape[0]
    x = jnp.transpose(stacked_frames_nchw, (0, 2, 3, 1))  # NCHW -> NHWC (input only)

    x = conv_as_gemm(x, pp["conv1_w"], pp["conv1_b"], k=8, s=4)
    x = conv_as_gemm(x, pp["conv2_w"], pp["conv2_b"], k=4, s=2)
    x = conv_as_gemm(x, pp["conv3_w"], pp["conv3_b"], k=3, s=1)

    # Plain NHWC flatten; CHW->HWC reorder was folded into the emb weight rows.
    feat = x.reshape(B, -1)

    emb_state, emb_adv, q = pallas_dueling_head(
        feat, pp["emb_w"], pp["emb_b"],
        pp["value_w"], pp["value_b"], pp["adv_w"], pp["adv_b"])
    return {"qvalues": q, "emb": [emb_state, emb_adv]}


# ----------------------------------------------------------------------------
if __name__ == "__main__":
    # Small but conv-stack-compatible shapes: 52x52 frames, stack of 4, 6 actions.
    BATCH, STACK, HFRAME, WFRAME, ACTIONS = 2, 4, 52, 52, 6

    key = jax.random.PRNGKey(0)
    key_p, key_x = jax.random.split(key)
    params, conv_hw = init_params(
        key_p, stack_size=STACK, frame_size=(HFRAME, WFRAME), action_size=ACTIONS
    )
    prepared = prepare_params(params, conv_out_hw=conv_hw)
    x = jax.random.normal(key_x, (BATCH, STACK, HFRAME, WFRAME), dtype=jnp.float32)

    out = jax.jit(atari_dueling_dqn_forward)(prepared, x)
    jax.block_until_ready(out)

    assert out["qvalues"].shape == (BATCH, ACTIONS)
    assert out["emb"][0].shape == (BATCH, 256)
    assert out["emb"][1].shape == (BATCH, 256)
    assert all(jnp.isfinite(v).all() for v in
               (out["qvalues"], out["emb"][0], out["emb"][1]))
    print("KERNEL_OK")
</pallas_src>

<mosaic_0001>
module attributes {stable_mosaic.version = 11 : i64} {
  func.func @_gemm_bias_act_kernel(%arg0: i32, %arg1: memref<288x256xf32, #tpu.memory_space<vmem>>, %arg2: memref<256x32xf32, #tpu.memory_space<vmem>>, %arg3: memref<1x32xf32, #tpu.memory_space<vmem>>, %arg4: memref<288x32xf32, #tpu.memory_space<vmem>>) attributes {dimension_semantics = [#tpu.dimension_semantics<parallel>], iteration_bounds = array<i64: 1>, scalar_prefetch = 0 : i64, scratch_operands = 0 : i64, tpu.core_type = #tpu.core_type<tc>, window_params = [{transform_indices = @transform_0, window_bounds = array<i64: 288, 256>}, {pipeline_mode = #tpu.pipeline_mode<synchronous>, transform_indices = @transform_1, window_bounds = array<i64: 256, 32>}, {pipeline_mode = #tpu.pipeline_mode<synchronous>, transform_indices = @transform_2, window_bounds = array<i64: 1, 32>}, {transform_indices = @transform_3, window_bounds = array<i64: 288, 32>}]} {
    %c0 = arith.constant 0 : index
    %c0_0 = arith.constant 0 : index
    %0 = vector.load %arg1[%c0, %c0_0] : memref<288x256xf32, #tpu.memory_space<vmem>>, vector<288x256xf32>
    %c0_1 = arith.constant 0 : index
    %c0_2 = arith.constant 0 : index
    %1 = vector.load %arg2[%c0_1, %c0_2] : memref<256x32xf32, #tpu.memory_space<vmem>>, vector<256x32xf32>
    %cst = arith.constant dense<0.000000e+00> : vector<288x32xf32>
    %2 = tpu.matmul %0, %1, %cst {dimension_numbers = #tpu.dot_dimension_numbers<[1], [0], [0], [1], [0, 0, 1, 1], [], []>} : vector<288x256xf32>, vector<256x32xf32>, vector<288x32xf32> -> vector<288x32xf32>
    %c0_3 = arith.constant 0 : index
    %c0_4 = arith.constant 0 : index
    %3 = vector.load %arg3[%c0_3, %c0_4] : memref<1x32xf32, #tpu.memory_space<vmem>>, vector<1x32xf32>
    %4 = vector.broadcast %3 : vector<1x32xf32> to vector<288x32xf32>
    %5 = arith.addf %2, %4 : vector<288x32xf32>
    %cst_5 = arith.constant 0.000000e+00 : f32
    %6 = vector.broadcast %cst_5 : f32 to vector<288x32xf32>
    %7 = arith.cmpf ogt, %5, %6 : vector<288x32xf32>
    %cst_6 = arith.constant 0.000000e+00 : f32
    %8 = vector.broadcast %cst_6 : f32 to vector<288x32xf32>
    %9 = arith.minimumf %5, %8 : vector<288x32xf32>
    %10 = math.exp %9 : vector<288x32xf32>
    %cst_7 = arith.constant 1.000000e+00 : f32
    %11 = vector.broadcast %cst_7 : f32 to vector<288x32xf32>
    %12 = arith.subf %10, %11 : vector<288x32xf32>
    %13 = arith.select %7, %5, %12 : vector<288x32xi1>, vector<288x32xf32>
    %c0_8 = arith.constant 0 : index
    %c0_9 = arith.constant 0 : index
    %14 = vector.load %arg4[%c0_8, %c0_9] : memref<288x32xf32, #tpu.memory_space<vmem>>, vector<288x32xf32>
    tpu.vector_store %arg4[%c0_8, %c0_9], %13 {strides = array<i32>} : memref<288x32xf32, #tpu.memory_space<vmem>>, vector<288x32xf32>,
    return
  }
  func.func @transform_0(%arg0: i32) -> (i32, i32) {
    %c0_i32 = arith.constant 0 : i32
    %c0_i32_0 = arith.constant 0 : i32
    return %arg0, %c0_i32 : i32, i32
  }
  func.func @transform_1(%arg0: i32) -> (i32, i32) {
    %c0_i32 = arith.constant 0 : i32
    %c0_i32_0 = arith.constant 0 : i32
    %c0_i32_1 = arith.constant 0 : i32
    return %c0_i32, %c0_i32_0 : i32, i32
  }
  func.func @transform_2(%arg0: i32) -> (i32, i32) {
    %c0_i32 = arith.constant 0 : i32
    %c0_i32_0 = arith.constant 0 : i32
    %c0_i32_1 = arith.constant 0 : i32
    return %c0_i32, %c0_i32_0 : i32, i32
  }
  func.func @transform_3(%arg0: i32) -> (i32, i32) {
    %c0_i32 = arith.constant 0 : i32
    %c0_i32_0 = arith.constant 0 : i32
    return %arg0, %c0_i32 : i32, i32
  }
}

module attributes {stable_mosaic.version = 11 : i64} {
  func.func @_gemm_bias_act_kernel(%arg0: i32, %arg1: memref<50x512xf32, #tpu.memory_space<vmem>>, %arg2: memref<512x64xf32, #tpu.memory_space<vmem>>, %arg3: memref<1x64xf32, #tpu.memory_space<vmem>>, %arg4: memref<50x64xf32, #tpu.memory_space<vmem>>) attributes {dimension_semantics = [#tpu.dimension_semantics<parallel>], iteration_bounds = array<i64: 1>, scalar_prefetch = 0 : i64, scratch_operands = 0 : i64, tpu.core_type = #tpu.core_type<tc>, window_params = [{transform_indices = @transform_0, window_bounds = array<i64: 50, 512>}, {pipeline_mode = #tpu.pipeline_mode<synchronous>, transform_indices = @transform_1, window_bounds = array<i64: 512, 64>}, {pipeline_mode = #tpu.pipeline_mode<synchronous>, transform_indices = @transform_2, window_bounds = array<i64: 1, 64>}, {transform_indices = @transform_3, window_bounds = array<i64: 50, 64>}]} {
    %c0 = arith.constant 0 : index
    %c0_0 = arith.constant 0 : index
    %0 = vector.load %arg1[%c0, %c0_0] : memref<50x512xf32, #tpu.memory_space<vmem>>, vector<50x512xf32>
    %c0_1 = arith.constant 0 : index
    %c0_2 = arith.constant 0 : index
    %1 = vector.load %arg2[%c0_1, %c0_2] : memref<512x64xf32, #tpu.memory_space<vmem>>, vector<512x64xf32>
    %cst = arith.constant dense<0.000000e+00> : vector<50x64xf32>
    %2 = tpu.matmul %0, %1, %cst {dimension_numbers = #tpu.dot_dimension_numbers<[1], [0], [0], [1], [0, 0, 1, 1], [], []>} : vector<50x512xf32>, vector<512x64xf32>, vector<50x64xf32> -> vector<50x64xf32>
    %c0_3 = arith.constant 0 : index
    %c0_4 = arith.constant 0 : index
    %3 = vector.load %arg3[%c0_3, %c0_4] : memref<1x64xf32, #tpu.memory_space<vmem>>, vector<1x64xf32>
    %4 = vector.broadcast %3 : vector<1x64xf32> to vector<50x64xf32>
    %5 = arith.addf %2, %4 : vector<50x64xf32>
    %cst_5 = arith.constant 0.000000e+00 : f32
    %6 = vector.broadcast %cst_5 : f32 to vector<50x64xf32>
    %7 = arith.cmpf ogt, %5, %6 : vector<50x64xf32>
    %cst_6 = arith.constant 0.000000e+00 : f32
    %8 = vector.broadcast %cst_6 : f32 to vector<50x64xf32>
    %9 = arith.minimumf %5, %8 : vector<50x64xf32>
    %10 = math.exp %9 : vector<50x64xf32>
    %cst_7 = arith.constant 1.000000e+00 : f32
    %11 = vector.broadcast %cst_7 : f32 to vector<50x64xf32>
    %12 = arith.subf %10, %11 : vector<50x64xf32>
    %13 = arith.select %7, %5, %12 : vector<50x64xi1>, vector<50x64xf32>
    %c0_8 = arith.constant 0 : index
    %c0_9 = arith.constant 0 : index
    %14 = vector.load %arg4[%c0_8, %c0_9] : memref<50x64xf32, #tpu.memory_space<vmem>>, vector<50x64xf32>
    tpu.vector_store %arg4[%c0_8, %c0_9], %13 {strides = array<i32>} : memref<50x64xf32, #tpu.memory_space<vmem>>, vector<50x64xf32>,
    return
  }
  func.func @transform_0(%arg0: i32) -> (i32, i32) {
    %c0_i32 = arith.constant 0 : i32
    %c0_i32_0 = arith.constant 0 : i32
    return %arg0, %c0_i32 : i32, i32
  }
  func.func @transform_1(%arg0: i32) -> (i32, i32) {
    %c0_i32 = arith.constant 0 : i32
    %c0_i32_0 = arith.constant 0 : i32
    %c0_i32_1 = arith.constant 0 : i32
    return %c0_i32, %c0_i32_0 : i32, i32
  }
  func.func @transform_2(%arg0: i32) -> (i32, i32) {
    %c0_i32 = arith.constant 0 : i32
    %c0_i32_0 = arith.constant 0 : i32
    %c0_i32_1 = arith.constant 0 : i32
    return %c0_i32, %c0_i32_0 : i32, i32
  }
  func.func @transform_3(%arg0: i32) -> (i32, i32) {
    %c0_i32 = arith.constant 0 : i32
    %c0_i32_0 = arith.constant 0 : i32
    return %arg0, %c0_i32 : i32, i32
  }
}

module attributes {stable_mosaic.version = 11 : i64} {
  func.func @_gemm_bias_act_kernel(%arg0: i32, %arg1: memref<18x576xf32, #tpu.memory_space<vmem>>, %arg2: memref<576x64xf32, #tpu.memory_space<vmem>>, %arg3: memref<1x64xf32, #tpu.memory_space<vmem>>, %arg4: memref<18x64xf32, #tpu.memory_space<vmem>>) attributes {dimension_semantics = [#tpu.dimension_semantics<parallel>], iteration_bounds = array<i64: 1>, scalar_prefetch = 0 : i64, scratch_operands = 0 : i64, tpu.core_type = #tpu.core_type<tc>, window_params = [{transform_indices = @transform_0, window_bounds = array<i64: 18, 576>}, {pipeline_mode = #tpu.pipeline_mode<synchronous>, transform_indices = @transform_1, window_bounds = array<i64: 576, 64>}, {pipeline_mode = #tpu.pipeline_mode<synchronous>, transform_indices = @transform_2, window_bounds = array<i64: 1, 64>}, {transform_indices = @transform_3, window_bounds = array<i64: 18, 64>}]} {
    %c0 = arith.constant 0 : index
    %c0_0 = arith.constant 0 : index
    %0 = vector.load %arg1[%c0, %c0_0] : memref<18x576xf32, #tpu.memory_space<vmem>>, vector<18x576xf32>
    %c0_1 = arith.constant 0 : index
    %c0_2 = arith.constant 0 : index
    %1 = vector.load %arg2[%c0_1, %c0_2] : memref<576x64xf32, #tpu.memory_space<vmem>>, vector<576x64xf32>
    %cst = arith.constant dense<0.000000e+00> : vector<18x64xf32>
    %2 = tpu.matmul %0, %1, %cst {dimension_numbers = #tpu.dot_dimension_numbers<[1], [0], [0], [1], [0, 0, 1, 1], [], []>} : vector<18x576xf32>, vector<576x64xf32>, vector<18x64xf32> -> vector<18x64xf32>
    %c0_3 = arith.constant 0 : index
    %c0_4 = arith.constant 0 : index
    %3 = vector.load %arg3[%c0_3, %c0_4] : memref<1x64xf32, #tpu.memory_space<vmem>>, vector<1x64xf32>
    %4 = vector.broadcast %3 : vector<1x64xf32> to vector<18x64xf32>
    %5 = arith.addf %2, %4 : vector<18x64xf32>
    %cst_5 = arith.constant 0.000000e+00 : f32
    %6 = vector.broadcast %cst_5 : f32 to vector<18x64xf32>
    %7 = arith.cmpf ogt, %5, %6 : vector<18x64xf32>
    %cst_6 = arith.constant 0.000000e+00 : f32
    %8 = vector.broadcast %cst_6 : f32 to vector<18x64xf32>
    %9 = arith.minimumf %5, %8 : vector<18x64xf32>
    %10 = math.exp %9 : vector<18x64xf32>
    %cst_7 = arith.constant 1.000000e+00 : f32
    %11 = vector.broadcast %cst_7 : f32 to vector<18x64xf32>
    %12 = arith.subf %10, %11 : vector<18x64xf32>
    %13 = arith.select %7, %5, %12 : vector<18x64xi1>, vector<18x64xf32>
    %c0_8 = arith.constant 0 : index
    %c0_9 = arith.constant 0 : index
    %14 = vector.load %arg4[%c0_8, %c0_9] : memref<18x64xf32, #tpu.memory_space<vmem>>, vector<18x64xf32>
    tpu.vector_store %arg4[%c0_8, %c0_9], %13 {strides = array<i32>} : memref<18x64xf32, #tpu.memory_space<vmem>>, vector<18x64xf32>,
    return
  }
  func.func @transform_0(%arg0: i32) -> (i32, i32) {
    %c0_i32 = arith.constant 0 : i32
    %c0_i32_0 = arith.constant 0 : i32
    return %arg0, %c0_i32 : i32, i32
  }
  func.func @transform_1(%arg0: i32) -> (i32, i32) {
    %c0_i32 = arith.constant 0 : i32
    %c0_i32_0 = arith.constant 0 : i32
    %c0_i32_1 = arith.constant 0 : i32
    return %c0_i32, %c0_i32_0 : i32, i32
  }
  func.func @transform_2(%arg0: i32) -> (i32, i32) {
    %c0_i32 = arith.constant 0 : i32
    %c0_i32_0 = arith.constant 0 : i32
    %c0_i32_1 = arith.constant 0 : i32
    return %c0_i32, %c0_i32_0 : i32, i32
  }
  func.func @transform_3(%arg0: i32) -> (i32, i32) {
    %c0_i32 = arith.constant 0 : i32
    %c0_i32_0 = arith.constant 0 : i32
    return %arg0, %c0_i32 : i32, i32
  }
}

module attributes {stable_mosaic.version = 11 : i64} {
  func.func @_fused_head_kernel(%arg0: i32, %arg1: memref<2x576xf32, #tpu.memory_space<vmem>>, %arg2: memref<576x512xf32, #tpu.memory_space<vmem>>, %arg3: memref<1x512xf32, #tpu.memory_space<vmem>>, %arg4: memref<1x256xf32, #tpu.memory_space<vmem>>, %arg5: memref<1x1xf32, #tpu.memory_space<vmem>>, %arg6: memref<256x6xf32, #tpu.memory_space<vmem>>, %arg7: memref<1x6xf32, #tpu.memory_space<vmem>>, %arg8: memref<2x256xf32, #tpu.memory_space<vmem>>, %arg9: memref<2x256xf32, #tpu.memory_space<vmem>>, %arg10: memref<2x6xf32, #tpu.memory_space<vmem>>) attributes {dimension_semantics = [#tpu.dimension_semantics<parallel>], iteration_bounds = array<i64: 1>, scalar_prefetch = 0 : i64, scratch_operands = 0 : i64, tpu.core_type = #tpu.core_type<tc>, window_params = [{transform_indices = @transform_0, window_bounds = array<i64: 2, 576>}, {pipeline_mode = #tpu.pipeline_mode<synchronous>, transform_indices = @transform_1, window_bounds = array<i64: 576, 512>}, {pipeline_mode = #tpu.pipeline_mode<synchronous>, transform_indices = @transform_2, window_bounds = array<i64: 1, 512>}, {pipeline_mode = #tpu.pipeline_mode<synchronous>, transform_indices = @transform_3, window_bounds = array<i64: 1, 256>}, {pipeline_mode = #tpu.pipeline_mode<synchronous>, transform_indices = @transform_4, window_bounds = array<i64: 1, 1>}, {pipeline_mode = #tpu.pipeline_mode<synchronous>, transform_indices = @transform_5, window_bounds = array<i64: 256, 6>}, {pipeline_mode = #tpu.pipeline_mode<synchronous>, transform_indices = @transform_6, window_bounds = array<i64: 1, 6>}, {transform_indices = @transform_7, window_bounds = array<i64: 2, 256>}, {transform_indices = @transform_8, window_bounds = array<i64: 2, 256>}, {transform_indices = @transform_9, window_bounds = array<i64: 2, 6>}]} {
    %c0 = arith.constant 0 : index
    %c0_0 = arith.constant 0 : index
    %0 = vector.load %arg1[%c0, %c0_0] : memref<2x576xf32, #tpu.memory_space<vmem>>, vector<2x576xf32>
    %c0_1 = arith.constant 0 : index
    %c0_2 = arith.constant 0 : index
    %1 = vector.load %arg2[%c0_1, %c0_2] : memref<576x512xf32, #tpu.memory_space<vmem>>, vector<576x512xf32>
    %cst = arith.constant dense<0.000000e+00> : vector<2x512xf32>
    %2 = tpu.matmul %0, %1, %cst {dimension_numbers = #tpu.dot_dimension_numbers<[1], [0], [0], [1], [0, 0, 1, 1], [], []>} : vector<2x576xf32>, vector<576x512xf32>, vector<2x512xf32> -> vector<2x512xf32>
    %c0_3 = arith.constant 0 : index
    %c0_4 = arith.constant 0 : index
    %3 = vector.load %arg3[%c0_3, %c0_4] : memref<1x512xf32, #tpu.memory_space<vmem>>, vector<1x512xf32>
    %4 = vector.broadcast %3 : vector<1x512xf32> to vector<2x512xf32>
    %5 = arith.addf %2, %4 : vector<2x512xf32>
    %6 = vector.extract_strided_slice %5 {offsets = [0, 0], sizes = [2, 256], strides = [1, 1]} : vector<2x512xf32> to vector<2x256xf32>
    %7 = vector.extract_strided_slice %5 {offsets = [0, 256], sizes = [2, 256], strides = [1, 1]} : vector<2x512xf32> to vector<2x256xf32>
    %c0_5 = arith.constant 0 : index
    %c0_6 = arith.constant 0 : index
    %8 = vector.load %arg8[%c0_5, %c0_6] : memref<2x256xf32, #tpu.memory_space<vmem>>, vector<2x256xf32>
    tpu.vector_store %arg8[%c0_5, %c0_6], %6 {strides = array<i32>} : memref<2x256xf32, #tpu.memory_space<vmem>>, vector<2x256xf32>,
    %c0_7 = arith.constant 0 : index
    %c0_8 = arith.constant 0 : index
    %9 = vector.load %arg9[%c0_7, %c0_8] : memref<2x256xf32, #tpu.memory_space<vmem>>, vector<2x256xf32>
    tpu.vector_store %arg9[%c0_7, %c0_8], %7 {strides = array<i32>} : memref<2x256xf32, #tpu.memory_space<vmem>>, vector<2x256xf32>,
    %cst_9 = arith.constant 0.000000e+00 : f32
    %10 = vector.broadcast %cst_9 : f32 to vector<2x256xf32>
    %11 = arith.cmpf ogt, %6, %10 : vector<2x256xf32>
    %cst_10 = arith.constant 0.000000e+00 : f32
    %12 = vector.broadcast %cst_10 : f32 to vector<2x256xf32>
    %13 = arith.minimumf %6, %12 : vector<2x256xf32>
    %14 = math.exp %13 : vector<2x256xf32>
    %cst_11 = arith.constant 1.000000e+00 : f32
    %15 = vector.broadcast %cst_11 : f32 to vector<2x256xf32>
    %16 = arith.subf %14, %15 : vector<2x256xf32>
    %17 = arith.select %11, %6, %16 : vector<2x256xi1>, vector<2x256xf32>
    %cst_12 = arith.constant 0.000000e+00 : f32
    %18 = vector.broadcast %cst_12 : f32 to vector<2x256xf32>
    %19 = arith.cmpf ogt, %7, %18 : vector<2x256xf32>
    %cst_13 = arith.constant 0.000000e+00 : f32
    %20 = vector.broadcast %cst_13 : f32 to vector<2x256xf32>
    %21 = arith.minimumf %7, %20 : vector<2x256xf32>
    %22 = math.exp %21 : vector<2x256xf32>
    %cst_14 = arith.constant 1.000000e+00 : f32
    %23 = vector.broadcast %cst_14 : f32 to vector<2x256xf32>
    %24 = arith.subf %22, %23 : vector<2x256xf32>
    %25 = arith.select %19, %7, %24 : vector<2x256xi1>, vector<2x256xf32>
    %c0_15 = arith.constant 0 : index
    %c0_16 = arith.constant 0 : index
    %26 = vector.load %arg4[%c0_15, %c0_16] : memref<1x256xf32, #tpu.memory_space<vmem>>, vector<1x256xf32>
    %27 = vector.broadcast %26 : vector<1x256xf32> to vector<2x256xf32>
    %28 = arith.mulf %17, %27 : vector<2x256xf32>
    %cst_17 = arith.constant dense<0.000000e+00> : vector<2xf32>
    %29 = vector.multi_reduction <add>, %28, %cst_17 [1] : vector<2x256xf32> to vector<2xf32>
    %30 = vector.shape_cast %29 : vector<2xf32> to vector<2x1xf32>
    %c0_18 = arith.constant 0 : index
    %c0_19 = arith.constant 0 : index
    %31 = vector.load %arg5[%c0_18, %c0_19] : memref<1x1xf32, #tpu.memory_space<vmem>>, vector<1x1xf32>
    %32 = vector.broadcast %31 : vector<1x1xf32> to vector<2x1xf32>
    %33 = arith.addf %30, %32 : vector<2x1xf32>
    %c0_20 = arith.constant 0 : index
    %c0_21 = arith.constant 0 : index
    %34 = vector.load %arg6[%c0_20, %c0_21] : memref<256x6xf32, #tpu.memory_space<vmem>>, vector<256x6xf32>
    %cst_22 = arith.constant dense<0.000000e+00> : vector<2x6xf32>
    %35 = tpu.matmul %25, %34, %cst_22 {dimension_numbers = #tpu.dot_dimension_numbers<[1], [0], [0], [1], [0, 0, 1, 1], [], []>} : vector<2x256xf32>, vector<256x6xf32>, vector<2x6xf32> -> vector<2x6xf32>
    %c0_23 = arith.constant 0 : index
    %c0_24 = arith.constant 0 : index
    %36 = vector.load %arg7[%c0_23, %c0_24] : memref<1x6xf32, #tpu.memory_space<vmem>>, vector<1x6xf32>
    %37 = vector.broadcast %36 : vector<1x6xf32> to vector<2x6xf32>
    %38 = arith.addf %35, %37 : vector<2x6xf32>
    %cst_25 = arith.constant dense<0.000000e+00> : vector<2xf32>
    %39 = vector.multi_reduction <add>, %38, %cst_25 [1] : vector<2x6xf32> to vector<2xf32>
    %40 = vector.shape_cast %39 : vector<2xf32> to vector<2x1xf32>
    %cst_26 = arith.constant 6.000000e+00 : f32
    %41 = vector.broadcast %cst_26 : f32 to vector<2x1xf32>
    %42 = arith.divf %40, %41 : vector<2x1xf32>
    %43 = vector.broadcast %42 : vector<2x1xf32> to vector<2x6xf32>
    %44 = arith.subf %38, %43 : vector<2x6xf32>
    %45 = vector.broadcast %33 : vector<2x1xf32> to vector<2x6xf32>
    %46 = arith.addf %45, %44 : vector<2x6xf32>
    %c0_27 = arith.constant 0 : index
    %c0_28 = arith.constant 0 : index
    %47 = vector.load %arg10[%c0_27, %c0_28] : memref<2x6xf32, #tpu.memory_space<vmem>>, vector<2x6xf32>
    tpu.vector_store %arg10[%c0_27, %c0_28], %46 {strides = array<i32>} : memref<2x6xf32, #tpu.memory_space<vmem>>, vector<2x6xf32>,
    return
  }
  func.func @transform_0(%arg0: i32) -> (i32, i32) {
    %c0_i32 = arith.constant 0 : i32
    %c0_i32_0 = arith.constant 0 : i32
    return %arg0, %c0_i32 : i32, i32
  }
  func.func @transform_1(%arg0: i32) -> (i32, i32) {
    %c0_i32 = arith.constant 0 : i32
    %c0_i32_0 = arith.constant 0 : i32
    %c0_i32_1 = arith.constant 0 : i32
    return %c0_i32, %c0_i32_0 : i32, i32
  }
  func.func @transform_2(%arg0: i32) -> (i32, i32) {
    %c0_i32 = arith.constant 0 : i32
    %c0_i32_0 = arith.constant 0 : i32
    %c0_i32_1 = arith.constant 0 : i32
    return %c0_i32, %c0_i32_0 : i32, i32
  }
  func.func @transform_3(%arg0: i32) -> (i32, i32) {
    %c0_i32 = arith.constant 0 : i32
    %c0_i32_0 = arith.constant 0 : i32
    %c0_i32_1 = arith.constant 0 : i32
    return %c0_i32, %c0_i32_0 : i32, i32
  }
  func.func @transform_4(%arg0: i32) -> (i32, i32) {
    %c0_i32 = arith.constant 0 : i32
    %c0_i32_0 = arith.constant 0 : i32
    %c0_i32_1 = arith.constant 0 : i32
    return %c0_i32, %c0_i32_0 : i32, i32
  }
  func.func @transform_5(%arg0: i32) -> (i32, i32) {
    %c0_i32 = arith.constant 0 : i32
    %c0_i32_0 = arith.constant 0 : i32
    %c0_i32_1 = arith.constant 0 : i32
    return %c0_i32, %c0_i32_0 : i32, i32
  }
  func.func @transform_6(%arg0: i32) -> (i32, i32) {
    %c0_i32 = arith.constant 0 : i32
    %c0_i32_0 = arith.constant 0 : i32
    %c0_i32_1 = arith.constant 0 : i32
    return %c0_i32, %c0_i32_0 : i32, i32
  }
  func.func @transform_7(%arg0: i32) -> (i32, i32) {
    %c0_i32 = arith.constant 0 : i32
    %c0_i32_0 = arith.constant 0 : i32
    return %arg0, %c0_i32 : i32, i32
  }
  func.func @transform_8(%arg0: i32) -> (i32, i32) {
    %c0_i32 = arith.constant 0 : i32
    %c0_i32_0 = arith.constant 0 : i32
    return %arg0, %c0_i32 : i32, i32
  }
  func.func @transform_9(%arg0: i32) -> (i32, i32) {
    %c0_i32 = arith.constant 0 : i32
    %c0_i32_0 = arith.constant 0 : i32
    return %arg0, %c0_i32 : i32, i32
  }
}

</mosaic_0001>

<bundles_post_ra>
// kernel: atari_dueling_dqn_forward.4
= control target key start
LH: loop header
LB: loop body
LE: loop exit
PB: predicated region body
PF: predicated region fallthrough
CT: control target
= control target key end

     0   :  { %vm588_vm0 = vcmask 261120   ;;  %s1287_s1 = inlined_call_operand.vmem [shape: f32[256,32], index: 1, kind: input, shape index: {}]   ;;  %s1288_s0 = inlined_call_operand.vmem [shape: f32[288,256], index: 0, kind: input, shape index: {}]   ;;  %s1289_s2 = inlined_call_operand.vmem [shape: f32[1,32], index: 2, kind: input, shape index: {}]   ;;  %s1290_s3 = inlined_call_operand.vmem [shape: f32[288,32], index: 3, kind: output, shape index: {}]  }
   0x1   :  { %v101_v0 = vld [vmem:[%s1287_s1 + $0x78] sm:$0xff]  ;;  %v100_v1 = vld [vmem:[%s1287_s1 + $0x70] sm:$0xff]  ;;  %v99_v4 = vld [vmem:[%s1287_s1 + $0x68] sm:$0xff] }
   0x2   :  { %v117_v2 = vld [vmem:[%s1287_s1 + $0xf8] sm:$0xff]  ;;  %122 = vmatpush.msra.mxu0 %v101_v0  ;;  %665 = vmatpush.msra.mxu2 %v101_v0  ;;  %v116_v3 = vld [vmem:[%s1287_s1 + $0xf0] sm:$0xff]  ;;  %v115_v5 = vld [vmem:[%s1287_s1 + $0xe8] sm:$0xff] }
   0x3   :  { %247 = vmatpush.msra.mxu1 %v117_v2  ;;  %681 = vmatpush.msra.mxu3 %v117_v2  ;;  %v98_v6 = vld [vmem:[%s1287_s1 + $0x60] sm:$0xff]  ;;  %v97_v8 = vld [vmem:[%s1287_s1 + $0x58] sm:$0xff]  ;;  %v96_v10 = vld [vmem:[%s1287_s1 + $0x50] sm:$0xff] }
   0x4   :  { %123 = vmatpush.msra.mxu0 %v100_v1  ;;  %666 = vmatpush.msra.mxu2 %v100_v1  ;;  %v114_v7 = vld [vmem:[%s1287_s1 + $0xe0] sm:$0xff]  ;;  %v113_v9 = vld [vmem:[%s1287_s1 + $0xd8] sm:$0xff]  ;;  %v112_v11 = vld [vmem:[%s1287_s1 + $0xd0] sm:$0xff] }
   0x5   :  { %248 = vmatpush.msra.mxu1 %v116_v3  ;;  %682 = vmatpush.msra.mxu3 %v116_v3  ;;  %v95_v12 = vld [vmem:[%s1287_s1 + $0x48] sm:$0xff]  ;;  %v94_v14 = vld [vmem:[%s1287_s1 + $0x40] sm:$0xff]  ;;  %v93_v16 = vld [vmem:[%s1287_s1 + $0x38] sm:$0xff] }
   0x6   :  { %124 = vmatpush.msra.mxu0 %v99_v4  ;;  %667 = vmatpush.msra.mxu2 %v99_v4  ;;  %v111_v13 = vld [vmem:[%s1287_s1 + $0xc8] sm:$0xff]  ;;  %v110_v15 = vld [vmem:[%s1287_s1 + $0xc0] sm:$0xff]  ;;  %v109_v17 = vld [vmem:[%s1287_s1 + $0xb8] sm:$0xff] }
   0x7   :  { %249 = vmatpush.msra.mxu1 %v115_v5  ;;  %683 = vmatpush.msra.mxu3 %v115_v5  ;;  %v92_v18 = vld [vmem:[%s1287_s1 + $0x30] sm:$0xff]  ;;  %v91_v20 = vld [vmem:[%s1287_s1 + $0x28] sm:$0xff]  ;;  %v90_v22 = vld [vmem:[%s1287_s1 + $0x20] sm:$0xff] }
   0x8   :  { %125 = vmatpush.msra.mxu0 %v98_v6  ;;  %668 = vmatpush.msra.mxu2 %v98_v6  ;;  %v108_v19 = vld [vmem:[%s1287_s1 + $0xb0] sm:$0xff]  ;;  %v107_v21 = vld [vmem:[%s1287_s1 + $0xa8] sm:$0xff]  ;;  %v106_v23 = vld [vmem:[%s1287_s1 + $0xa0] sm:$0xff] }
   0x9   :  { %250 = vmatpush.msra.mxu1 %v114_v7  ;;  %684 = vmatpush.msra.mxu3 %v114_v7  ;;  %v89_v24 = vld [vmem:[%s1287_s1 + $0x18] sm:$0xff]  ;;  %v88_v26 = vld [vmem:[%s1287_s1 + $0x10] sm:$0xff]  ;;  %v87_v28 = vld [vmem:[%s1287_s1 + $0x8] sm:$0xff] }
   0xa   :  { %126 = vmatpush.msra.mxu0 %v97_v8  ;;  %669 = vmatpush.msra.mxu2 %v97_v8  ;;  %v105_v25 = vld [vmem:[%s1287_s1 + $0x98] sm:$0xff]  ;;  %v104_v27 = vld [vmem:[%s1287_s1 + $0x90] sm:$0xff]  ;;  %v103_v29 = vld [vmem:[%s1287_s1 + $0x88] sm:$0xff] }
   0xb   :  { %251 = vmatpush.msra.mxu1 %v113_v9  ;;  %685 = vmatpush.msra.mxu3 %v113_v9  ;;  %v86_v30 = vld [vmem:[%s1287_s1] sm:$0xff]  ;;  %v15_v34 = vld [vmem:[%s1288_s0 + $0x8] sm:$0xff]  ;;  %v16_v36 = vld [vmem:[%s1288_s0 + $0x10] sm:$0xff] }
   0xc   :  { %127 = vmatpush.msra.mxu0 %v96_v10  ;;  %670 = vmatpush.msra.mxu2 %v96_v10  ;;  %v14_v31 = vld [vmem:[%s1288_s0] sm:$0xff]  ;;  %v51_v35 = vld [vmem:[%s1288_s0 + $0x128] sm:$0xff]  ;;  %v52_v37 = vld [vmem:[%s1288_s0 + $0x130] sm:$0xff] }
   0xd   :  { %252 = vmatpush.msra.mxu1 %v112_v11  ;;  %686 = vmatpush.msra.mxu3 %v112_v11  ;;  %v50_v32 = vld [vmem:[%s1288_s0 + $0x120] sm:$0xff]  ;;  %v17_v38 = vld [vmem:[%s1288_s0 + $0x18] sm:$0xff]  ;;  %v19_v42 = vld [vmem:[%s1288_s0 + $0x28] sm:$0xff] }
   0xe   :  { %128 = vmatpush.msra.mxu0 %v95_v12  ;;  %671 = vmatpush.msra.mxu2 %v95_v12  ;;  %v102_v33 = vld [vmem:[%s1287_s1 + $0x80] sm:$0xff]  ;;  %v53_v39 = vld [vmem:[%s1288_s0 + $0x138] sm:$0xff]  ;;  %v55_v43 = vld [vmem:[%s1288_s0 + $0x148] sm:$0xff] }
   0xf   :  { %253 = vmatpush.msra.mxu1 %v111_v13  ;;  %687 = vmatpush.msra.mxu3 %v111_v13  ;;  %v18_v40 = vld [vmem:[%s1288_s0 + $0x20] sm:$0xff]  ;;  %v20_v44 = vld [vmem:[%s1288_s0 + $0x30] sm:$0xff]  ;;  %v21_v46 = vld [vmem:[%s1288_s0 + $0x38] sm:$0xff] }
  0x10   :  { %129 = vmatpush.msra.mxu0 %v94_v14  ;;  %672 = vmatpush.msra.mxu2 %v94_v14  ;;  %v54_v41 = vld [vmem:[%s1288_s0 + $0x140] sm:$0xff]  ;;  %v56_v45 = vld [vmem:[%s1288_s0 + $0x150] sm:$0xff]  ;;  %v57_v47 = vld [vmem:[%s1288_s0 + $0x158] sm:$0xff] }
  0x11   :  { %254 = vmatpush.msra.mxu1 %v110_v15  ;;  %688 = vmatpush.msra.mxu3 %v110_v15  ;;  %v22_v48 = vld [vmem:[%s1288_s0 + $0x40] sm:$0xff]  ;;  %v23_v50 = vld [vmem:[%s1288_s0 + $0x48] sm:$0xff]  ;;  %v24_v52 = vld [vmem:[%s1288_s0 + $0x50] sm:$0xff] }
  0x12   :  { %130 = vmatpush.msra.mxu0 %v93_v16  ;;  %673 = vmatpush.msra.mxu2 %v93_v16  ;;  %v58_v49 = vld [vmem:[%s1288_s0 + $0x160] sm:$0xff]  ;;  %v59_v51 = vld [vmem:[%s1288_s0 + $0x168] sm:$0xff]  ;;  %v60_v53 = vld [vmem:[%s1288_s0 + $0x170] sm:$0xff] }
  0x13   :  { %255 = vmatpush.msra.mxu1 %v109_v17  ;;  %689 = vmatpush.msra.mxu3 %v109_v17  ;;  %v25_v54 = vld [vmem:[%s1288_s0 + $0x58] sm:$0xff]  ;;  %v26_v56 = vld [vmem:[%s1288_s0 + $0x60] sm:$0xff]  ;;  %v27_v58 = vld [vmem:[%s1288_s0 + $0x68] sm:$0xff] }
  0x14   :  { %131 = vmatpush.msra.mxu0 %v92_v18  ;;  %674 = vmatpush.msra.mxu2 %v92_v18  ;;  %v61_v55 = vld [vmem:[%s1288_s0 + $0x178] sm:$0xff]  ;;  %v62_v57 = vld [vmem:[%s1288_s0 + $0x180] sm:$0xff]  ;;  %v63_v59 = vld [vmem:[%s1288_s0 + $0x188] sm:$0xff] }
  0x15   :  { %256 = vmatpush.msra.mxu1 %v108_v19  ;;  %690 = vmatpush.msra.mxu3 %v108_v19  ;;  %v28_v60 = vld [vmem:[%s1288_s0 + $0x70] sm:$0xff]  ;;  %v29_v62 = vld [vmem:[%s1288_s0 + $0x78] sm:$0xff]  ;;  %v30_v0 = vld [vmem:[%s1288_s0 + $0x80] sm:$0xff] }
  0x16   :  { %132 = vmatpush.msra.mxu0 %v91_v20  ;;  %675 = vmatpush.msra.mxu2 %v91_v20  ;;  %v64_v61 = vld [vmem:[%s1288_s0 + $0x190] sm:$0xff]  ;;  %v65_v63 = vld [vmem:[%s1288_s0 + $0x198] sm:$0xff]  ;;  %v66_v1 = vld [vmem:[%s1288_s0 + $0x1a0] sm:$0xff] }
  0x17   :  { %257 = vmatpush.msra.mxu1 %v107_v21  ;;  %691 = vmatpush.msra.mxu3 %v107_v21  ;;  %v31_v2 = vld [vmem:[%s1288_s0 + $0x88] sm:$0xff]  ;;  %v32_v4 = vld [vmem:[%s1288_s0 + $0x90] sm:$0xff]  ;;  %v33_v6 = vld [vmem:[%s1288_s0 + $0x98] sm:$0xff] }
  0x18   :  { %133 = vmatpush.msra.mxu0 %v90_v22  ;;  %676 = vmatpush.msra.mxu2 %v90_v22  ;;  %v67_v3 = vld [vmem:[%s1288_s0 + $0x1a8] sm:$0xff]  ;;  %v68_v5 = vld [vmem:[%s1288_s0 + $0x1b0] sm:$0xff]  ;;  %v69_v7 = vld [vmem:[%s1288_s0 + $0x1b8] sm:$0xff] }
  0x19   :  { %258 = vmatpush.msra.mxu1 %v106_v23  ;;  %692 = vmatpush.msra.mxu3 %v106_v23  ;;  %v34_v8 = vld [vmem:[%s1288_s0 + $0xa0] sm:$0xff]  ;;  %v35_v10 = vld [vmem:[%s1288_s0 + $0xa8] sm:$0xff]  ;;  %v36_v12 = vld [vmem:[%s1288_s0 + $0xb0] sm:$0xff] }
  0x1a   :  { %134 = vmatpush.msra.mxu0 %v89_v24  ;;  %677 = vmatpush.msra.mxu2 %v89_v24  ;;  %v70_v9 = vld [vmem:[%s1288_s0 + $0x1c0] sm:$0xff]  ;;  %v71_v11 = vld [vmem:[%s1288_s0 + $0x1c8] sm:$0xff]  ;;  %v72_v13 = vld [vmem:[%s1288_s0 + $0x1d0] sm:$0xff] }
  0x1b   :  { %259 = vmatpush.msra.mxu1 %v105_v25  ;;  %693 = vmatpush.msra.mxu3 %v105_v25  ;;  %v37_v14 = vld [vmem:[%s1288_s0 + $0xb8] sm:$0xff]  ;;  %v38_v16 = vld [vmem:[%s1288_s0 + $0xc0] sm:$0xff]  ;;  %v39_v18 = vld [vmem:[%s1288_s0 + $0xc8] sm:$0xff] }
  0x1c   :  { %135 = vmatpush.msra.mxu0 %v88_v26  ;;  %678 = vmatpush.msra.mxu2 %v88_v26  ;;  %v73_v15 = vld [vmem:[%s1288_s0 + $0x1d8] sm:$0xff]  ;;  %v74_v17 = vld [vmem:[%s1288_s0 + $0x1e0] sm:$0xff]  ;;  %v75_v19 = vld [vmem:[%s1288_s0 + $0x1e8] sm:$0xff] }
  0x1d   :  { %260 = vmatpush.msra.mxu1 %v104_v27  ;;  %694 = vmatpush.msra.mxu3 %v104_v27  ;;  %v40_v20 = vld [vmem:[%s1288_s0 + $0xd0] sm:$0xff]  ;;  %v41_v22 = vld [vmem:[%s1288_s0 + $0xd8] sm:$0xff]  ;;  %v42_v24 = vld [vmem:[%s1288_s0 + $0xe0] sm:$0xff] }
  0x1e   :  { %136 = vmatpush.msra.mxu0 %v87_v28  ;;  %679 = vmatpush.msra.mxu2 %v87_v28  ;;  %v76_v21 = vld [vmem:[%s1288_s0 + $0x1f0] sm:$0xff]  ;;  %v77_v23 = vld [vmem:[%s1288_s0 + $0x1f8] sm:$0xff]  ;;  %v78_v25 = vld [vmem:[%s1288_s0 + $0x200] sm:$0xff] }
  0x1f   :  { %261 = vmatpush.msra.mxu1 %v103_v29  ;;  %695 = vmatpush.msra.mxu3 %v103_v29  ;;  %v43_v26 = vld [vmem:[%s1288_s0 + $0xe8] sm:$0xff]  ;;  %v44_v28 = vld [vmem:[%s1288_s0 + $0xf0] sm:$0xff] }
  0x20   :  { %137 = vmatpush.msra.mxu0 %v86_v30  ;;  %680 = vmatpush.msra.mxu2 %v86_v30  ;;  %v79_v27 = vld [vmem:[%s1288_s0 + $0x208] sm:$0xff]  ;;  %v80_v29 = vld [vmem:[%s1288_s0 + $0x210] sm:$0xff]  ;;  %v45_v30 = vld [vmem:[%s1288_s0 + $0xf8] sm:$0xff] }
  0x21   :  { %138 = vmatmul.f32.vlgmr.msra.gmra.mxu0 %v14_v31  ;;  %192 = vmatmul.f32.vlgmr.msra.gmra.mxu2 %v50_v32  ;;  %v81_v31 = vld [vmem:[%s1288_s0 + $0x218] sm:$0xff]  ;;  %v1081_v32 = vld [vmem:[%s1289_s2] ss:$0 sm:$0xff] }
  0x22   :  { %262 = vmatpush.msra.mxu1 %v102_v33  ;;  %696 = vmatpush.msra.mxu3 %v102_v33 }
  0x23   :  { %263 = vmatmul.f32.vlgmr.msra.gmra.mxu1 %v15_v34  ;;  %317 = vmatmul.f32.vlgmr.msra.gmra.mxu3 %v51_v35  ;;  %v46_v34 = vld [vmem:[%s1288_s0 + $0x100] sm:$0xff] }
  0x24   :  { %v82_v35 = vld [vmem:[%s1288_s0 + $0x220] sm:$0xff] }
  0x29   :  { %141 = vmatmul.f32.gmra.mxu0 %v16_v36  ;;  %195 = vmatmul.f32.gmra.mxu2 %v52_v37 }
  0x2b   :  { %266 = vmatmul.f32.gmra.mxu1 %v17_v38  ;;  %320 = vmatmul.f32.gmra.mxu3 %v53_v39  ;;  %v47_v38 = vld [vmem:[%s1288_s0 + $0x108] sm:$0xff] }
  0x2c   :  { %v83_v39 = vld [vmem:[%s1288_s0 + $0x228] sm:$0xff] }
  0x31   :  { %144 = vmatmul.f32.gmra.mxu0 %v18_v40  ;;  %198 = vmatmul.f32.gmra.mxu2 %v54_v41 }
  0x33   :  { %269 = vmatmul.f32.gmra.mxu1 %v19_v42  ;;  %323 = vmatmul.f32.gmra.mxu3 %v55_v43 }
  0x39   :  { %147 = vmatmul.f32.gmra.mxu0 %v20_v44  ;;  %201 = vmatmul.f32.gmra.mxu2 %v56_v45 }
  0x3b   :  { %272 = vmatmul.f32.gmra.mxu1 %v21_v46  ;;  %326 = vmatmul.f32.gmra.mxu3 %v57_v47  ;;  %v48_v47 = vld [vmem:[%s1288_s0 + $0x110] sm:$0xff] }
  0x41   :  { %150 = vmatmul.f32.gmra.mxu0 %v22_v48  ;;  %204 = vmatmul.f32.gmra.mxu2 %v58_v49  ;;  %v84_v48 = vld [vmem:[%s1288_s0 + $0x230] sm:$0xff] }
  0x43   :  { %275 = vmatmul.f32.gmra.mxu1 %v23_v50  ;;  %329 = vmatmul.f32.gmra.mxu3 %v59_v51 }
  0x49   :  { %153 = vmatmul.f32.gmra.mxu0 %v24_v52  ;;  %207 = vmatmul.f32.gmra.mxu2 %v60_v53  ;;  %v49_v52 = vld [vmem:[%s1288_s0 + $0x118] sm:$0xff] }
  0x4a   :  { %v85_v53 = vld [vmem:[%s1288_s0 + $0x238] sm:$0xff] }
  0x4b   :  { %278 = vmatmul.f32.gmra.mxu1 %v25_v54  ;;  %332 = vmatmul.f32.gmra.mxu3 %v61_v55 }
  0x51   :  { %156 = vmatmul.f32.gmra.mxu0 %v26_v56  ;;  %210 = vmatmul.f32.gmra.mxu2 %v62_v57 }
  0x53   :  { %281 = vmatmul.f32.gmra.mxu1 %v27_v58  ;;  %335 = vmatmul.f32.gmra.mxu3 %v63_v59 }
  0x59   :  { %159 = vmatmul.f32.gmra.mxu0 %v28_v60  ;;  %213 = vmatmul.f32.gmra.mxu2 %v64_v61 }
  0x5b   :  { %284 = vmatmul.f32.gmra.mxu1 %v29_v62  ;;  %338 = vmatmul.f32.gmra.mxu3 %v65_v63 }
  0x61   :  { %162 = vmatmul.f32.gmra.mxu0 %v30_v0  ;;  %216 = vmatmul.f32.gmra.mxu2 %v66_v1 }
  0x63   :  { %287 = vmatmul.f32.gmra.mxu1 %v31_v2  ;;  %341 = vmatmul.f32.gmra.mxu3 %v67_v3 }
  0x69   :  { %165 = vmatmul.f32.gmra.mxu0 %v32_v4  ;;  %219 = vmatmul.f32.gmra.mxu2 %v68_v5 }
  0x6b   :  { %290 = vmatmul.f32.gmra.mxu1 %v33_v6  ;;  %344 = vmatmul.f32.gmra.mxu3 %v69_v7 }
  0x71   :  { %168 = vmatmul.f32.gmra.mxu0 %v34_v8  ;;  %222 = vmatmul.f32.gmra.mxu2 %v70_v9 }
  0x73   :  { %293 = vmatmul.f32.gmra.mxu1 %v35_v10  ;;  %347 = vmatmul.f32.gmra.mxu3 %v71_v11 }
  0x79   :  { %171 = vmatmul.f32.gmra.mxu0 %v36_v12  ;;  %225 = vmatmul.f32.gmra.mxu2 %v72_v13 }
  0x7b   :  { %296 = vmatmul.f32.gmra.mxu1 %v37_v14  ;;  %350 = vmatmul.f32.gmra.mxu3 %v73_v15 }
  0x81   :  { %174 = vmatmul.f32.gmra.mxu0 %v38_v16  ;;  %228 = vmatmul.f32.gmra.mxu2 %v74_v17 }
  0x83   :  { %299 = vmatmul.f32.gmra.mxu1 %v39_v18  ;;  %353 = vmatmul.f32.gmra.mxu3 %v75_v19 }
  0x89   :  { %177 = vmatmul.f32.gmra.mxu0 %v40_v20  ;;  %231 = vmatmul.f32.gmra.mxu2 %v76_v21 }
  0x8b   :  { %302 = vmatmul.f32.gmra.mxu1 %v41_v22  ;;  %356 = vmatmul.f32.gmra.mxu3 %v77_v23 }
  0x91   :  { %180 = vmatmul.f32.gmra.mxu0 %v42_v24  ;;  %234 = vmatmul.f32.gmra.mxu2 %v78_v25 }
  0x93   :  { %305 = vmatmul.f32.gmra.mxu1 %v43_v26  ;;  %359 = vmatmul.f32.gmra.mxu3 %v79_v27 }
  0x99   :  { %183 = vmatmul.f32.gmra.mxu0 %v44_v28  ;;  %237 = vmatmul.f32.gmra.mxu2 %v80_v29 }
  0x9b   :  { %308 = vmatmul.f32.gmra.mxu1 %v45_v30  ;;  %362 = vmatmul.f32.gmra.mxu3 %v81_v31 }
  0x9e   :  { %v139_v33 = vpop.f32.mrf.mxu0 }
  0x9f   :  { %v140_v36 = vadd.f32 %v1081_v32, %v139_v33 }
  0xa0   :  { %v264_v37 = vpop.f32.mrf.mxu1 }
  0xa1   :  { %v265_v40 = vadd.f32 %v264_v37, %v140_v36  ;;  %186 = vmatmul.f32.gmra.mxu0 %v46_v34  ;;  %240 = vmatmul.f32.gmra.mxu2 %v82_v35 }
  0xa3   :  { %v408_v41 = vmin.f32 %v265_v40, 0.0  ;;  %311 = vmatmul.f32.gmra.mxu1 %v47_v38  ;;  %365 = vmatmul.f32.gmra.mxu3 %v83_v39  ;;  %vm372_vm1 = vcmp.gt.f32.partialorder %v265_v40, 0.0 }
  0xa4   :  { %v193_v42 = vpop.f32.mrf.mxu2 }
  0xa5   :  { %v444_v43 = vmul.f32 1.442695, %v408_v41  ;;  %v194_v44 = vadd.f32 %v1081_v32, %v193_v42 }
  0xa6   :  { %v142_v45 = vpop.f32.mrf.mxu0  ;;  %v318_v46 = vpop.f32.mrf.mxu3 }
  0xa7   :  { %698 = vpow2.f32 %v444_v43  ;;  %v143_v49 = vadd.f32 %v1081_v32, %v142_v45  ;;  %v319_v50 = vadd.f32 %v318_v46, %v194_v44 }
  0xa8   :  { %v267_v51 = vpop.f32.mrf.mxu1 }
  0xa9   :  { %v426_v54 = vmin.f32 %v319_v50, 0.0  ;;  %v268_v55 = vadd.f32 %v267_v51, %v143_v49  ;;  %189 = vmatmul.f32.gmra.mxu0 %v48_v47  ;;  %243 = vmatmul.f32.gmra.mxu2 %v84_v48  ;;  %vm390_vm2 = vcmp.gt.f32.partialorder %v319_v50, 0.0 }
  0xab   :  { %v480_v56 = vmul.f32 1.442695, %v426_v54  ;;  %v409_v57 = vmin.f32 %v268_v55, 0.0  ;;  %314 = vmatmul.f32.gmra.mxu1 %v49_v52  ;;  %368 = vmatmul.f32.gmra.mxu3 %v85_v53  ;;  %vm373_vm3 = vcmp.gt.f32.partialorder %v268_v55, 0.0 }
  0xac   :  { %v196_v58 = vpop.f32.mrf.mxu2 }
  0xad   :  { %v699_v59 = vpop.eup %698  ;;  %700 = vpow2.f32 %v480_v56  ;;  %v446_v60 = vmul.f32 1.442695, %v409_v57  ;;  %v197_v61 = vadd.f32 %v1081_v32, %v196_v58 }
  0xae   :  { %v629_v62 = vadd.f32 -1.0, %v699_v59  ;;  %v145_v63 = vpop.f32.mrf.mxu0  ;;  %v321_v0 = vpop.f32.mrf.mxu3 }
  0xaf   :  { %702 = vpow2.f32 %v446_v60  ;;  %v146_v1 = vadd.f32 %v1081_v32, %v145_v63  ;;  %v322_v2 = vadd.f32 %v321_v0, %v197_v61 }
  0xb0   :  { %v552_v3 = vsel %vm372_vm1, %v265_v40, %v629_v62  ;;  %v270_v4 = vpop.f32.mrf.mxu1 }
  0xb1   :  { %589 = vst.msk [vmem:[%s1290_s3] sm:$0xff] %vm588_vm0, %v552_v3  ;;  %v427_v5 = vmin.f32 %v322_v2, 0.0  ;;  %v271_v6 = vadd.f32 %v270_v4, %v146_v1  ;;  %vm391_vm4 = vcmp.gt.f32.partialorder %v322_v2, 0.0 }
  0xb3   :  { %v701_v7 = vpop.eup %700  ;;  %v482_v8 = vmul.f32 1.442695, %v427_v5  ;;  %v410_v9 = vmin.f32 %v271_v6, 0.0  ;;  %vm374_vm5 = vcmp.gt.f32.partialorder %v271_v6, 0.0 }
  0xb4   :  { %v647_v10 = vadd.f32 -1.0, %v701_v7  ;;  %v199_v11 = vpop.f32.mrf.mxu2 }
  0xb5   :  { %v703_v12 = vpop.eup %702  ;;  %704 = vpow2.f32 %v482_v8  ;;  %v448_v13 = vmul.f32 1.442695, %v410_v9  ;;  %v200_v14 = vadd.f32 %v1081_v32, %v199_v11 }
  0xb6   :  { %v570_v15 = vsel %vm390_vm2, %v319_v50, %v647_v10  ;;  %v630_v16 = vadd.f32 -1.0, %v703_v12  ;;  %v148_v17 = vpop.f32.mrf.mxu0  ;;  %v324_v18 = vpop.f32.mrf.mxu3 }
  0xb7   :  { %607 = vst.msk [vmem:[%s1290_s3 + $0x90] sm:$0xff] %vm588_vm0, %v570_v15  ;;  %706 = vpow2.f32 %v448_v13  ;;  %v149_v19 = vadd.f32 %v1081_v32, %v148_v17  ;;  %v325_v20 = vadd.f32 %v324_v18, %v200_v14 }
  0xb8   :  { %v553_v21 = vsel %vm373_vm3, %v268_v55, %v630_v16  ;;  %v273_v22 = vpop.f32.mrf.mxu1 }
  0xb9   :  { %590 = vst.msk [vmem:[%s1290_s3 + $0x8] sm:$0xff] %vm588_vm0, %v553_v21  ;;  %v428_v23 = vmin.f32 %v325_v20, 0.0  ;;  %v274_v24 = vadd.f32 %v273_v22, %v149_v19  ;;  %vm392_vm6 = vcmp.gt.f32.partialorder %v325_v20, 0.0 }
  0xbb   :  { %v705_v25 = vpop.eup %704  ;;  %v484_v26 = vmul.f32 1.442695, %v428_v23  ;;  %v411_v27 = vmin.f32 %v274_v24, 0.0  ;;  %vm375_vm7 = vcmp.gt.f32.partialorder %v274_v24, 0.0 }
  0xbc   :  { %v648_v28 = vadd.f32 -1.0, %v705_v25  ;;  %v202_v29 = vpop.f32.mrf.mxu2 }
  0xbd   :  { %v707_v30 = vpop.eup %706  ;;  %708 = vpow2.f32 %v484_v26  ;;  %v450_v31 = vmul.f32 1.442695, %v411_v27  ;;  %v203_v33 = vadd.f32 %v1081_v32, %v202_v29 }
  0xbe   :  { %v571_v34 = vsel %vm391_vm4, %v322_v2, %v648_v28  ;;  %v631_v35 = vadd.f32 -1.0, %v707_v30  ;;  %v151_v36 = vpop.f32.mrf.mxu0  ;;  %v327_v37 = vpop.f32.mrf.mxu3 }
  0xbf   :  { %608 = vst.msk [vmem:[%s1290_s3 + $0x98] sm:$0xff] %vm588_vm0, %v571_v34  ;;  %710 = vpow2.f32 %v450_v31  ;;  %v152_v38 = vadd.f32 %v1081_v32, %v151_v36  ;;  %v328_v39 = vadd.f32 %v327_v37, %v203_v33 }
  0xc0   :  { %v554_v40 = vsel %vm374_vm5, %v271_v6, %v631_v35  ;;  %v276_v41 = vpop.f32.mrf.mxu1 }
  0xc1   :  { %591 = vst.msk [vmem:[%s1290_s3 + $0x10] sm:$0xff] %vm588_vm0, %v554_v40  ;;  %v429_v42 = vmin.f32 %v328_v39, 0.0  ;;  %v277_v43 = vadd.f32 %v276_v41, %v152_v38  ;;  %vm393_vm8 = vcmp.gt.f32.partialorder %v328_v39, 0.0 }
  0xc3   :  { %v709_v44 = vpop.eup %708  ;;  %v486_v45 = vmul.f32 1.442695, %v429_v42  ;;  %v412_v46 = vmin.f32 %v277_v43, 0.0  ;;  %vm376_vm9 = vcmp.gt.f32.partialorder %v277_v43, 0.0 }
  0xc4   :  { %v649_v47 = vadd.f32 -1.0, %v709_v44  ;;  %v205_v48 = vpop.f32.mrf.mxu2 }
  0xc5   :  { %v711_v49 = vpop.eup %710  ;;  %712 = vpow2.f32 %v486_v45  ;;  %v452_v50 = vmul.f32 1.442695, %v412_v46  ;;  %v206_v51 = vadd.f32 %v1081_v32, %v205_v48 }
  0xc6   :  { %v572_v52 = vsel %vm392_vm6, %v325_v20, %v649_v47  ;;  %v632_v53 = vadd.f32 -1.0, %v711_v49  ;;  %v154_v54 = vpop.f32.mrf.mxu0  ;;  %v330_v55 = vpop.f32.mrf.mxu3 }
  0xc7   :  { %609 = vst.msk [vmem:[%s1290_s3 + $0xa0] sm:$0xff] %vm588_vm0, %v572_v52  ;;  %714 = vpow2.f32 %v452_v50  ;;  %v155_v56 = vadd.f32 %v1081_v32, %v154_v54  ;;  %v331_v57 = vadd.f32 %v330_v55, %v206_v51 }
  0xc8   :  { %v555_v58 = vsel %vm375_vm7, %v274_v24, %v632_v53  ;;  %v279_v59 = vpop.f32.mrf.mxu1 }
  0xc9   :  { %592 = vst.msk [vmem:[%s1290_s3 + $0x18] sm:$0xff] %vm588_vm0, %v555_v58  ;;  %v430_v60 = vmin.f32 %v331_v57, 0.0  ;;  %v280_v61 = vadd.f32 %v279_v59, %v155_v56  ;;  %vm394_vm10 = vcmp.gt.f32.partialorder %v331_v57, 0.0 }
  0xcb   :  { %v713_v62 = vpop.eup %712  ;;  %v488_v63 = vmul.f32 1.442695, %v430_v60  ;;  %v413_v0 = vmin.f32 %v280_v61, 0.0  ;;  %vm377_vm11 = vcmp.gt.f32.partialorder %v280_v61, 0.0 }
  0xcc   :  { %v650_v1 = vadd.f32 -1.0, %v713_v62  ;;  %v208_v2 = vpop.f32.mrf.mxu2 }
  0xcd   :  { %v715_v3 = vpop.eup %714  ;;  %716 = vpow2.f32 %v488_v63  ;;  %v454_v4 = vmul.f32 1.442695, %v413_v0  ;;  %v209_v5 = vadd.f32 %v1081_v32, %v208_v2 }
  0xce   :  { %v573_v6 = vsel %vm393_vm8, %v328_v39, %v650_v1  ;;  %v633_v7 = vadd.f32 -1.0, %v715_v3  ;;  %v157_v8 = vpop.f32.mrf.mxu0  ;;  %v333_v9 = vpop.f32.mrf.mxu3 }
  0xcf   :  { %610 = vst.msk [vmem:[%s1290_s3 + $0xa8] sm:$0xff] %vm588_vm0, %v573_v6  ;;  %718 = vpow2.f32 %v454_v4  ;;  %v158_v10 = vadd.f32 %v1081_v32, %v157_v8  ;;  %v334_v11 = vadd.f32 %v333_v9, %v209_v5 }
  0xd0   :  { %v556_v12 = vsel %vm376_vm9, %v277_v43, %v633_v7  ;;  %v282_v13 = vpop.f32.mrf.mxu1 }
  0xd1   :  { %593 = vst.msk [vmem:[%s1290_s3 + $0x20] sm:$0xff] %vm588_vm0, %v556_v12  ;;  %v431_v14 = vmin.f32 %v334_v11, 0.0  ;;  %v283_v15 = vadd.f32 %v282_v13, %v158_v10  ;;  %vm395_vm12 = vcmp.gt.f32.partialorder %v334_v11, 0.0 }
  0xd3   :  { %v717_v16 = vpop.eup %716  ;;  %v490_v17 = vmul.f32 1.442695, %v431_v14  ;;  %v414_v18 = vmin.f32 %v283_v15, 0.0  ;;  %vm378_vm13 = vcmp.gt.f32.partialorder %v283_v15, 0.0 }
  0xd4   :  { %v651_v19 = vadd.f32 -1.0, %v717_v16  ;;  %v211_v20 = vpop.f32.mrf.mxu2 }
  0xd5   :  { %v719_v21 = vpop.eup %718  ;;  %720 = vpow2.f32 %v490_v17  ;;  %v456_v22 = vmul.f32 1.442695, %v414_v18  ;;  %v212_v23 = vadd.f32 %v1081_v32, %v211_v20 }
  0xd6   :  { %v574_v24 = vsel %vm394_vm10, %v331_v57, %v651_v19  ;;  %v634_v25 = vadd.f32 -1.0, %v719_v21  ;;  %v160_v26 = vpop.f32.mrf.mxu0  ;;  %v336_v27 = vpop.f32.mrf.mxu3 }
  0xd7   :  { %611 = vst.msk [vmem:[%s1290_s3 + $0xb0] sm:$0xff] %vm588_vm0, %v574_v24  ;;  %722 = vpow2.f32 %v456_v22  ;;  %v161_v28 = vadd.f32 %v1081_v32, %v160_v26  ;;  %v337_v29 = vadd.f32 %v336_v27, %v212_v23 }
  0xd8   :  { %v557_v30 = vsel %vm377_vm11, %v280_v61, %v634_v25  ;;  %v285_v31 = vpop.f32.mrf.mxu1 }
  0xd9   :  { %594 = vst.msk [vmem:[%s1290_s3 + $0x28] sm:$0xff] %vm588_vm0, %v557_v30  ;;  %v432_v33 = vmin.f32 %v337_v29, 0.0  ;;  %v286_v34 = vadd.f32 %v285_v31, %v161_v28  ;;  %vm396_vm14 = vcmp.gt.f32.partialorder %v337_v29, 0.0 }
  0xdb   :  { %v721_v35 = vpop.eup %720  ;;  %v492_v36 = vmul.f32 1.442695, %v432_v33  ;;  %v415_v37 = vmin.f32 %v286_v34, 0.0  ;;  %vm379_vm15 = vcmp.gt.f32.partialorder %v286_v34, 0.0 }
  0xdc   :  { %v652_v38 = vadd.f32 -1.0, %v721_v35  ;;  %v214_v39 = vpop.f32.mrf.mxu2 }
  0xdd   :  { %v723_v40 = vpop.eup %722  ;;  %724 = vpow2.f32 %v492_v36  ;;  %v458_v41 = vmul.f32 1.442695, %v415_v37  ;;  %v215_v42 = vadd.f32 %v1081_v32, %v214_v39 }
  0xde   :  { %v575_v43 = vsel %vm395_vm12, %v334_v11, %v652_v38  ;;  %v635_v44 = vadd.f32 -1.0, %v723_v40  ;;  %v163_v45 = vpop.f32.mrf.mxu0  ;;  %v339_v46 = vpop.f32.mrf.mxu3 }
  0xdf   :  { %612 = vst.msk [vmem:[%s1290_s3 + $0xb8] sm:$0xff] %vm588_vm0, %v575_v43  ;;  %726 = vpow2.f32 %v458_v41  ;;  %v164_v47 = vadd.f32 %v1081_v32, %v163_v45  ;;  %v340_v48 = vadd.f32 %v339_v46, %v215_v42 }
  0xe0   :  { %v558_v49 = vsel %vm378_vm13, %v283_v15, %v635_v44  ;;  %v288_v50 = vpop.f32.mrf.mxu1 }
  0xe1   :  { %595 = vst.msk [vmem:[%s1290_s3 + $0x30] sm:$0xff] %vm588_vm0, %v558_v49  ;;  %v433_v51 = vmin.f32 %v340_v48, 0.0  ;;  %v289_v52 = vadd.f32 %v288_v50, %v164_v47  ;;  %vm397_vm1 = vcmp.gt.f32.partialorder %v340_v48, 0.0 }
  0xe3   :  { %v725_v53 = vpop.eup %724  ;;  %v494_v54 = vmul.f32 1.442695, %v433_v51  ;;  %v416_v55 = vmin.f32 %v289_v52, 0.0  ;;  %vm380_vm2 = vcmp.gt.f32.partialorder %v289_v52, 0.0 }
  0xe4   :  { %v653_v56 = vadd.f32 -1.0, %v725_v53  ;;  %v217_v57 = vpop.f32.mrf.mxu2 }
  0xe5   :  { %v727_v58 = vpop.eup %726  ;;  %728 = vpow2.f32 %v494_v54  ;;  %v460_v59 = vmul.f32 1.442695, %v416_v55  ;;  %v218_v60 = vadd.f32 %v1081_v32, %v217_v57 }
  0xe6   :  { %v576_v61 = vsel %vm396_vm14, %v337_v29, %v653_v56  ;;  %v636_v62 = vadd.f32 -1.0, %v727_v58  ;;  %v166_v63 = vpop.f32.mrf.mxu0  ;;  %v342_v0 = vpop.f32.mrf.mxu3 }
  0xe7   :  { %613 = vst.msk [vmem:[%s1290_s3 + $0xc0] sm:$0xff] %vm588_vm0, %v576_v61  ;;  %730 = vpow2.f32 %v460_v59  ;;  %v167_v1 = vadd.f32 %v1081_v32, %v166_v63  ;;  %v343_v2 = vadd.f32 %v342_v0, %v218_v60 }
  0xe8   :  { %v559_v3 = vsel %vm379_vm15, %v286_v34, %v636_v62  ;;  %v291_v4 = vpop.f32.mrf.mxu1 }
  0xe9   :  { %596 = vst.msk [vmem:[%s1290_s3 + $0x38] sm:$0xff] %vm588_vm0, %v559_v3  ;;  %v434_v5 = vmin.f32 %v343_v2, 0.0  ;;  %v292_v6 = vadd.f32 %v291_v4, %v167_v1  ;;  %vm398_vm3 = vcmp.gt.f32.partialorder %v343_v2, 0.0 }
  0xeb   :  { %v729_v7 = vpop.eup %728  ;;  %v496_v8 = vmul.f32 1.442695, %v434_v5  ;;  %v417_v9 = vmin.f32 %v292_v6, 0.0  ;;  %vm381_vm4 = vcmp.gt.f32.partialorder %v292_v6, 0.0 }
  0xec   :  { %v654_v10 = vadd.f32 -1.0, %v729_v7  ;;  %v220_v11 = vpop.f32.mrf.mxu2 }
  0xed   :  { %v731_v12 = vpop.eup %730  ;;  %732 = vpow2.f32 %v496_v8  ;;  %v462_v13 = vmul.f32 1.442695, %v417_v9  ;;  %v221_v14 = vadd.f32 %v1081_v32, %v220_v11 }
  0xee   :  { %v577_v15 = vsel %vm397_vm1, %v340_v48, %v654_v10  ;;  %v637_v16 = vadd.f32 -1.0, %v731_v12  ;;  %v169_v17 = vpop.f32.mrf.mxu0  ;;  %v345_v18 = vpop.f32.mrf.mxu3 }
  0xef   :  { %614 = vst.msk [vmem:[%s1290_s3 + $0xc8] sm:$0xff] %vm588_vm0, %v577_v15  ;;  %734 = vpow2.f32 %v462_v13  ;;  %v170_v19 = vadd.f32 %v1081_v32, %v169_v17  ;;  %v346_v20 = vadd.f32 %v345_v18, %v221_v14 }
  0xf0   :  { %v560_v21 = vsel %vm380_vm2, %v289_v52, %v637_v16  ;;  %v294_v22 = vpop.f32.mrf.mxu1 }
  0xf1   :  { %597 = vst.msk [vmem:[%s1290_s3 + $0x40] sm:$0xff] %vm588_vm0, %v560_v21  ;;  %v435_v23 = vmin.f32 %v346_v20, 0.0  ;;  %v295_v24 = vadd.f32 %v294_v22, %v170_v19  ;;  %vm399_vm5 = vcmp.gt.f32.partialorder %v346_v20, 0.0 }
  0xf3   :  { %v733_v25 = vpop.eup %732  ;;  %v498_v26 = vmul.f32 1.442695, %v435_v23  ;;  %v418_v27 = vmin.f32 %v295_v24, 0.0  ;;  %vm382_vm6 = vcmp.gt.f32.partialorder %v295_v24, 0.0 }
  0xf4   :  { %v655_v28 = vadd.f32 -1.0, %v733_v25  ;;  %v223_v29 = vpop.f32.mrf.mxu2 }
  0xf5   :  { %v735_v30 = vpop.eup %734  ;;  %736 = vpow2.f32 %v498_v26  ;;  %v464_v31 = vmul.f32 1.442695, %v418_v27  ;;  %v224_v33 = vadd.f32 %v1081_v32, %v223_v29 }
  0xf6   :  { %v578_v34 = vsel %vm398_vm3, %v343_v2, %v655_v28  ;;  %v638_v35 = vadd.f32 -1.0, %v735_v30  ;;  %v172_v36 = vpop.f32.mrf.mxu0  ;;  %v348_v37 = vpop.f32.mrf.mxu3 }
  0xf7   :  { %615 = vst.msk [vmem:[%s1290_s3 + $0xd0] sm:$0xff] %vm588_vm0, %v578_v34  ;;  %738 = vpow2.f32 %v464_v31  ;;  %v173_v38 = vadd.f32 %v1081_v32, %v172_v36  ;;  %v349_v39 = vadd.f32 %v348_v37, %v224_v33 }
  0xf8   :  { %v561_v40 = vsel %vm381_vm4, %v292_v6, %v638_v35  ;;  %v297_v41 = vpop.f32.mrf.mxu1 }
  0xf9   :  { %598 = vst.msk [vmem:[%s1290_s3 + $0x48] sm:$0xff] %vm588_vm0, %v561_v40  ;;  %v436_v42 = vmin.f32 %v349_v39, 0.0  ;;  %v298_v43 = vadd.f32 %v297_v41, %v173_v38  ;;  %vm400_vm7 = vcmp.gt.f32.partialorder %v349_v39, 0.0 }
  0xfb   :  { %v737_v44 = vpop.eup %736  ;;  %v500_v45 = vmul.f32 1.442695, %v436_v42  ;;  %v419_v46 = vmin.f32 %v298_v43, 0.0  ;;  %vm383_vm8 = vcmp.gt.f32.partialorder %v298_v43, 0.0 }
  0xfc   :  { %v656_v47 = vadd.f32 -1.0, %v737_v44  ;;  %v226_v48 = vpop.f32.mrf.mxu2 }
  0xfd   :  { %v739_v49 = vpop.eup %738  ;;  %740 = vpow2.f32 %v500_v45  ;;  %v466_v50 = vmul.f32 1.442695, %v419_v46  ;;  %v227_v51 = vadd.f32 %v1081_v32, %v226_v48 }
  0xfe   :  { %v579_v52 = vsel %vm399_vm5, %v346_v20, %v656_v47  ;;  %v639_v53 = vadd.f32 -1.0, %v739_v49  ;;  %v175_v54 = vpop.f32.mrf.mxu0  ;;  %v351_v55 = vpop.f32.mrf.mxu3 }
  0xff   :  { %616 = vst.msk [vmem:[%s1290_s3 + $0xd8] sm:$0xff] %vm588_vm0, %v579_v52  ;;  %742 = vpow2.f32 %v466_v50  ;;  %v176_v56 = vadd.f32 %v1081_v32, %v175_v54  ;;  %v352_v57 = vadd.f32 %v351_v55, %v227_v51 }
 0x100   :  { %v562_v58 = vsel %vm382_vm6, %v295_v24, %v639_v53  ;;  %v300_v59 = vpop.f32.mrf.mxu1 }
 0x101   :  { %599 = vst.msk [vmem:[%s1290_s3 + $0x50] sm:$0xff] %vm588_vm0, %v562_v58  ;;  %v437_v60 = vmin.f32 %v352_v57, 0.0  ;;  %v301_v61 = vadd.f32 %v300_v59, %v176_v56  ;;  %vm401_vm9 = vcmp.gt.f32.partialorder %v352_v57, 0.0 }
 0x103   :  { %v741_v62 = vpop.eup %740  ;;  %v502_v63 = vmul.f32 1.442695, %v437_v60  ;;  %v420_v0 = vmin.f32 %v301_v61, 0.0  ;;  %vm384_vm10 = vcmp.gt.f32.partialorder %v301_v61, 0.0 }
 0x104   :  { %v657_v1 = vadd.f32 -1.0, %v741_v62  ;;  %v229_v2 = vpop.f32.mrf.mxu2 }
 0x105   :  { %v743_v3 = vpop.eup %742  ;;  %744 = vpow2.f32 %v502_v63  ;;  %v468_v4 = vmul.f32 1.442695, %v420_v0  ;;  %v230_v5 = vadd.f32 %v1081_v32, %v229_v2 }
 0x106   :  { %v580_v6 = vsel %vm400_vm7, %v349_v39, %v657_v1  ;;  %v640_v7 = vadd.f32 -1.0, %v743_v3  ;;  %v178_v8 = vpop.f32.mrf.mxu0  ;;  %v354_v9 = vpop.f32.mrf.mxu3 }
 0x107   :  { %617 = vst.msk [vmem:[%s1290_s3 + $0xe0] sm:$0xff] %vm588_vm0, %v580_v6  ;;  %746 = vpow2.f32 %v468_v4  ;;  %v179_v10 = vadd.f32 %v1081_v32, %v178_v8  ;;  %v355_v11 = vadd.f32 %v354_v9, %v230_v5 }
 0x108   :  { %v563_v12 = vsel %vm383_vm8, %v298_v43, %v640_v7  ;;  %v303_v13 = vpop.f32.mrf.mxu1 }
 0x109   :  { %600 = vst.msk [vmem:[%s1290_s3 + $0x58] sm:$0xff] %vm588_vm0, %v563_v12  ;;  %v438_v14 = vmin.f32 %v355_v11, 0.0  ;;  %v304_v15 = vadd.f32 %v303_v13, %v179_v10  ;;  %vm402_vm11 = vcmp.gt.f32.partialorder %v355_v11, 0.0 }
 0x10b   :  { %v745_v16 = vpop.eup %744  ;;  %v504_v17 = vmul.f32 1.442695, %v438_v14  ;;  %v421_v18 = vmin.f32 %v304_v15, 0.0  ;;  %vm385_vm12 = vcmp.gt.f32.partialorder %v304_v15, 0.0 }
 0x10c   :  { %v658_v19 = vadd.f32 -1.0, %v745_v16  ;;  %v232_v20 = vpop.f32.mrf.mxu2 }
 0x10d   :  { %v747_v21 = vpop.eup %746  ;;  %748 = vpow2.f32 %v504_v17  ;;  %v470_v22 = vmul.f32 1.442695, %v421_v18  ;;  %v233_v23 = vadd.f32 %v1081_v32, %v232_v20 }
 0x10e   :  { %v581_v24 = vsel %vm401_vm9, %v352_v57, %v658_v19  ;;  %v641_v25 = vadd.f32 -1.0, %v747_v21  ;;  %v181_v26 = vpop.f32.mrf.mxu0  ;;  %v357_v27 = vpop.f32.mrf.mxu3 }
 0x10f   :  { %618 = vst.msk [vmem:[%s1290_s3 + $0xe8] sm:$0xff] %vm588_vm0, %v581_v24  ;;  %750 = vpow2.f32 %v470_v22  ;;  %v182_v28 = vadd.f32 %v1081_v32, %v181_v26  ;;  %v358_v29 = vadd.f32 %v357_v27, %v233_v23 }
 0x110   :  { %v564_v30 = vsel %vm384_vm10, %v301_v61, %v641_v25  ;;  %v306_v31 = vpop.f32.mrf.mxu1 }
 0x111   :  { %601 = vst.msk [vmem:[%s1290_s3 + $0x60] sm:$0xff] %vm588_vm0, %v564_v30  ;;  %v439_v33 = vmin.f32 %v358_v29, 0.0  ;;  %v307_v34 = vadd.f32 %v306_v31, %v182_v28  ;;  %vm403_vm13 = vcmp.gt.f32.partialorder %v358_v29, 0.0 }
 0x113   :  { %v749_v35 = vpop.eup %748  ;;  %v506_v36 = vmul.f32 1.442695, %v439_v33  ;;  %v422_v37 = vmin.f32 %v307_v34, 0.0  ;;  %vm386_vm14 = vcmp.gt.f32.partialorder %v307_v34, 0.0 }
 0x114   :  { %v659_v38 = vadd.f32 -1.0, %v749_v35  ;;  %v235_v39 = vpop.f32.mrf.mxu2 }
 0x115   :  { %v751_v40 = vpop.eup %750  ;;  %752 = vpow2.f32 %v506_v36  ;;  %v472_v41 = vmul.f32 1.442695, %v422_v37  ;;  %v236_v42 = vadd.f32 %v1081_v32, %v235_v39 }
 0x116   :  { %v582_v43 = vsel %vm402_vm11, %v355_v11, %v659_v38  ;;  %v642_v44 = vadd.f32 -1.0, %v751_v40  ;;  %v184_v45 = vpop.f32.mrf.mxu0  ;;  %v360_v46 = vpop.f32.mrf.mxu3 }
 0x117   :  { %619 = vst.msk [vmem:[%s1290_s3 + $0xf0] sm:$0xff] %vm588_vm0, %v582_v43  ;;  %754 = vpow2.f32 %v472_v41  ;;  %v185_v47 = vadd.f32 %v1081_v32, %v184_v45  ;;  %v361_v48 = vadd.f32 %v360_v46, %v236_v42 }
 0x118   :  { %v565_v49 = vsel %vm385_vm12, %v304_v15, %v642_v44  ;;  %v309_v50 = vpop.f32.mrf.mxu1 }
 0x119   :  { %602 = vst.msk [vmem:[%s1290_s3 + $0x68] sm:$0xff] %vm588_vm0, %v565_v49  ;;  %v440_v51 = vmin.f32 %v361_v48, 0.0  ;;  %v310_v52 = vadd.f32 %v309_v50, %v185_v47  ;;  %vm404_vm15 = vcmp.gt.f32.partialorder %v361_v48, 0.0 }
 0x11b   :  { %v753_v53 = vpop.eup %752  ;;  %v508_v54 = vmul.f32 1.442695, %v440_v51  ;;  %v423_v55 = vmin.f32 %v310_v52, 0.0  ;;  %vm387_vm1 = vcmp.gt.f32.partialorder %v310_v52, 0.0 }
 0x11c   :  { %v660_v56 = vadd.f32 -1.0, %v753_v53  ;;  %v238_v57 = vpop.f32.mrf.mxu2 }
 0x11d   :  { %v755_v58 = vpop.eup %754  ;;  %756 = vpow2.f32 %v508_v54  ;;  %v474_v59 = vmul.f32 1.442695, %v423_v55  ;;  %v239_v60 = vadd.f32 %v1081_v32, %v238_v57 }
 0x11e   :  { %v583_v61 = vsel %vm403_vm13, %v358_v29, %v660_v56  ;;  %v643_v62 = vadd.f32 -1.0, %v755_v58  ;;  %v187_v63 = vpop.f32.mrf.mxu0  ;;  %v363_v0 = vpop.f32.mrf.mxu3 }
 0x11f   :  { %620 = vst.msk [vmem:[%s1290_s3 + $0xf8] sm:$0xff] %vm588_vm0, %v583_v61  ;;  %758 = vpow2.f32 %v474_v59  ;;  %v188_v1 = vadd.f32 %v1081_v32, %v187_v63  ;;  %v364_v2 = vadd.f32 %v363_v0, %v239_v60 }
 0x120   :  { %v566_v3 = vsel %vm386_vm14, %v307_v34, %v643_v62  ;;  %v312_v4 = vpop.f32.mrf.mxu1 }
 0x121   :  { %603 = vst.msk [vmem:[%s1290_s3 + $0x70] sm:$0xff] %vm588_vm0, %v566_v3  ;;  %v441_v5 = vmin.f32 %v364_v2, 0.0  ;;  %v313_v6 = vadd.f32 %v312_v4, %v188_v1  ;;  %vm405_vm2 = vcmp.gt.f32.partialorder %v364_v2, 0.0 }
 0x123   :  { %v757_v7 = vpop.eup %756  ;;  %v510_v8 = vmul.f32 1.442695, %v441_v5  ;;  %v424_v9 = vmin.f32 %v313_v6, 0.0  ;;  %vm388_vm3 = vcmp.gt.f32.partialorder %v313_v6, 0.0 }
 0x124   :  { %v661_v10 = vadd.f32 -1.0, %v757_v7  ;;  %v241_v11 = vpop.f32.mrf.mxu2 }
 0x125   :  { %v759_v12 = vpop.eup %758  ;;  %760 = vpow2.f32 %v510_v8  ;;  %v476_v13 = vmul.f32 1.442695, %v424_v9  ;;  %v242_v14 = vadd.f32 %v1081_v32, %v241_v11 }
 0x126   :  { %v584_v15 = vsel %vm404_vm15, %v361_v48, %v661_v10  ;;  %v644_v16 = vadd.f32 -1.0, %v759_v12  ;;  %v190_v17 = vpop.f32.mrf.mxu0  ;;  %v366_v18 = vpop.f32.mrf.mxu3 }
 0x127   :  { %621 = vst.msk [vmem:[%s1290_s3 + $0x100] sm:$0xff] %vm588_vm0, %v584_v15  ;;  %762 = vpow2.f32 %v476_v13  ;;  %v191_v19 = vadd.f32 %v1081_v32, %v190_v17  ;;  %v367_v20 = vadd.f32 %v366_v18, %v242_v14 }
 0x128   :  { %v567_v21 = vsel %vm387_vm1, %v310_v52, %v644_v16  ;;  %v315_v22 = vpop.f32.mrf.mxu1 }
 0x129   :  { %604 = vst.msk [vmem:[%s1290_s3 + $0x78] sm:$0xff] %vm588_vm0, %v567_v21  ;;  %v442_v23 = vmin.f32 %v367_v20, 0.0  ;;  %v316_v24 = vadd.f32 %v315_v22, %v191_v19  ;;  %vm406_vm4 = vcmp.gt.f32.partialorder %v367_v20, 0.0 }
 0x12b   :  { %v761_v25 = vpop.eup %760  ;;  %v512_v26 = vmul.f32 1.442695, %v442_v23  ;;  %v425_v27 = vmin.f32 %v316_v24, 0.0  ;;  %vm389_vm5 = vcmp.gt.f32.partialorder %v316_v24, 0.0 }
 0x12c   :  { %v662_v28 = vadd.f32 -1.0, %v761_v25  ;;  %v244_v29 = vpop.f32.mrf.mxu2 }
 0x12d   :  { %v763_v30 = vpop.eup %762  ;;  %764 = vpow2.f32 %v512_v26  ;;  %v478_v31 = vmul.f32 1.442695, %v425_v27  ;;  %v245_v33 = vadd.f32 %v1081_v32, %v244_v29 }
 0x12e   :  { %v585_v34 = vsel %vm405_vm2, %v364_v2, %v662_v28  ;;  %v645_v35 = vadd.f32 -1.0, %v763_v30  ;;  %v369_v36 = vpop.f32.mrf.mxu3 }
 0x12f   :  { %622 = vst.msk [vmem:[%s1290_s3 + $0x108] sm:$0xff] %vm588_vm0, %v585_v34  ;;  %766 = vpow2.f32 %v478_v31  ;;  %v370_v37 = vadd.f32 %v369_v36, %v245_v33 }
 0x130   :  { %v568_v38 = vsel %vm388_vm3, %v313_v6, %v645_v35 }
 0x131   :  { %605 = vst.msk [vmem:[%s1290_s3 + $0x80] sm:$0xff] %vm588_vm0, %v568_v38  ;;  %v443_v39 = vmin.f32 %v370_v37, 0.0  ;;  %vm407_vm6 = vcmp.gt.f32.partialorder %v370_v37, 0.0 }
 0x133   :  { %v765_v40 = vpop.eup %764  ;;  %v514_v32 = vmul.f32 1.442695, %v443_v39 }
 0x134   :  { %v663_v41 = vadd.f32 -1.0, %v765_v40 }
 0x135   :  { %v767_v42 = vpop.eup %766  ;;  %768 = vpow2.f32 %v514_v32 }
 0x136   :  { %v586_v43 = vsel %vm406_vm4, %v367_v20, %v663_v41  ;;  %v646_v44 = vadd.f32 -1.0, %v767_v42 }
 0x137   :  { %623 = vst.msk [vmem:[%s1290_s3 + $0x110] sm:$0xff] %vm588_vm0, %v586_v43 }
 0x138   :  { %v569_v45 = vsel %vm389_vm5, %v316_v24, %v646_v44 }
 0x139   :  { %606 = vst.msk [vmem:[%s1290_s3 + $0x88] sm:$0xff] %vm588_vm0, %v569_v45 }
 0x13b   :  { %v769_v46 = vpop.eup %768 }
 0x13c   :  { %v664_v47 = vadd.f32 -1.0, %v769_v46 }
 0x13e   :  { %v587_v48 = vsel %vm407_vm6, %v370_v37, %v664_v47 }
 0x13f   :  { %624 = vst.msk [vmem:[%s1290_s3 + $0x118] sm:$0xff] %vm588_vm0, %v587_v48 }

// kernel: atari_dueling_dqn_forward.5
= control target key start
LH: loop header
LB: loop body
LE: loop exit
PB: predicated region body
PF: predicated region fallthrough
CT: control target
= control target key end

     0   :  { %vm304_vm0 = vcmask 523264   ;;  %vm311_vm7 = vcmask 517120   ;;  %s674_s1 = inlined_call_operand.vmem [shape: f32[512,64], index: 1, kind: input, shape index: {}]   ;;  %s675_s2 = inlined_call_operand.vmem [shape: f32[1,64], index: 2, kind: input, shape index: {}]   ;;  %s676_s0 = inlined_call_operand.vmem [shape: f32[50,512], index: 0, kind: input, shape index: {}]   ;;  %s677_s3 = inlined_call_operand.vmem [shape: f32[50,64], index: 3, kind: output, shape index: {}]  }
   0x1   :  { %v89_v0 = vld [vmem:[%s674_s1 + $0x178] sm:$0xff]  ;;  %v88_v2 = vld [vmem:[%s674_s1 + $0x170] sm:$0xff]  ;;  %v87_v6 = vld [vmem:[%s674_s1 + $0x168] sm:$0xff] }
   0x2   :  { %v57_v1 = vld [vmem:[%s674_s1 + $0x78] sm:$0xff]  ;;  %186 = vmatpush.msra.mxu2 %v89_v0  ;;  %v56_v4 = vld [vmem:[%s674_s1 + $0x70] sm:$0xff]  ;;  %v55_v8 = vld [vmem:[%s674_s1 + $0x68] sm:$0xff] }
   0x3   :  { %110 = vmatpush.msra.mxu0 %v57_v1  ;;  %v105_v3 = vld [vmem:[%s674_s1 + $0x1f8] sm:$0xff]  ;;  %v104_v7 = vld [vmem:[%s674_s1 + $0x1f0] sm:$0xff]  ;;  %v103_v10 = vld [vmem:[%s674_s1 + $0x1e8] sm:$0xff] }
   0x4   :  { %v73_v5 = vld [vmem:[%s674_s1 + $0xf8] sm:$0xff]  ;;  %224 = vmatpush.msra.mxu3 %v105_v3  ;;  %187 = vmatpush.msra.mxu2 %v88_v2  ;;  %v72_v9 = vld [vmem:[%s674_s1 + $0xf0] sm:$0xff]  ;;  %v86_v11 = vld [vmem:[%s674_s1 + $0x160] sm:$0xff] }
   0x5   :  { %148 = vmatpush.msra.mxu1 %v73_v5  ;;  %111 = vmatpush.msra.mxu0 %v56_v4  ;;  %v54_v12 = vld [vmem:[%s674_s1 + $0x60] sm:$0xff]  ;;  %v71_v13 = vld [vmem:[%s674_s1 + $0xe8] sm:$0xff]  ;;  %v85_v16 = vld [vmem:[%s674_s1 + $0x158] sm:$0xff] }
   0x6   :  { %225 = vmatpush.msra.mxu3 %v104_v7  ;;  %188 = vmatpush.msra.mxu2 %v87_v6  ;;  %v102_v14 = vld [vmem:[%s674_s1 + $0x1e0] sm:$0xff]  ;;  %v53_v17 = vld [vmem:[%s674_s1 + $0x58] sm:$0xff]  ;;  %v84_v20 = vld [vmem:[%s674_s1 + $0x150] sm:$0xff] }
   0x7   :  { %149 = vmatpush.msra.mxu1 %v72_v9  ;;  %112 = vmatpush.msra.mxu0 %v55_v8  ;;  %v70_v15 = vld [vmem:[%s674_s1 + $0xe0] sm:$0xff]  ;;  %v101_v18 = vld [vmem:[%s674_s1 + $0x1d8] sm:$0xff]  ;;  %v52_v21 = vld [vmem:[%s674_s1 + $0x50] sm:$0xff] }
   0x8   :  { %226 = vmatpush.msra.mxu3 %v103_v10  ;;  %189 = vmatpush.msra.mxu2 %v86_v11  ;;  %v69_v19 = vld [vmem:[%s674_s1 + $0xd8] sm:$0xff]  ;;  %v100_v22 = vld [vmem:[%s674_s1 + $0x1d0] sm:$0xff]  ;;  %v83_v24 = vld [vmem:[%s674_s1 + $0x148] sm:$0xff] }
   0x9   :  { %150 = vmatpush.msra.mxu1 %v71_v13  ;;  %113 = vmatpush.msra.mxu0 %v54_v12  ;;  %v68_v23 = vld [vmem:[%s674_s1 + $0xd0] sm:$0xff]  ;;  %v51_v25 = vld [vmem:[%s674_s1 + $0x48] sm:$0xff]  ;;  %v82_v28 = vld [vmem:[%s674_s1 + $0x140] sm:$0xff] }
   0xa   :  { %227 = vmatpush.msra.mxu3 %v102_v14  ;;  %190 = vmatpush.msra.mxu2 %v85_v16  ;;  %v99_v26 = vld [vmem:[%s674_s1 + $0x1c8] sm:$0xff]  ;;  %v50_v29 = vld [vmem:[%s674_s1 + $0x40] sm:$0xff]  ;;  %v81_v32 = vld [vmem:[%s674_s1 + $0x138] sm:$0xff] }
   0xb   :  { %151 = vmatpush.msra.mxu1 %v70_v15  ;;  %114 = vmatpush.msra.mxu0 %v53_v17  ;;  %v67_v27 = vld [vmem:[%s674_s1 + $0xc8] sm:$0xff]  ;;  %v98_v30 = vld [vmem:[%s674_s1 + $0x1c0] sm:$0xff]  ;;  %v49_v33 = vld [vmem:[%s674_s1 + $0x38] sm:$0xff] }
   0xc   :  { %228 = vmatpush.msra.mxu3 %v101_v18  ;;  %191 = vmatpush.msra.mxu2 %v84_v20  ;;  %v66_v31 = vld [vmem:[%s674_s1 + $0xc0] sm:$0xff]  ;;  %v97_v34 = vld [vmem:[%s674_s1 + $0x1b8] sm:$0xff]  ;;  %v80_v36 = vld [vmem:[%s674_s1 + $0x130] sm:$0xff] }
   0xd   :  { %152 = vmatpush.msra.mxu1 %v69_v19  ;;  %115 = vmatpush.msra.mxu0 %v52_v21  ;;  %v65_v35 = vld [vmem:[%s674_s1 + $0xb8] sm:$0xff]  ;;  %v48_v37 = vld [vmem:[%s674_s1 + $0x30] sm:$0xff]  ;;  %v79_v40 = vld [vmem:[%s674_s1 + $0x128] sm:$0xff] }
   0xe   :  { %229 = vmatpush.msra.mxu3 %v100_v22  ;;  %192 = vmatpush.msra.mxu2 %v83_v24  ;;  %v96_v38 = vld [vmem:[%s674_s1 + $0x1b0] sm:$0xff]  ;;  %v47_v41 = vld [vmem:[%s674_s1 + $0x28] sm:$0xff]  ;;  %v78_v44 = vld [vmem:[%s674_s1 + $0x120] sm:$0xff] }
   0xf   :  { %153 = vmatpush.msra.mxu1 %v68_v23  ;;  %116 = vmatpush.msra.mxu0 %v51_v25  ;;  %v64_v39 = vld [vmem:[%s674_s1 + $0xb0] sm:$0xff]  ;;  %v95_v42 = vld [vmem:[%s674_s1 + $0x1a8] sm:$0xff]  ;;  %v46_v45 = vld [vmem:[%s674_s1 + $0x20] sm:$0xff] }
  0x10   :  { %230 = vmatpush.msra.mxu3 %v99_v26  ;;  %193 = vmatpush.msra.mxu2 %v82_v28  ;;  %v63_v43 = vld [vmem:[%s674_s1 + $0xa8] sm:$0xff]  ;;  %v94_v46 = vld [vmem:[%s674_s1 + $0x1a0] sm:$0xff]  ;;  %v77_v48 = vld [vmem:[%s674_s1 + $0x118] sm:$0xff] }
  0x11   :  { %154 = vmatpush.msra.mxu1 %v67_v27  ;;  %117 = vmatpush.msra.mxu0 %v50_v29  ;;  %v62_v47 = vld [vmem:[%s674_s1 + $0xa0] sm:$0xff]  ;;  %v45_v49 = vld [vmem:[%s674_s1 + $0x18] sm:$0xff]  ;;  %v76_v52 = vld [vmem:[%s674_s1 + $0x110] sm:$0xff] }
  0x12   :  { %231 = vmatpush.msra.mxu3 %v98_v30  ;;  %194 = vmatpush.msra.mxu2 %v81_v32  ;;  %v93_v50 = vld [vmem:[%s674_s1 + $0x198] sm:$0xff]  ;;  %v44_v53 = vld [vmem:[%s674_s1 + $0x10] sm:$0xff]  ;;  %v75_v56 = vld [vmem:[%s674_s1 + $0x108] sm:$0xff] }
  0x13   :  { %155 = vmatpush.msra.mxu1 %v66_v31  ;;  %118 = vmatpush.msra.mxu0 %v49_v33  ;;  %v61_v51 = vld [vmem:[%s674_s1 + $0x98] sm:$0xff]  ;;  %v92_v54 = vld [vmem:[%s674_s1 + $0x190] sm:$0xff]  ;;  %v43_v57 = vld [vmem:[%s674_s1 + $0x8] sm:$0xff] }
  0x14   :  { %232 = vmatpush.msra.mxu3 %v97_v34  ;;  %195 = vmatpush.msra.mxu2 %v80_v36  ;;  %v60_v55 = vld [vmem:[%s674_s1 + $0x90] sm:$0xff]  ;;  %v91_v58 = vld [vmem:[%s674_s1 + $0x188] sm:$0xff]  ;;  %v74_v60 = vld [vmem:[%s674_s1 + $0x100] sm:$0xff] }
  0x15   :  { %156 = vmatpush.msra.mxu1 %v65_v35  ;;  %119 = vmatpush.msra.mxu0 %v48_v37  ;;  %v59_v59 = vld [vmem:[%s674_s1 + $0x88] sm:$0xff]  ;;  %v42_v61 = vld [vmem:[%s674_s1] sm:$0xff]  ;;  %v16_v62 = vld [vmem:[%s676_s0 + $0x10] sm:$0xff] }
  0x16   :  { %233 = vmatpush.msra.mxu3 %v96_v38  ;;  %196 = vmatpush.msra.mxu2 %v79_v40  ;;  %v90_v63 = vld [vmem:[%s674_s1 + $0x180] sm:$0xff]  ;;  %v17_v1 = vld [vmem:[%s676_s0 + $0x18] sm:$0xff]  ;;  %v15_v3 = vld [vmem:[%s676_s0 + $0x8] sm:$0xff] }
  0x17   :  { %157 = vmatpush.msra.mxu1 %v64_v39  ;;  %120 = vmatpush.msra.mxu0 %v47_v41  ;;  %v14_v0 = vld [vmem:[%s676_s0] sm:$0xff]  ;;  %v20_v4 = vld [vmem:[%s676_s0 + $0x30] sm:$0xff]  ;;  %v21_v6 = vld [vmem:[%s676_s0 + $0x38] sm:$0xff] }
  0x18   :  { %234 = vmatpush.msra.mxu3 %v95_v42  ;;  %197 = vmatpush.msra.mxu2 %v78_v44  ;;  %v58_v2 = vld [vmem:[%s674_s1 + $0x80] sm:$0xff]  ;;  %v19_v7 = vld [vmem:[%s676_s0 + $0x28] sm:$0xff]  ;;  %v24_v8 = vld [vmem:[%s676_s0 + $0x50] sm:$0xff] }
  0x19   :  { %158 = vmatpush.msra.mxu1 %v63_v43  ;;  %121 = vmatpush.msra.mxu0 %v46_v45  ;;  %v18_v5 = vld [vmem:[%s676_s0 + $0x20] sm:$0xff]  ;;  %v25_v10 = vld [vmem:[%s676_s0 + $0x58] sm:$0xff]  ;;  %v23_v11 = vld [vmem:[%s676_s0 + $0x48] sm:$0xff] }
  0x1a   :  { %235 = vmatpush.msra.mxu3 %v94_v46  ;;  %198 = vmatpush.msra.mxu2 %v77_v48  ;;  %v22_v9 = vld [vmem:[%s676_s0 + $0x40] sm:$0xff]  ;;  %v28_v12 = vld [vmem:[%s676_s0 + $0x70] sm:$0xff]  ;;  %v29_v14 = vld [vmem:[%s676_s0 + $0x78] sm:$0xff] }
  0x1b   :  { %159 = vmatpush.msra.mxu1 %v62_v47  ;;  %122 = vmatpush.msra.mxu0 %v45_v49  ;;  %v26_v13 = vld [vmem:[%s676_s0 + $0x60] sm:$0xff]  ;;  %v27_v15 = vld [vmem:[%s676_s0 + $0x68] sm:$0xff]  ;;  %v32_v16 = vld [vmem:[%s676_s0 + $0x90] sm:$0xff] }
  0x1c   :  { %236 = vmatpush.msra.mxu3 %v93_v50  ;;  %199 = vmatpush.msra.mxu2 %v76_v52  ;;  %v30_v17 = vld [vmem:[%s676_s0 + $0x80] sm:$0xff]  ;;  %v33_v18 = vld [vmem:[%s676_s0 + $0x98] sm:$0xff]  ;;  %v31_v19 = vld [vmem:[%s676_s0 + $0x88] sm:$0xff] }
  0x1d   :  { %160 = vmatpush.msra.mxu1 %v61_v51  ;;  %123 = vmatpush.msra.mxu0 %v44_v53  ;;  %v36_v20 = vld [vmem:[%s676_s0 + $0xb0] sm:$0xff]  ;;  %v34_v21 = vld [vmem:[%s676_s0 + $0xa0] sm:$0xff]  ;;  %v37_v22 = vld [vmem:[%s676_s0 + $0xb8] sm:$0xff] }
  0x1e   :  { %237 = vmatpush.msra.mxu3 %v92_v54  ;;  %200 = vmatpush.msra.mxu2 %v75_v56  ;;  %v35_v23 = vld [vmem:[%s676_s0 + $0xa8] sm:$0xff]  ;;  %v40_v24 = vld [vmem:[%s676_s0 + $0xd0] sm:$0x3]  ;;  %v38_v25 = vld [vmem:[%s676_s0 + $0xc0] sm:$0x3] }
  0x1f   :  { %161 = vmatpush.msra.mxu1 %v60_v55  ;;  %124 = vmatpush.msra.mxu0 %v43_v57  ;;  %v41_v26 = vld [vmem:[%s676_s0 + $0xd8] sm:$0x3]  ;;  %v39_v27 = vld [vmem:[%s676_s0 + $0xc8] sm:$0x3]  ;;  %v638_v28 = vld [vmem:[%s675_s2] ss:$0 sm:$0xff] }
  0x20   :  { %238 = vmatpush.msra.mxu3 %v91_v58  ;;  %201 = vmatpush.msra.mxu2 %v74_v60 }
  0x21   :  { %162 = vmatpush.msra.mxu1 %v59_v59  ;;  %125 = vmatpush.msra.mxu0 %v42_v61 }
  0x22   :  { %202 = vmatmul.f32.vlgmr.msra.gmra.mxu2 %v16_v62  ;;  %239 = vmatpush.msra.mxu3 %v90_v63 }
  0x23   :  { %126 = vmatmul.f32.vlgmr.msra.gmra.mxu0 %v14_v0  ;;  %240 = vmatmul.f32.vlgmr.msra.gmra.mxu3 %v17_v1 }
  0x24   :  { %163 = vmatpush.msra.mxu1 %v58_v2 }
  0x25   :  { %164 = vmatmul.f32.vlgmr.msra.gmra.mxu1 %v15_v3 }
  0x2a   :  { %205 = vmatmul.f32.gmra.mxu2 %v20_v4 }
  0x2b   :  { %129 = vmatmul.f32.gmra.mxu0 %v18_v5  ;;  %243 = vmatmul.f32.gmra.mxu3 %v21_v6 }
  0x2d   :  { %167 = vmatmul.f32.gmra.mxu1 %v19_v7 }
  0x32   :  { %208 = vmatmul.f32.gmra.mxu2 %v24_v8 }
  0x33   :  { %132 = vmatmul.f32.gmra.mxu0 %v22_v9  ;;  %246 = vmatmul.f32.gmra.mxu3 %v25_v10 }
  0x35   :  { %170 = vmatmul.f32.gmra.mxu1 %v23_v11 }
  0x3a   :  { %211 = vmatmul.f32.gmra.mxu2 %v28_v12 }
  0x3b   :  { %135 = vmatmul.f32.gmra.mxu0 %v26_v13  ;;  %249 = vmatmul.f32.gmra.mxu3 %v29_v14 }
  0x3d   :  { %173 = vmatmul.f32.gmra.mxu1 %v27_v15 }
  0x42   :  { %214 = vmatmul.f32.gmra.mxu2 %v32_v16 }
  0x43   :  { %138 = vmatmul.f32.gmra.mxu0 %v30_v17  ;;  %252 = vmatmul.f32.gmra.mxu3 %v33_v18 }
  0x45   :  { %176 = vmatmul.f32.gmra.mxu1 %v31_v19 }
  0x4a   :  { %217 = vmatmul.f32.gmra.mxu2 %v36_v20 }
  0x4b   :  { %141 = vmatmul.f32.gmra.mxu0 %v34_v21  ;;  %255 = vmatmul.f32.gmra.mxu3 %v37_v22 }
  0x4d   :  { %179 = vmatmul.f32.gmra.mxu1 %v35_v23 }
  0x52   :  { %220 = vmatmul.f32.gmra.mxu2 %v40_v24 }
  0x53   :  { %144 = vmatmul.f32.gmra.mxu0 %v38_v25  ;;  %258 = vmatmul.f32.gmra.mxu3 %v41_v26 }
  0x55   :  { %182 = vmatmul.f32.gmra.mxu1 %v39_v27 }
  0xa0   :  { %v127_v29 = vpop.f32.mrf.mxu0 }
  0xa1   :  { %v128_v30 = vadd.f32 %v638_v28, %v127_v29 }
  0xa2   :  { %v165_v31 = vpop.f32.mrf.mxu1 }
  0xa3   :  { %v166_v32 = vadd.f32 %v165_v31, %v128_v30 }
  0xa5   :  { %v203_v33 = vpop.f32.mrf.mxu2 }
  0xa6   :  { %v204_v34 = vadd.f32 %v203_v33, %v166_v32  ;;  %v241_v35 = vpop.f32.mrf.mxu3 }
  0xa8   :  { %v242_v36 = vadd.f32 %v241_v35, %v204_v34  ;;  %v130_v37 = vpop.f32.mrf.mxu0 }
  0xa9   :  { %v131_v38 = vadd.f32 %v638_v28, %v130_v37 }
  0xaa   :  { %v269_v39 = vmin.f32 %v242_v36, 0.0  ;;  %v168_v40 = vpop.f32.mrf.mxu1  ;;  %vm262_vm1 = vcmp.gt.f32.partialorder %v242_v36, 0.0 }
  0xab   :  { %v169_v41 = vadd.f32 %v168_v40, %v131_v38 }
  0xac   :  { %v276_v42 = vmul.f32 1.442695, %v269_v39 }
  0xad   :  { %v206_v43 = vpop.f32.mrf.mxu2 }
  0xae   :  { %325 = vpow2.f32 %v276_v42  ;;  %v207_v44 = vadd.f32 %v206_v43, %v169_v41  ;;  %v244_v45 = vpop.f32.mrf.mxu3 }
  0xb0   :  { %v245_v46 = vadd.f32 %v244_v45, %v207_v44  ;;  %v133_v47 = vpop.f32.mrf.mxu0 }
  0xb1   :  { %v134_v48 = vadd.f32 %v638_v28, %v133_v47 }
  0xb2   :  { %v270_v49 = vmin.f32 %v245_v46, 0.0  ;;  %v171_v50 = vpop.f32.mrf.mxu1  ;;  %vm263_vm2 = vcmp.gt.f32.partialorder %v245_v46, 0.0 }
  0xb3   :  { %v172_v51 = vadd.f32 %v171_v50, %v134_v48 }
  0xb4   :  { %v326_v52 = vpop.eup %325  ;;  %v278_v53 = vmul.f32 1.442695, %v270_v49 }
  0xb5   :  { %v317_v54 = vadd.f32 -1.0, %v326_v52  ;;  %v209_v55 = vpop.f32.mrf.mxu2 }
  0xb6   :  { %327 = vpow2.f32 %v278_v53  ;;  %v210_v56 = vadd.f32 %v209_v55, %v172_v51  ;;  %v247_v57 = vpop.f32.mrf.mxu3 }
  0xb7   :  { %v297_v58 = vsel %vm262_vm1, %v242_v36, %v317_v54 }
  0xb8   :  { %305 = vst.msk [vmem:[%s677_s3] sm:$0xff] %vm304_vm0, %v297_v58  ;;  %v248_v59 = vadd.f32 %v247_v57, %v210_v56  ;;  %v136_v60 = vpop.f32.mrf.mxu0 }
  0xb9   :  { %v137_v61 = vadd.f32 %v638_v28, %v136_v60 }
  0xba   :  { %v271_v62 = vmin.f32 %v248_v59, 0.0  ;;  %v174_v63 = vpop.f32.mrf.mxu1  ;;  %vm264_vm3 = vcmp.gt.f32.partialorder %v248_v59, 0.0 }
  0xbb   :  { %v175_v0 = vadd.f32 %v174_v63, %v137_v61 }
  0xbc   :  { %v328_v1 = vpop.eup %327  ;;  %v280_v2 = vmul.f32 1.442695, %v271_v62 }
  0xbd   :  { %v318_v3 = vadd.f32 -1.0, %v328_v1  ;;  %v212_v4 = vpop.f32.mrf.mxu2 }
  0xbe   :  { %329 = vpow2.f32 %v280_v2  ;;  %v213_v5 = vadd.f32 %v212_v4, %v175_v0  ;;  %v250_v6 = vpop.f32.mrf.mxu3 }
  0xbf   :  { %v298_v7 = vsel %vm263_vm2, %v245_v46, %v318_v3 }
  0xc0   :  { %306 = vst.msk [vmem:[%s677_s3 + $0x8] sm:$0xff] %vm304_vm0, %v298_v7  ;;  %v251_v8 = vadd.f32 %v250_v6, %v213_v5  ;;  %v139_v9 = vpop.f32.mrf.mxu0 }
  0xc1   :  { %v140_v10 = vadd.f32 %v638_v28, %v139_v9 }
  0xc2   :  { %v272_v11 = vmin.f32 %v251_v8, 0.0  ;;  %v177_v12 = vpop.f32.mrf.mxu1  ;;  %vm265_vm4 = vcmp.gt.f32.partialorder %v251_v8, 0.0 }
  0xc3   :  { %v178_v13 = vadd.f32 %v177_v12, %v140_v10 }
  0xc4   :  { %v330_v14 = vpop.eup %329  ;;  %v282_v15 = vmul.f32 1.442695, %v272_v11 }
  0xc5   :  { %v319_v16 = vadd.f32 -1.0, %v330_v14  ;;  %v215_v17 = vpop.f32.mrf.mxu2 }
  0xc6   :  { %331 = vpow2.f32 %v282_v15  ;;  %v216_v18 = vadd.f32 %v215_v17, %v178_v13  ;;  %v253_v19 = vpop.f32.mrf.mxu3 }
  0xc7   :  { %v299_v20 = vsel %vm264_vm3, %v248_v59, %v319_v16 }
  0xc8   :  { %307 = vst.msk [vmem:[%s677_s3 + $0x10] sm:$0xff] %vm304_vm0, %v299_v20  ;;  %v254_v21 = vadd.f32 %v253_v19, %v216_v18  ;;  %v142_v22 = vpop.f32.mrf.mxu0 }
  0xc9   :  { %v143_v23 = vadd.f32 %v638_v28, %v142_v22 }
  0xca   :  { %v273_v24 = vmin.f32 %v254_v21, 0.0  ;;  %v180_v25 = vpop.f32.mrf.mxu1  ;;  %vm266_vm5 = vcmp.gt.f32.partialorder %v254_v21, 0.0 }
  0xcb   :  { %v181_v26 = vadd.f32 %v180_v25, %v143_v23 }
  0xcc   :  { %v332_v27 = vpop.eup %331  ;;  %v284_v29 = vmul.f32 1.442695, %v273_v24 }
  0xcd   :  { %v320_v30 = vadd.f32 -1.0, %v332_v27  ;;  %v218_v31 = vpop.f32.mrf.mxu2 }
  0xce   :  { %333 = vpow2.f32 %v284_v29  ;;  %v219_v32 = vadd.f32 %v218_v31, %v181_v26  ;;  %v256_v33 = vpop.f32.mrf.mxu3 }
  0xcf   :  { %v300_v34 = vsel %vm265_vm4, %v251_v8, %v320_v30 }
  0xd0   :  { %308 = vst.msk [vmem:[%s677_s3 + $0x18] sm:$0xff] %vm304_vm0, %v300_v34  ;;  %v257_v35 = vadd.f32 %v256_v33, %v219_v32  ;;  %v145_v36 = vpop.f32.mrf.mxu0 }
  0xd1   :  { %v146_v37 = vadd.f32 %v638_v28, %v145_v36 }
  0xd2   :  { %v274_v38 = vmin.f32 %v257_v35, 0.0  ;;  %v183_v39 = vpop.f32.mrf.mxu1  ;;  %vm267_vm6 = vcmp.gt.f32.partialorder %v257_v35, 0.0 }
  0xd3   :  { %v184_v40 = vadd.f32 %v183_v39, %v146_v37 }
  0xd4   :  { %v334_v41 = vpop.eup %333  ;;  %v286_v42 = vmul.f32 1.442695, %v274_v38 }
  0xd5   :  { %v321_v43 = vadd.f32 -1.0, %v334_v41  ;;  %v221_v44 = vpop.f32.mrf.mxu2 }
  0xd6   :  { %335 = vpow2.f32 %v286_v42  ;;  %v222_v45 = vadd.f32 %v221_v44, %v184_v40  ;;  %v259_v46 = vpop.f32.mrf.mxu3 }
  0xd7   :  { %v301_v47 = vsel %vm266_vm5, %v254_v21, %v321_v43 }
  0xd8   :  { %309 = vst.msk [vmem:[%s677_s3 + $0x20] sm:$0xff] %vm304_vm0, %v301_v47  ;;  %v260_v48 = vadd.f32 %v259_v46, %v222_v45 }
  0xda   :  { %v275_v49 = vmin.f32 %v260_v48, 0.0  ;;  %vm268_vm8 = vcmp.gt.f32.partialorder %v260_v48, 0.0 }
  0xdc   :  { %v336_v28 = vpop.eup %335  ;;  %v288_v50 = vmul.f32 1.442695, %v275_v49 }
  0xdd   :  { %v322_v51 = vadd.f32 -1.0, %v336_v28 }
  0xde   :  { %337 = vpow2.f32 %v288_v50 }
  0xdf   :  { %v302_v52 = vsel %vm267_vm6, %v257_v35, %v322_v51 }
  0xe0   :  { %310 = vst.msk [vmem:[%s677_s3 + $0x28] sm:$0xff] %vm304_vm0, %v302_v52 }
  0xe4   :  { %v338_v53 = vpop.eup %337 }
  0xe5   :  { %v323_v54 = vadd.f32 -1.0, %v338_v53 }
  0xe7   :  { %v303_v55 = vsel %vm268_vm8, %v260_v48, %v323_v54 }
  0xe8   :  { %312 = vst.msk [vmem:[%s677_s3 + $0x30] sm:$0x3] %vm311_vm7, %v303_v55 }

// kernel: atari_dueling_dqn_forward.6
= control target key start
LH: loop header
LB: loop body
LE: loop exit
PB: predicated region body
PF: predicated region fallthrough
CT: control target
= control target key end

     0   :  { %vm105_vm0 = vcmask 523264   ;;  %vm265_vm3 = vcmask 517120   ;;  %s598_s1 = inlined_call_operand.vmem [shape: f32[576,64], index: 1, kind: input, shape index: {}]   ;;  %s599_s0 = inlined_call_operand.vmem [shape: f32[18,576], index: 0, kind: input, shape index: {}]   ;;  %s600_s2 = inlined_call_operand.vmem [shape: f32[1,64], index: 2, kind: input, shape index: {}]   ;;  %s601_s3 = inlined_call_operand.vmem [shape: f32[18,64], index: 3, kind: output, shape index: {}]  }
   0x1   :  { %v44_v0 = vld [vmem:[%s598_s1 + $0x78] sm:$0xff]  ;;  %v43_v3 = vld [vmem:[%s598_s1 + $0x70] sm:$0xff]  ;;  %v42_v7 = vld [vmem:[%s598_s1 + $0x68] sm:$0xff] }
   0x2   :  { %v60_v1 = vld [vmem:[%s598_s1 + $0xf8] sm:$0xff]  ;;  %115 = vmatpush.msra.mxu0 %v44_v0  ;;  %v59_v4 = vld [vmem:[%s598_s1 + $0xf0] sm:$0xff]  ;;  %v58_v8 = vld [vmem:[%s598_s1 + $0xe8] sm:$0xff] }
   0x3   :  { %v76_v2 = vld [vmem:[%s598_s1 + $0x178] sm:$0xff]  ;;  %141 = vmatpush.msra.mxu1 %v60_v1  ;;  %v75_v5 = vld [vmem:[%s598_s1 + $0x170] sm:$0xff]  ;;  %v74_v9 = vld [vmem:[%s598_s1 + $0x168] sm:$0xff] }
   0x4   :  { %167 = vmatpush.msra.mxu2 %v76_v2  ;;  %v92_v6 = vld [vmem:[%s598_s1 + $0x1f8] sm:$0xff]  ;;  %116 = vmatpush.msra.mxu0 %v43_v3  ;;  %v91_v10 = vld [vmem:[%s598_s1 + $0x1f0] sm:$0xff]  ;;  %v41_v11 = vld [vmem:[%s598_s1 + $0x60] sm:$0xff] }
   0x5   :  { %142 = vmatpush.msra.mxu1 %v59_v4  ;;  %193 = vmatpush.msra.mxu3 %v92_v6  ;;  %v57_v12 = vld [vmem:[%s598_s1 + $0xe0] sm:$0xff]  ;;  %v90_v14 = vld [vmem:[%s598_s1 + $0x1e8] sm:$0xff]  ;;  %v40_v15 = vld [vmem:[%s598_s1 + $0x58] sm:$0xff] }
   0x6   :  { %168 = vmatpush.msra.mxu2 %v75_v5  ;;  %117 = vmatpush.msra.mxu0 %v42_v7  ;;  %v73_v13 = vld [vmem:[%s598_s1 + $0x160] sm:$0xff]  ;;  %v56_v16 = vld [vmem:[%s598_s1 + $0xd8] sm:$0xff]  ;;  %v39_v19 = vld [vmem:[%s598_s1 + $0x50] sm:$0xff] }
   0x7   :  { %143 = vmatpush.msra.mxu1 %v58_v8  ;;  %194 = vmatpush.msra.mxu3 %v91_v10  ;;  %v72_v17 = vld [vmem:[%s598_s1 + $0x158] sm:$0xff]  ;;  %v89_v18 = vld [vmem:[%s598_s1 + $0x1e0] sm:$0xff]  ;;  %v55_v20 = vld [vmem:[%s598_s1 + $0xd0] sm:$0xff] }
   0x8   :  { %169 = vmatpush.msra.mxu2 %v74_v9  ;;  %118 = vmatpush.msra.mxu0 %v41_v11  ;;  %v71_v21 = vld [vmem:[%s598_s1 + $0x150] sm:$0xff]  ;;  %v88_v22 = vld [vmem:[%s598_s1 + $0x1d8] sm:$0xff]  ;;  %v38_v23 = vld [vmem:[%s598_s1 + $0x48] sm:$0xff] }
   0x9   :  { %144 = vmatpush.msra.mxu1 %v57_v12  ;;  %195 = vmatpush.msra.mxu3 %v90_v14  ;;  %v54_v24 = vld [vmem:[%s598_s1 + $0xc8] sm:$0xff]  ;;  %v87_v26 = vld [vmem:[%s598_s1 + $0x1d0] sm:$0xff]  ;;  %v37_v27 = vld [vmem:[%s598_s1 + $0x40] sm:$0xff] }
   0xa   :  { %170 = vmatpush.msra.mxu2 %v73_v13  ;;  %119 = vmatpush.msra.mxu0 %v40_v15  ;;  %v70_v25 = vld [vmem:[%s598_s1 + $0x148] sm:$0xff]  ;;  %v53_v28 = vld [vmem:[%s598_s1 + $0xc0] sm:$0xff]  ;;  %v36_v31 = vld [vmem:[%s598_s1 + $0x38] sm:$0xff] }
   0xb   :  { %145 = vmatpush.msra.mxu1 %v56_v16  ;;  %196 = vmatpush.msra.mxu3 %v89_v18  ;;  %v69_v29 = vld [vmem:[%s598_s1 + $0x140] sm:$0xff]  ;;  %v86_v30 = vld [vmem:[%s598_s1 + $0x1c8] sm:$0xff]  ;;  %v52_v32 = vld [vmem:[%s598_s1 + $0xb8] sm:$0xff] }
   0xc   :  { %171 = vmatpush.msra.mxu2 %v72_v17  ;;  %120 = vmatpush.msra.mxu0 %v39_v19  ;;  %v68_v33 = vld [vmem:[%s598_s1 + $0x138] sm:$0xff]  ;;  %v85_v34 = vld [vmem:[%s598_s1 + $0x1c0] sm:$0xff]  ;;  %v35_v35 = vld [vmem:[%s598_s1 + $0x30] sm:$0xff] }
   0xd   :  { %146 = vmatpush.msra.mxu1 %v55_v20  ;;  %197 = vmatpush.msra.mxu3 %v88_v22  ;;  %v51_v36 = vld [vmem:[%s598_s1 + $0xb0] sm:$0xff]  ;;  %v84_v38 = vld [vmem:[%s598_s1 + $0x1b8] sm:$0xff]  ;;  %v34_v39 = vld [vmem:[%s598_s1 + $0x28] sm:$0xff] }
   0xe   :  { %172 = vmatpush.msra.mxu2 %v71_v21  ;;  %121 = vmatpush.msra.mxu0 %v38_v23  ;;  %v67_v37 = vld [vmem:[%s598_s1 + $0x130] sm:$0xff]  ;;  %v50_v40 = vld [vmem:[%s598_s1 + $0xa8] sm:$0xff]  ;;  %v33_v43 = vld [vmem:[%s598_s1 + $0x20] sm:$0xff] }
   0xf   :  { %147 = vmatpush.msra.mxu1 %v54_v24  ;;  %198 = vmatpush.msra.mxu3 %v87_v26  ;;  %v66_v41 = vld [vmem:[%s598_s1 + $0x128] sm:$0xff]  ;;  %v83_v42 = vld [vmem:[%s598_s1 + $0x1b0] sm:$0xff]  ;;  %v49_v44 = vld [vmem:[%s598_s1 + $0xa0] sm:$0xff] }
  0x10   :  { %173 = vmatpush.msra.mxu2 %v70_v25  ;;  %122 = vmatpush.msra.mxu0 %v37_v27  ;;  %v65_v45 = vld [vmem:[%s598_s1 + $0x120] sm:$0xff]  ;;  %v82_v46 = vld [vmem:[%s598_s1 + $0x1a8] sm:$0xff]  ;;  %v32_v47 = vld [vmem:[%s598_s1 + $0x18] sm:$0xff] }
  0x11   :  { %148 = vmatpush.msra.mxu1 %v53_v28  ;;  %199 = vmatpush.msra.mxu3 %v86_v30  ;;  %v48_v48 = vld [vmem:[%s598_s1 + $0x98] sm:$0xff]  ;;  %v81_v50 = vld [vmem:[%s598_s1 + $0x1a0] sm:$0xff]  ;;  %v31_v51 = vld [vmem:[%s598_s1 + $0x10] sm:$0xff] }
  0x12   :  { %174 = vmatpush.msra.mxu2 %v69_v29  ;;  %123 = vmatpush.msra.mxu0 %v36_v31  ;;  %v64_v49 = vld [vmem:[%s598_s1 + $0x118] sm:$0xff]  ;;  %v47_v52 = vld [vmem:[%s598_s1 + $0x90] sm:$0xff]  ;;  %v30_v55 = vld [vmem:[%s598_s1 + $0x8] sm:$0xff] }
  0x13   :  { %149 = vmatpush.msra.mxu1 %v52_v32  ;;  %200 = vmatpush.msra.mxu3 %v85_v34  ;;  %v63_v53 = vld [vmem:[%s598_s1 + $0x110] sm:$0xff]  ;;  %v80_v54 = vld [vmem:[%s598_s1 + $0x198] sm:$0xff]  ;;  %v46_v56 = vld [vmem:[%s598_s1 + $0x88] sm:$0xff] }
  0x14   :  { %175 = vmatpush.msra.mxu2 %v68_v33  ;;  %124 = vmatpush.msra.mxu0 %v35_v35  ;;  %v62_v57 = vld [vmem:[%s598_s1 + $0x108] sm:$0xff]  ;;  %v79_v58 = vld [vmem:[%s598_s1 + $0x190] sm:$0xff]  ;;  %v29_v59 = vld [vmem:[%s598_s1] sm:$0xff] }
  0x15   :  { %150 = vmatpush.msra.mxu1 %v51_v36  ;;  %201 = vmatpush.msra.mxu3 %v84_v38  ;;  %v45_v60 = vld [vmem:[%s598_s1 + $0x80] sm:$0xff]  ;;  %v78_v62 = vld [vmem:[%s598_s1 + $0x188] sm:$0xff]  ;;  %v16_v1 = vld [vmem:[%s599_s0 + $0x10] sm:$0xff] }
  0x16   :  { %176 = vmatpush.msra.mxu2 %v67_v37  ;;  %125 = vmatpush.msra.mxu0 %v34_v39  ;;  %v61_v61 = vld [vmem:[%s598_s1 + $0x100] sm:$0xff]  ;;  %v15_v0 = vld [vmem:[%s599_s0 + $0x8] sm:$0xff]  ;;  %v100_v3 = vld [vmem:[%s598_s1 + $0x238] sm:$0xff] }
  0x17   :  { %151 = vmatpush.msra.mxu1 %v50_v40  ;;  %202 = vmatpush.msra.mxu3 %v83_v42  ;;  %v14_v63 = vld [vmem:[%s599_s0] sm:$0xff]  ;;  %v17_v4 = vld [vmem:[%s599_s0 + $0x18] sm:$0xff]  ;;  %v99_v5 = vld [vmem:[%s598_s1 + $0x230] sm:$0xff] }
  0x18   :  { %177 = vmatpush.msra.mxu2 %v66_v41  ;;  %126 = vmatpush.msra.mxu0 %v33_v43  ;;  %v77_v2 = vld [vmem:[%s598_s1 + $0x180] sm:$0xff]  ;;  %v98_v6 = vld [vmem:[%s598_s1 + $0x228] sm:$0xff]  ;;  %v20_v8 = vld [vmem:[%s599_s0 + $0x30] sm:$0xff] }
  0x19   :  { %152 = vmatpush.msra.mxu1 %v49_v44  ;;  %203 = vmatpush.msra.mxu3 %v82_v46  ;;  %v19_v7 = vld [vmem:[%s599_s0 + $0x28] sm:$0xff]  ;;  %v21_v9 = vld [vmem:[%s599_s0 + $0x38] sm:$0xff]  ;;  %v97_v10 = vld [vmem:[%s598_s1 + $0x220] sm:$0xff] }
  0x1a   :  { %178 = vmatpush.msra.mxu2 %v65_v45  ;;  %127 = vmatpush.msra.mxu0 %v32_v47  ;;  %v22_v11 = vld [vmem:[%s599_s0 + $0x40] sm:$0xff]  ;;  %v96_v12 = vld [vmem:[%s598_s1 + $0x218] sm:$0xff]  ;;  %v95_v13 = vld [vmem:[%s598_s1 + $0x210] sm:$0xff] }
  0x1b   :  { %153 = vmatpush.msra.mxu1 %v48_v48  ;;  %204 = vmatpush.msra.mxu3 %v81_v50  ;;  %v94_v14 = vld [vmem:[%s598_s1 + $0x208] sm:$0xff]  ;;  %v24_v15 = vld [vmem:[%s599_s0 + $0x50] sm:$0x3]  ;;  %v25_v16 = vld [vmem:[%s599_s0 + $0x58] sm:$0x3] }
  0x1c   :  { %179 = vmatpush.msra.mxu2 %v64_v49  ;;  %128 = vmatpush.msra.mxu0 %v31_v51  ;;  %v26_v17 = vld [vmem:[%s599_s0 + $0x60] sm:$0x3]  ;;  %v27_v18 = vld [vmem:[%s599_s0 + $0x68] sm:$0x3]  ;;  %v28_v22 = vld [vmem:[%s599_s0 + $0x70] sm:$0x3] }
  0x1d   :  { %154 = vmatpush.msra.mxu1 %v47_v52  ;;  %205 = vmatpush.msra.mxu3 %v80_v54  ;;  %v93_v19 = vld [vmem:[%s598_s1 + $0x200] sm:$0xff]  ;;  %v23_v21 = vld [vmem:[%s599_s0 + $0x48] sm:$0xff] }
  0x1e   :  { %180 = vmatpush.msra.mxu2 %v63_v53  ;;  %129 = vmatpush.msra.mxu0 %v30_v55  ;;  %v18_v20 = vld [vmem:[%s599_s0 + $0x20] sm:$0xff] }
  0x1f   :  { %155 = vmatpush.msra.mxu1 %v46_v56  ;;  %206 = vmatpush.msra.mxu3 %v79_v58  ;;  %v293_v25 = vld [vmem:[%s600_s2] ss:$0 sm:$0xff] }
  0x20   :  { %181 = vmatpush.msra.mxu2 %v62_v57  ;;  %130 = vmatpush.msra.mxu0 %v29_v59 }
  0x21   :  { %156 = vmatpush.msra.mxu1 %v45_v60  ;;  %207 = vmatpush.msra.mxu3 %v78_v62 }
  0x22   :  { %182 = vmatpush.msra.mxu2 %v61_v61  ;;  %131 = vmatmul.f32.vlgmr.msra.gmra.mxu0 %v14_v63 }
  0x23   :  { %157 = vmatmul.f32.vlgmr.msra.gmra.mxu1 %v15_v0  ;;  %183 = vmatmul.f32.vlgmr.msra.gmra.mxu2 %v16_v1 }
  0x24   :  { %208 = vmatpush.msra.mxu3 %v77_v2  ;;  %278 = vmatpush.msrb.mxu2 %v100_v3 }
  0x25   :  { %209 = vmatmul.f32.vlgmr.msra.gmra.mxu3 %v17_v4  ;;  %227 = vmatpush.msrb.mxu0 %v100_v3 }
  0x26   :  { %277 = vmatpush.msrb.mxu1 %v100_v3  ;;  %280 = vmatpush.msrb.mxu2 %v99_v5 }
  0x27   :  { %228 = vmatpush.msrb.mxu0 %v99_v5 }
  0x28   :  { %279 = vmatpush.msrb.mxu1 %v99_v5  ;;  %282 = vmatpush.msrb.mxu2 %v98_v6 }
  0x29   :  { %229 = vmatpush.msrb.mxu0 %v98_v6 }
  0x2a   :  { %281 = vmatpush.msrb.mxu1 %v98_v6  ;;  %134 = vmatmul.f32.gmra.mxu0 %v19_v7 }
  0x2b   :  { %160 = vmatmul.f32.gmra.mxu1 %v20_v8  ;;  %186 = vmatmul.f32.gmra.mxu2 %v21_v9 }
  0x2c   :  { %230 = vmatpush.msrb.mxu0 %v97_v10  ;;  %284 = vmatpush.msrb.mxu2 %v97_v10 }
  0x2d   :  { %212 = vmatmul.f32.gmra.mxu3 %v22_v11  ;;  %283 = vmatpush.msrb.mxu1 %v97_v10 }
  0x2e   :  { %231 = vmatpush.msrb.mxu0 %v96_v12  ;;  %286 = vmatpush.msrb.mxu2 %v96_v12 }
  0x2f   :  { %285 = vmatpush.msrb.mxu1 %v96_v12 }
  0x30   :  { %232 = vmatpush.msrb.mxu0 %v95_v13  ;;  %288 = vmatpush.msrb.mxu2 %v95_v13 }
  0x31   :  { %287 = vmatpush.msrb.mxu1 %v95_v13 }
  0x32   :  { %233 = vmatpush.msrb.mxu0 %v94_v14  ;;  %290 = vmatpush.msrb.mxu2 %v94_v14 }
  0x33   :  { %137 = vmatmul.f32.gmra.mxu0 %v24_v15  ;;  %163 = vmatmul.f32.gmra.mxu1 %v25_v16 }
  0x34   :  { %189 = vmatmul.f32.gmra.mxu2 %v26_v17  ;;  %289 = vmatpush.msrb.mxu1 %v94_v14 }
  0x35   :  { %215 = vmatmul.f32.gmra.mxu3 %v27_v18  ;;  %234 = vmatpush.msrb.mxu0 %v93_v19 }
  0x36   :  { %291 = vmatpush.msrb.mxu1 %v93_v19  ;;  %292 = vmatpush.msrb.mxu2 %v93_v19 }
  0x3b   :  { %271 = vmatmul.msk.f32.vlgmr.msrb.gmra.mxu0 %vm105_vm0, %v18_v20  ;;  %272 = vmatmul.msk.f32.vlgmr.msrb.gmra.mxu1 %vm105_vm0, %v23_v21 }
  0x3c   :  { %273 = vmatmul.msk.f32.vlgmr.msrb.gmra.mxu2 %vm105_vm0, %v28_v22 }
  0x9f   :  { %v132_v23 = vpop.f32.mrf.mxu0 }
  0xa0   :  { %v158_v24 = vpop.f32.mrf.mxu1  ;;  %v133_v30 = vadd.f32 %v293_v25, %v132_v23 }
  0xa2   :  { %v159_v32 = vadd.f32 %v158_v24, %v133_v30 }
  0xa6   :  { %v184_v26 = vpop.f32.mrf.mxu2 }
  0xa7   :  { %v135_v27 = vpop.f32.mrf.mxu0  ;;  %v185_v39 = vadd.f32 %v184_v26, %v159_v32 }
  0xa8   :  { %v161_v28 = vpop.f32.mrf.mxu1  ;;  %v210_v29 = vpop.f32.mrf.mxu3  ;;  %v136_v31 = vadd.f32 %v293_v25, %v135_v27 }
  0xa9   :  { %v211_v42 = vadd.f32 %v210_v29, %v185_v39 }
  0xaa   :  { %v162_v33 = vadd.f32 %v161_v28, %v136_v31 }
  0xae   :  { %v187_v34 = vpop.f32.mrf.mxu2 }
  0xaf   :  { %v188_v40 = vadd.f32 %v187_v34, %v162_v33 }
  0xb0   :  { %v138_v35 = vpop.f32.mrf.mxu0  ;;  %v164_v36 = vpop.f32.mrf.mxu1 }
  0xb1   :  { %v213_v37 = vpop.f32.mrf.mxu3  ;;  %v139_v38 = vadd.f32 %v293_v25, %v138_v35 }
  0xb2   :  { %v214_v43 = vadd.f32 %v213_v37, %v188_v40 }
  0xb3   :  { %v165_v41 = vadd.f32 %v164_v36, %v139_v38 }
  0xb7   :  { %v190_v44 = vpop.f32.mrf.mxu2 }
  0xb8   :  { %v236_v45 = vpop.f32.mrf.mxu0  ;;  %v239_v46 = vpop.f32.mrf.mxu1  ;;  %v191_v49 = vadd.f32 %v190_v44, %v165_v41 }
  0xb9   :  { %v237_v47 = vadd.f32 %v236_v45, %v211_v42  ;;  %v240_v48 = vadd.f32 %v239_v46, %v214_v43  ;;  %v216_v50 = vpop.f32.mrf.mxu3 }
  0xba   :  { %v217_v55 = vadd.f32 %v216_v50, %v191_v49 }
  0xbb   :  { %v248_v51 = vmin.f32 %v237_v47, 0.0  ;;  %v249_v52 = vmin.f32 %v240_v48, 0.0  ;;  %vm245_vm1 = vcmp.gt.f32.partialorder %v237_v47, 0.0  ;;  %vm246_vm2 = vcmp.gt.f32.partialorder %v240_v48, 0.0 }
  0xbd   :  { %v251_v53 = vmul.f32 1.442695, %v248_v51  ;;  %v253_v54 = vmul.f32 1.442695, %v249_v52 }
  0xbf   :  { %294 = vpow2.f32 %v251_v53  ;;  %v242_v56 = vpop.f32.mrf.mxu2 }
  0xc0   :  { %296 = vpow2.f32 %v253_v54  ;;  %v243_v57 = vadd.f32 %v242_v56, %v217_v55 }
  0xc2   :  { %v250_v58 = vmin.f32 %v243_v57, 0.0  ;;  %vm247_vm4 = vcmp.gt.f32.partialorder %v243_v57, 0.0 }
  0xc4   :  { %v255_v59 = vmul.f32 1.442695, %v250_v58 }
  0xc5   :  { %v295_v60 = vpop.eup %294 }
  0xc6   :  { %v297_v61 = vpop.eup %296  ;;  %v274_v62 = vadd.f32 -1.0, %v295_v60  ;;  %298 = vpow2.f32 %v255_v59 }
  0xc7   :  { %v275_v63 = vadd.f32 -1.0, %v297_v61 }
  0xc8   :  { %v260_v0 = vsel %vm245_vm1, %v237_v47, %v274_v62 }
  0xc9   :  { %263 = vst.msk [vmem:[%s601_s3] sm:$0xff] %vm105_vm0, %v260_v0  ;;  %v261_v1 = vsel %vm246_vm2, %v240_v48, %v275_v63 }
  0xca   :  { %264 = vst.msk [vmem:[%s601_s3 + $0x8] sm:$0xff] %vm105_vm0, %v261_v1 }
  0xcc   :  { %v299_v2 = vpop.eup %298 }
  0xcd   :  { %v276_v3 = vadd.f32 -1.0, %v299_v2 }
  0xcf   :  { %v262_v4 = vsel %vm247_vm4, %v243_v57, %v276_v3 }
  0xd0   :  { %266 = vst.msk [vmem:[%s601_s3 + $0x10] sm:$0x3] %vm265_vm3, %v262_v4 }

// kernel: atari_dueling_dqn_forward.7
= control target key start
LH: loop header
LB: loop body
LE: loop exit
PB: predicated region body
PF: predicated region fallthrough
CT: control target
= control target key end

     0   :  { %s2139_s0 = inlined_call_operand.vmem [shape: f32[2,576], index: 0, kind: input, shape index: {}]   ;;  %s2140_s1 = inlined_call_operand.vmem [shape: f32[576,512], index: 1, kind: input, shape index: {}]   ;;  %s2141_s2 = inlined_call_operand.vmem [shape: f32[1,512], index: 2, kind: input, shape index: {}]   ;;  %s2142_s3 = inlined_call_operand.vmem [shape: f32[1,256], index: 3, kind: input, shape index: {}]   ;;  %s2143_s4 = inlined_call_operand.<no memory space> [shape: f32[1,1], index: 4, kind: input, shape index: {}]   ;;  %s2144_s5 = inlined_call_operand.vmem [shape: f32[256,6], index: 5, kind: input, shape index: {}]   ;;  %s2145_s6 = inlined_call_operand.vmem [shape: f32[1,6], index: 6, kind: input, shape index: {}]   ;;  %s2146_s7 = inlined_call_operand.hbm [shape: f32[2,256], index: 7, kind: output, shape index: {0}]   ;;  %s2147_s8 = inlined_call_operand.hbm [shape: f32[2,256], index: 8, kind: output, shape index: {1}]   ;;  %s2148_s9 = inlined_call_operand.hbm [shape: f32[2,6], index: 9, kind: output, shape index: {2}]  }
   0x1   :  { %v15_v0 = vstv %s2143_s4 }
   0x2   :  { %16 = vst [vmem:[#allocation2] sm:$0x1] %v15_v0 }
   0x3   :  { %17 = vsyncpa [#allocation4], 0  ;;  %v223_v1 = vld [vmem:[%s2140_s1 + $0x5e0] sm:$0xff]  ;;  %v34_v56 = vld [vmem:[%s2139_s0 + $0x8] sm:$0x3]  ;;  %vm347_vm0 = vcmask 523264  }
   0x4   :  { %v219_v2 = vld [vmem:[%s2140_s1 + $0x5c0] sm:$0xff]  ;;  %390 = vmatpush.msra.mxu2 %v223_v1  ;;  %337 = vst [vmem:[#allocation1 + $0x20] ss:$4 sm:$0xff] %v34_v56  ;;  %v224_v62 = vld [vmem:[%s2140_s1 + $0x5e8] sm:$0xff] }
   0x5   :  { %v287_v3 = vld [vmem:[%s2140_s1 + $0x7e0] sm:$0xff] }
   0x6   :  { %410 = vmatpush.msra.mxu3 %v287_v3  ;;  %v283_v4 = vld [vmem:[%s2140_s1 + $0x7c0] sm:$0xff]  ;;  %391 = vmatpush.msra.mxu2 %v219_v2  ;;  %v220_v2 = vld [vmem:[%s2140_s1 + $0x5c8] sm:$0xff] }
   0x7   :  { %v215_v5 = vld [vmem:[%s2140_s1 + $0x5a0] sm:$0xff] }
   0x8   :  { %v279_v6 = vld [vmem:[%s2140_s1 + $0x7a0] sm:$0xff]  ;;  %411 = vmatpush.msra.mxu3 %v283_v4  ;;  %392 = vmatpush.msra.mxu2 %v215_v5 }
   0x9   :  { %v211_v7 = vld [vmem:[%s2140_s1 + $0x580] sm:$0xff] }
   0xa   :  { %v275_v8 = vld [vmem:[%s2140_s1 + $0x780] sm:$0xff]  ;;  %412 = vmatpush.msra.mxu3 %v279_v6  ;;  %393 = vmatpush.msra.mxu2 %v211_v7  ;;  %v216_v6 = vld [vmem:[%s2140_s1 + $0x5a8] sm:$0xff] }
   0xb   :  { %v95_v9 = vld [vmem:[%s2140_s1 + $0x1e0] sm:$0xff] }
   0xc   :  { %v91_v10 = vld [vmem:[%s2140_s1 + $0x1c0] sm:$0xff]  ;;  %350 = vmatpush.msra.mxu0 %v95_v9  ;;  %413 = vmatpush.msra.mxu3 %v275_v8 }
   0xd   :  { %v159_v11 = vld [vmem:[%s2140_s1 + $0x3e0] sm:$0xff] }
   0xe   :  { %v207_v12 = vld [vmem:[%s2140_s1 + $0x560] sm:$0xff]  ;;  %370 = vmatpush.msra.mxu1 %v159_v11  ;;  %351 = vmatpush.msra.mxu0 %v91_v10  ;;  %v212_v10 = vld [vmem:[%s2140_s1 + $0x588] sm:$0xff] }
   0xf   :  { %v271_v13 = vld [vmem:[%s2140_s1 + $0x760] sm:$0xff]  ;;  %394 = vmatpush.msra.mxu2 %v207_v12 }
  0x10   :  { %v87_v14 = vld [vmem:[%s2140_s1 + $0x1a0] sm:$0xff]  ;;  %414 = vmatpush.msra.mxu3 %v271_v13 }
  0x11   :  { %v155_v15 = vld [vmem:[%s2140_s1 + $0x3c0] sm:$0xff]  ;;  %352 = vmatpush.msra.mxu0 %v87_v14  ;;  %v208_v14 = vld [vmem:[%s2140_s1 + $0x568] sm:$0xff] }
  0x12   :  { %v203_v16 = vld [vmem:[%s2140_s1 + $0x540] sm:$0xff]  ;;  %371 = vmatpush.msra.mxu1 %v155_v15 }
  0x13   :  { %v267_v17 = vld [vmem:[%s2140_s1 + $0x740] sm:$0xff]  ;;  %395 = vmatpush.msra.mxu2 %v203_v16  ;;  %v288_v16 = vld [vmem:[%s2140_s1 + $0x7e8] sm:$0xff] }
  0x14   :  { %v151_v18 = vld [vmem:[%s2140_s1 + $0x3a0] sm:$0xff]  ;;  %415 = vmatpush.msra.mxu3 %v267_v17 }
  0x15   :  { %v83_v19 = vld [vmem:[%s2140_s1 + $0x180] sm:$0xff]  ;;  %372 = vmatpush.msra.mxu1 %v151_v18  ;;  %v204_v18 = vld [vmem:[%s2140_s1 + $0x548] sm:$0xff] }
  0x16   :  { %v147_v20 = vld [vmem:[%s2140_s1 + $0x380] sm:$0xff]  ;;  %353 = vmatpush.msra.mxu0 %v83_v19 }
  0x17   :  { %v199_v21 = vld [vmem:[%s2140_s1 + $0x520] sm:$0xff]  ;;  %373 = vmatpush.msra.mxu1 %v147_v20  ;;  %v284_v20 = vld [vmem:[%s2140_s1 + $0x7c8] sm:$0xff] }
  0x18   :  { %v263_v22 = vld [vmem:[%s2140_s1 + $0x720] sm:$0xff]  ;;  %396 = vmatpush.msra.mxu2 %v199_v21 }
  0x19   :  { %v79_v23 = vld [vmem:[%s2140_s1 + $0x160] sm:$0xff]  ;;  %416 = vmatpush.msra.mxu3 %v263_v22  ;;  %v200_v22 = vld [vmem:[%s2140_s1 + $0x528] sm:$0xff] }
  0x1a   :  { %v143_v24 = vld [vmem:[%s2140_s1 + $0x360] sm:$0xff]  ;;  %354 = vmatpush.msra.mxu0 %v79_v23  ;;  %v96_v23 = vld [vmem:[%s2140_s1 + $0x1e8] sm:$0xff] }
  0x1b   :  { %v195_v25 = vld [vmem:[%s2140_s1 + $0x500] sm:$0xff]  ;;  %374 = vmatpush.msra.mxu1 %v143_v24  ;;  %v280_v24 = vld [vmem:[%s2140_s1 + $0x7a8] sm:$0xff] }
  0x1c   :  { %v259_v26 = vld [vmem:[%s2140_s1 + $0x700] sm:$0xff]  ;;  %397 = vmatpush.msra.mxu2 %v195_v25 }
  0x1d   :  { %v75_v27 = vld [vmem:[%s2140_s1 + $0x140] sm:$0xff]  ;;  %417 = vmatpush.msra.mxu3 %v259_v26  ;;  %v196_v26 = vld [vmem:[%s2140_s1 + $0x508] sm:$0xff] }
  0x1e   :  { %v139_v28 = vld [vmem:[%s2140_s1 + $0x340] sm:$0xff]  ;;  %355 = vmatpush.msra.mxu0 %v75_v27 }
  0x1f   :  { %v191_v29 = vld [vmem:[%s2140_s1 + $0x4e0] sm:$0xff]  ;;  %375 = vmatpush.msra.mxu1 %v139_v28  ;;  %v92_v28 = vld [vmem:[%s2140_s1 + $0x1c8] sm:$0xff] }
  0x20   :  { %v255_v30 = vld [vmem:[%s2140_s1 + $0x6e0] sm:$0xff]  ;;  %398 = vmatpush.msra.mxu2 %v191_v29  ;;  %v160_v29 = vld [vmem:[%s2140_s1 + $0x3e8] sm:$0xff] }
  0x21   :  { %v71_v31 = vld [vmem:[%s2140_s1 + $0x120] sm:$0xff]  ;;  %418 = vmatpush.msra.mxu3 %v255_v30  ;;  %v192_v30 = vld [vmem:[%s2140_s1 + $0x4e8] sm:$0xff] }
  0x22   :  { %v135_v32 = vld [vmem:[%s2140_s1 + $0x320] sm:$0xff]  ;;  %356 = vmatpush.msra.mxu0 %v71_v31  ;;  %v88_v31 = vld [vmem:[%s2140_s1 + $0x1a8] sm:$0xff] }
  0x23   :  { %v187_v33 = vld [vmem:[%s2140_s1 + $0x4c0] sm:$0xff]  ;;  %376 = vmatpush.msra.mxu1 %v135_v32  ;;  %v276_v32 = vld [vmem:[%s2140_s1 + $0x788] sm:$0xff] }
  0x24   :  { %v251_v34 = vld [vmem:[%s2140_s1 + $0x6c0] sm:$0xff]  ;;  %399 = vmatpush.msra.mxu2 %v187_v33  ;;  %v156_v33 = vld [vmem:[%s2140_s1 + $0x3c8] sm:$0xff] }
  0x25   :  { %v67_v35 = vld [vmem:[%s2140_s1 + $0x100] sm:$0xff]  ;;  %419 = vmatpush.msra.mxu3 %v251_v34  ;;  %v188_v34 = vld [vmem:[%s2140_s1 + $0x4c8] sm:$0xff] }
  0x26   :  { %v131_v36 = vld [vmem:[%s2140_s1 + $0x300] sm:$0xff]  ;;  %357 = vmatpush.msra.mxu0 %v67_v35  ;;  %v84_v35 = vld [vmem:[%s2140_s1 + $0x188] sm:$0xff] }
  0x27   :  { %v183_v37 = vld [vmem:[%s2140_s1 + $0x4a0] sm:$0xff]  ;;  %377 = vmatpush.msra.mxu1 %v131_v36  ;;  %v272_v36 = vld [vmem:[%s2140_s1 + $0x768] sm:$0xff] }
  0x28   :  { %v247_v38 = vld [vmem:[%s2140_s1 + $0x6a0] sm:$0xff]  ;;  %400 = vmatpush.msra.mxu2 %v183_v37  ;;  %v152_v37 = vld [vmem:[%s2140_s1 + $0x3a8] sm:$0xff] }
  0x29   :  { %v63_v39 = vld [vmem:[%s2140_s1 + $0xe0] sm:$0xff]  ;;  %420 = vmatpush.msra.mxu3 %v247_v38  ;;  %v184_v38 = vld [vmem:[%s2140_s1 + $0x4a8] sm:$0xff] }
  0x2a   :  { %v127_v40 = vld [vmem:[%s2140_s1 + $0x2e0] sm:$0xff]  ;;  %358 = vmatpush.msra.mxu0 %v63_v39  ;;  %v80_v39 = vld [vmem:[%s2140_s1 + $0x168] sm:$0xff] }
  0x2b   :  { %v179_v41 = vld [vmem:[%s2140_s1 + $0x480] sm:$0xff]  ;;  %378 = vmatpush.msra.mxu1 %v127_v40  ;;  %v268_v40 = vld [vmem:[%s2140_s1 + $0x748] sm:$0xff] }
  0x2c   :  { %v243_v42 = vld [vmem:[%s2140_s1 + $0x680] sm:$0xff]  ;;  %401 = vmatpush.msra.mxu2 %v179_v41  ;;  %v148_v41 = vld [vmem:[%s2140_s1 + $0x388] sm:$0xff] }
  0x2d   :  { %v59_v43 = vld [vmem:[%s2140_s1 + $0xc0] sm:$0xff]  ;;  %421 = vmatpush.msra.mxu3 %v243_v42  ;;  %v180_v42 = vld [vmem:[%s2140_s1 + $0x488] sm:$0xff] }
  0x2e   :  { %v123_v44 = vld [vmem:[%s2140_s1 + $0x2c0] sm:$0xff]  ;;  %359 = vmatpush.msra.mxu0 %v59_v43  ;;  %v76_v43 = vld [vmem:[%s2140_s1 + $0x148] sm:$0xff] }
  0x2f   :  { %v33_v45 = vld [vmem:[%s2139_s0] sm:$0xff]  ;;  %379 = vmatpush.msra.mxu1 %v123_v44  ;;  %v264_v44 = vld [vmem:[%s2140_s1 + $0x728] sm:$0xff] }
  0x30   :  { %v175_v46 = vld [vmem:[%s2140_s1 + $0x460] sm:$0xff]  ;;  %335 = vst [vmem:[#allocation1] ss:$4 sm:$0xff] %v33_v45  ;;  %v144_v45 = vld [vmem:[%s2140_s1 + $0x368] sm:$0xff] }
  0x31   :  { %v239_v47 = vld [vmem:[%s2140_s1 + $0x660] sm:$0xff]  ;;  %402 = vmatpush.msra.mxu2 %v175_v46  ;;  %v176_v46 = vld [vmem:[%s2140_s1 + $0x468] sm:$0xff] }
  0x32   :  { %v55_v48 = vld [vmem:[%s2140_s1 + $0xa0] sm:$0xff]  ;;  %422 = vmatpush.msra.mxu3 %v239_v47 }
  0x33   :  { %v119_v49 = vld [vmem:[%s2140_s1 + $0x2a0] sm:$0xff]  ;;  %360 = vmatpush.msra.mxu0 %v55_v48 }
  0x34   :  { %v171_v50 = vld [vmem:[%s2140_s1 + $0x440] sm:$0xff]  ;;  %380 = vmatpush.msra.mxu1 %v119_v49 }
  0x35   :  { %v235_v51 = vld [vmem:[%s2140_s1 + $0x640] sm:$0xff]  ;;  %403 = vmatpush.msra.mxu2 %v171_v50 }
  0x36   :  { %v51_v52 = vld [vmem:[%s2140_s1 + $0x80] sm:$0xff]  ;;  %423 = vmatpush.msra.mxu3 %v235_v51 }
  0x37   :  { %v115_v53 = vld [vmem:[%s2140_s1 + $0x280] sm:$0xff]  ;;  %361 = vmatpush.msra.mxu0 %v51_v52  ;;  %v1295_v63 = vld.sshfl [vmem:[#allocation1 + $0x10] sm:$0xff pattern:$0x73625140] }
  0x38   :  { %v167_v54 = vld [vmem:[%s2140_s1 + $0x420] sm:$0xff]  ;;  %381 = vmatpush.msra.mxu1 %v115_v53  ;;  %v1333_v12 = vld.sshfl [vmem:[#allocation1 + $0x18] sm:$0xff pattern:$0x73625140] }
  0x39   :  { %v231_v55 = vld [vmem:[%s2140_s1 + $0x620] sm:$0xff]  ;;  %404 = vmatpush.msra.mxu2 %v167_v54  ;;  %v1355_v19 = vld.sshfl [vmem:[#allocation1 + $0x8] sm:$0xff pattern:$0x73625140] }
  0x3a   :  { %v47_v57 = vld [vmem:[%s2140_s1 + $0x60] sm:$0xff]  ;;  %424 = vmatpush.msra.mxu3 %v231_v55 }
  0x3b   :  { %v111_v58 = vld [vmem:[%s2140_s1 + $0x260] sm:$0xff]  ;;  %362 = vmatpush.msra.mxu0 %v47_v57 }
  0x3c   :  { %v163_v59 = vld [vmem:[%s2140_s1 + $0x400] sm:$0xff]  ;;  %382 = vmatpush.msra.mxu1 %v111_v58 }
  0x3d   :  { %v227_v60 = vld [vmem:[%s2140_s1 + $0x600] sm:$0xff]  ;;  %405 = vmatpush.msra.mxu2 %v163_v59 }
  0x3e   :  { %v319_v61 = vld [vmem:[%s2140_s1 + $0x8e0] sm:$0xff]  ;;  %425 = vmatpush.msra.mxu3 %v227_v60  ;;  %406 = vmatmul.f32.vlgmr.msra.gmra.mxu2 %v1295_v63 }
  0x3f   :  { %v43_v0 = vld [vmem:[%s2140_s1 + $0x40] sm:$0xff]  ;;  %438 = vmatpush.msrb.mxu2 %v319_v61  ;;  %426 = vmatmul.f32.vlgmr.msra.gmra.mxu3 %v1333_v12 }
  0x40   :  { %v315_v1 = vld [vmem:[%s2140_s1 + $0x8c0] sm:$0xff]  ;;  %490 = vmatpush.msrb.mxu3 %v224_v62  ;;  %363 = vmatpush.msra.mxu0 %v43_v0 }
  0x41   :  { %v39_v3 = vld [vmem:[%s2140_s1 + $0x20] sm:$0xff]  ;;  %439 = vmatpush.msrb.mxu2 %v315_v1 }
  0x42   :  { %v107_v4 = vld [vmem:[%s2140_s1 + $0x240] sm:$0xff]  ;;  %491 = vmatpush.msrb.mxu3 %v220_v2  ;;  %364 = vmatpush.msra.mxu0 %v39_v3 }
  0x43   :  { %v311_v5 = vld [vmem:[%s2140_s1 + $0x8a0] sm:$0xff]  ;;  %383 = vmatpush.msra.mxu1 %v107_v4 }
  0x44   :  { %v35_v7 = vld [vmem:[%s2140_s1] sm:$0xff]  ;;  %440 = vmatpush.msrb.mxu2 %v311_v5  ;;  %492 = vmatpush.msrb.mxu3 %v216_v6 }
  0x45   :  { %v103_v8 = vld [vmem:[%s2140_s1 + $0x220] sm:$0xff]  ;;  %365 = vmatpush.msra.mxu0 %v35_v7 }
  0x46   :  { %v307_v9 = vld [vmem:[%s2140_s1 + $0x880] sm:$0xff]  ;;  %384 = vmatpush.msra.mxu1 %v103_v8  ;;  %493 = vmatpush.msrb.mxu3 %v212_v10 }
  0x47   :  { %v1331_v11 = vld.sshfl [vmem:[#allocation1] sm:$0xff pattern:$0x73625140]  ;;  %441 = vmatpush.msrb.mxu2 %v307_v9  ;;  %510 = vmatpush.msrb.mxu0 %v288_v16 }
  0x48   :  { %v303_v13 = vld [vmem:[%s2140_s1 + $0x860] sm:$0xff]  ;;  %366 = vmatmul.f32.vlgmr.msra.gmra.mxu0 %v1331_v11  ;;  %494 = vmatpush.msrb.mxu3 %v208_v14 }
  0x49   :  { %v99_v15 = vld [vmem:[%s2140_s1 + $0x200] sm:$0xff]  ;;  %442 = vmatpush.msrb.mxu2 %v303_v13  ;;  %511 = vmatpush.msrb.mxu0 %v284_v20 }
  0x4a   :  { %v299_v17 = vld [vmem:[%s2140_s1 + $0x840] sm:$0xff]  ;;  %385 = vmatpush.msra.mxu1 %v99_v15  ;;  %495 = vmatpush.msrb.mxu3 %v204_v18 }
  0x4b   :  { %v295_v21 = vld [vmem:[%s2140_s1 + $0x820] sm:$0xff]  ;;  %443 = vmatpush.msrb.mxu2 %v299_v17  ;;  %386 = vmatmul.f32.vlgmr.msra.gmra.mxu1 %v1355_v19 }
  0x4c   :  { %v291_v25 = vld [vmem:[%s2140_s1 + $0x800] sm:$0xff]  ;;  %496 = vmatpush.msrb.mxu3 %v200_v22  ;;  %450 = vmatpush.msrb.mxu1 %v96_v23 }
  0x4d   :  { %444 = vmatpush.msrb.mxu2 %v295_v21  ;;  %v1379_v27 = vld.sshfl [vmem:[#allocation1 + $0x20] sm:$0xff pattern:$0x73625140]  ;;  %512 = vmatpush.msrb.mxu0 %v280_v24 }
  0x4e   :  { %497 = vmatpush.msrb.mxu3 %v196_v26  ;;  %451 = vmatpush.msrb.mxu1 %v92_v28 }
  0x4f   :  { %445 = vmatpush.msrb.mxu2 %v291_v25  ;;  %513 = vmatpush.msrb.mxu0 %v276_v32 }
  0x50   :  { %948 = vmatmul.msk.f32.vlgmr.msrb.gmra.mxu2 %vm347_vm0, %v1379_v27  ;;  %498 = vmatpush.msrb.mxu3 %v192_v30 }
  0x51   :  { %470 = vmatpush.msra.mxu2 %v160_v29  ;;  %452 = vmatpush.msrb.mxu1 %v88_v31 }
  0x52   :  { %499 = vmatpush.msrb.mxu3 %v188_v34  ;;  %514 = vmatpush.msrb.mxu0 %v272_v36 }
  0x53   :  { %471 = vmatpush.msra.mxu2 %v156_v33  ;;  %453 = vmatpush.msrb.mxu1 %v84_v35 }
  0x54   :  { %500 = vmatpush.msrb.mxu3 %v184_v38  ;;  %515 = vmatpush.msrb.mxu0 %v268_v40 }
  0x55   :  { %472 = vmatpush.msra.mxu2 %v152_v37  ;;  %454 = vmatpush.msrb.mxu1 %v80_v39 }
  0x56   :  { %18 = vsyncpa [#allocation6], 0  ;;  %501 = vmatpush.msrb.mxu3 %v180_v42  ;;  %v72_v47 = vld [vmem:[%s2140_s1 + $0x128] sm:$0xff]  ;;  %516 = vmatpush.msrb.mxu0 %v264_v44  ;;  %v161_v29 = vld [vmem:[%s2140_s1 + $0x3f0] sm:$0xff]  ;;  %vm753_vm1 = vcmask 1041408   ;;  %s1052_s13 = smov [#allocation5]  }
  0x57   :  { %473 = vmatpush.msra.mxu2 %v148_v41  ;;  %v260_v48 = vld [vmem:[%s2140_s1 + $0x708] sm:$0xff]  ;;  %455 = vmatpush.msrb.mxu1 %v76_v43  ;;  %v97_v30 = vld [vmem:[%s2140_s1 + $0x1f0] sm:$0xff]  ;;  %s917_s14 = sshll.u32 %s1052_s13, 4  ;;  %s919_s17 = sshll.u32 %s2147_s8, 4  ;;  %vm881_vm6 = vcmask 41984   ;;  %s918_s14 = int_to_ptr.vmem [resolvable:$true] %s917_s14  ;;  %s920_s17 = int_to_ptr.hbm [resolvable:$true] %s919_s17 }
  0x58   :  { %v140_v49 = vld [vmem:[%s2140_s1 + $0x348] sm:$0xff]  ;;  %502 = vmatpush.msrb.mxu3 %v176_v46  ;;  %517 = vmatpush.msrb.mxu0 %v260_v48  ;;  %v157_v31 = vld [vmem:[%s2140_s1 + $0x3d0] sm:$0xff]  ;;  %s1053_s19 = smov [#allocation3]  }
  0x59   :  { %v172_v50 = vld [vmem:[%s2140_s1 + $0x448] sm:$0xff]  ;;  %474 = vmatpush.msra.mxu2 %v144_v45  ;;  %456 = vmatpush.msrb.mxu1 %v72_v47  ;;  %v289_v32 = vld [vmem:[%s2140_s1 + $0x7f0] sm:$0xff]  ;;  %s906_s0 = sshll.u32 %s1053_s19, 4  ;;  %s907_s0 = int_to_ptr.vmem [resolvable:$true] %s906_s0 }
  0x5a   :  { %v68_v51 = vld [vmem:[%s2140_s1 + $0x108] sm:$0xff]  ;;  %503 = vmatpush.msrb.mxu3 %v172_v50  ;;  %v93_v33 = vld [vmem:[%s2140_s1 + $0x1d0] sm:$0xff] }
  0x5b   :  { %v256_v52 = vld [vmem:[%s2140_s1 + $0x6e8] sm:$0xff]  ;;  %475 = vmatpush.msra.mxu2 %v140_v49  ;;  %457 = vmatpush.msrb.mxu1 %v68_v51  ;;  %v153_v34 = vld [vmem:[%s2140_s1 + $0x3b0] sm:$0xff] }
  0x5c   :  { %v136_v53 = vld [vmem:[%s2140_s1 + $0x328] sm:$0xff]  ;;  %518 = vmatpush.msrb.mxu0 %v256_v52  ;;  %v225_v35 = vld [vmem:[%s2140_s1 + $0x5f0] sm:$0xff] }
  0x5d   :  { %v168_v54 = vld [vmem:[%s2140_s1 + $0x428] sm:$0xff]  ;;  %476 = vmatpush.msra.mxu2 %v136_v53  ;;  %v285_v36 = vld [vmem:[%s2140_s1 + $0x7d0] sm:$0xff] }
  0x5e   :  { %v64_v55 = vld [vmem:[%s2140_s1 + $0xe8] sm:$0xff]  ;;  %504 = vmatpush.msrb.mxu3 %v168_v54  ;;  %v89_v37 = vld [vmem:[%s2140_s1 + $0x1b0] sm:$0xff] }
  0x5f   :  { %v252_v56 = vld [vmem:[%s2140_s1 + $0x6c8] sm:$0xff]  ;;  %458 = vmatpush.msrb.mxu1 %v64_v55  ;;  %v149_v38 = vld [vmem:[%s2140_s1 + $0x390] sm:$0xff] }
  0x60   :  { %v132_v57 = vld [vmem:[%s2140_s1 + $0x308] sm:$0xff]  ;;  %519 = vmatpush.msrb.mxu0 %v252_v56  ;;  %v221_v39 = vld [vmem:[%s2140_s1 + $0x5d0] sm:$0xff] }
  0x61   :  { %v164_v58 = vld [vmem:[%s2140_s1 + $0x408] sm:$0xff]  ;;  %477 = vmatpush.msra.mxu2 %v132_v57  ;;  %v281_v40 = vld [vmem:[%s2140_s1 + $0x7b0] sm:$0xff] }
  0x62   :  { %v320_v59 = vld [vmem:[%s2140_s1 + $0x8e8] sm:$0xff]  ;;  %505 = vmatpush.msrb.mxu3 %v164_v58  ;;  %v85_v41 = vld [vmem:[%s2140_s1 + $0x190] sm:$0xff] }
  0x63   :  { %v60_v60 = vld [vmem:[%s2140_s1 + $0xc8] sm:$0xff]  ;;  %506 = vmatmul.f32.vlgmr.msrb.gmra.mxu3 %v1295_v63  ;;  %v145_v42 = vld [vmem:[%s2140_s1 + $0x370] sm:$0xff] }
  0x64   :  { %v128_v61 = vld [vmem:[%s2140_s1 + $0x2e8] sm:$0xff]  ;;  %538 = vmatpush.msra.mxu3 %v320_v59  ;;  %459 = vmatpush.msrb.mxu1 %v60_v60  ;;  %v217_v43 = vld [vmem:[%s2140_s1 + $0x5b0] sm:$0xff] }
  0x65   :  { %v316_v62 = vld [vmem:[%s2140_s1 + $0x8c8] sm:$0xff]  ;;  %478 = vmatpush.msra.mxu2 %v128_v61  ;;  %v277_v44 = vld [vmem:[%s2140_s1 + $0x790] sm:$0xff] }
  0x66   :  { %v56_v0 = vld [vmem:[%s2140_s1 + $0xa8] sm:$0xff]  ;;  %539 = vmatpush.msra.mxu3 %v316_v62  ;;  %v81_v45 = vld [vmem:[%s2140_s1 + $0x170] sm:$0xff] }
  0x67   :  { %v124_v1 = vld [vmem:[%s2140_s1 + $0x2c8] sm:$0xff]  ;;  %460 = vmatpush.msrb.mxu1 %v56_v0  ;;  %v141_v46 = vld [vmem:[%s2140_s1 + $0x350] sm:$0xff] }
  0x68   :  { %v248_v2 = vld [vmem:[%s2140_s1 + $0x6a8] sm:$0xff]  ;;  %479 = vmatpush.msra.mxu2 %v124_v1  ;;  %v213_v47 = vld [vmem:[%s2140_s1 + $0x590] sm:$0xff] }
  0x69   :  { %v312_v3 = vld [vmem:[%s2140_s1 + $0x8a8] sm:$0xff]  ;;  %520 = vmatpush.msrb.mxu0 %v248_v2  ;;  %v273_v48 = vld [vmem:[%s2140_s1 + $0x770] sm:$0xff] }
  0x6a   :  { %v52_v4 = vld [vmem:[%s2140_s1 + $0x88] sm:$0xff]  ;;  %540 = vmatpush.msra.mxu3 %v312_v3  ;;  %v77_v49 = vld [vmem:[%s2140_s1 + $0x150] sm:$0xff] }
  0x6b   :  { %v120_v5 = vld [vmem:[%s2140_s1 + $0x2a8] sm:$0xff]  ;;  %461 = vmatpush.msrb.mxu1 %v52_v4  ;;  %v137_v50 = vld [vmem:[%s2140_s1 + $0x330] sm:$0xff] }
  0x6c   :  { %v244_v6 = vld [vmem:[%s2140_s1 + $0x688] sm:$0xff]  ;;  %480 = vmatpush.msra.mxu2 %v120_v5  ;;  %v209_v51 = vld [vmem:[%s2140_s1 + $0x570] sm:$0xff] }
  0x6d   :  { %v308_v7 = vld [vmem:[%s2140_s1 + $0x888] sm:$0xff]  ;;  %521 = vmatpush.msrb.mxu0 %v244_v6  ;;  %v269_v52 = vld [vmem:[%s2140_s1 + $0x750] sm:$0xff] }
  0x6e   :  { %v48_v8 = vld [vmem:[%s2140_s1 + $0x68] sm:$0xff]  ;;  %541 = vmatpush.msra.mxu3 %v308_v7  ;;  %v73_v53 = vld [vmem:[%s2140_s1 + $0x130] sm:$0xff] }
  0x6f   :  { %v116_v9 = vld [vmem:[%s2140_s1 + $0x288] sm:$0xff]  ;;  %462 = vmatpush.msrb.mxu1 %v48_v8  ;;  %v133_v54 = vld [vmem:[%s2140_s1 + $0x310] sm:$0xff] }
  0x70   :  { %v240_v10 = vld [vmem:[%s2140_s1 + $0x668] sm:$0xff]  ;;  %481 = vmatpush.msra.mxu2 %v116_v9  ;;  %v205_v55 = vld [vmem:[%s2140_s1 + $0x550] sm:$0xff] }
  0x71   :  { %v304_v13 = vld [vmem:[%s2140_s1 + $0x868] sm:$0xff]  ;;  %522 = vmatpush.msrb.mxu0 %v240_v10  ;;  %v265_v56 = vld [vmem:[%s2140_s1 + $0x730] sm:$0xff] }
  0x72   :  { %v44_v14 = vld [vmem:[%s2140_s1 + $0x48] sm:$0xff]  ;;  %542 = vmatpush.msra.mxu3 %v304_v13  ;;  %v69_v57 = vld [vmem:[%s2140_s1 + $0x110] sm:$0xff] }
  0x73   :  { %v112_v15 = vld [vmem:[%s2140_s1 + $0x268] sm:$0xff]  ;;  %463 = vmatpush.msrb.mxu1 %v44_v14  ;;  %v129_v58 = vld [vmem:[%s2140_s1 + $0x2f0] sm:$0xff] }
  0x74   :  { %v236_v16 = vld [vmem:[%s2140_s1 + $0x648] sm:$0xff]  ;;  %482 = vmatpush.msra.mxu2 %v112_v15  ;;  %v201_v59 = vld [vmem:[%s2140_s1 + $0x530] sm:$0xff] }
  0x75   :  { %v300_v17 = vld [vmem:[%s2140_s1 + $0x848] sm:$0xff]  ;;  %523 = vmatpush.msrb.mxu0 %v236_v16  ;;  %v261_v60 = vld [vmem:[%s2140_s1 + $0x710] sm:$0xff] }
  0x76   :  { %v40_v18 = vld [vmem:[%s2140_s1 + $0x28] sm:$0xff]  ;;  %543 = vmatpush.msra.mxu3 %v300_v17  ;;  %v65_v61 = vld [vmem:[%s2140_s1 + $0xf0] sm:$0xff] }
  0x77   :  { %v108_v20 = vld [vmem:[%s2140_s1 + $0x248] sm:$0xff]  ;;  %464 = vmatpush.msrb.mxu1 %v40_v18  ;;  %v125_v62 = vld [vmem:[%s2140_s1 + $0x2d0] sm:$0xff] }
  0x78   :  { %v232_v21 = vld [vmem:[%s2140_s1 + $0x628] sm:$0xff]  ;;  %483 = vmatpush.msra.mxu2 %v108_v20  ;;  %v197_v0 = vld [vmem:[%s2140_s1 + $0x510] sm:$0xff] }
  0x79   :  { %v296_v22 = vld [vmem:[%s2140_s1 + $0x828] sm:$0xff]  ;;  %524 = vmatpush.msrb.mxu0 %v232_v21  ;;  %v257_v1 = vld [vmem:[%s2140_s1 + $0x6f0] sm:$0xff] }
  0x7a   :  { %v36_v23 = vld [vmem:[%s2140_s1 + $0x8] sm:$0xff]  ;;  %544 = vmatpush.msra.mxu3 %v296_v22  ;;  %v61_v2 = vld [vmem:[%s2140_s1 + $0xd0] sm:$0xff] }
  0x7b   :  { %v104_v24 = vld [vmem:[%s2140_s1 + $0x228] sm:$0xff]  ;;  %465 = vmatpush.msrb.mxu1 %v36_v23  ;;  %v121_v3 = vld [vmem:[%s2140_s1 + $0x2b0] sm:$0xff] }
  0x7c   :  { %v292_v25 = vld [vmem:[%s2140_s1 + $0x808] sm:$0xff]  ;;  %484 = vmatpush.msra.mxu2 %v104_v24  ;;  %466 = vmatmul.f32.vlgmr.msrb.gmra.mxu1 %v1331_v11  ;;  %v193_v4 = vld [vmem:[%s2140_s1 + $0x4f0] sm:$0xff] }
  0x7d   :  { %v228_v26 = vld [vmem:[%s2140_s1 + $0x608] sm:$0xff]  ;;  %545 = vmatpush.msra.mxu3 %v292_v25  ;;  %610 = vmatpush.msra.mxu1 %v289_v32  ;;  %v253_v5 = vld [vmem:[%s2140_s1 + $0x6d0] sm:$0xff]  ;;  %v94_v32 = vld [vmem:[%s2140_s1 + $0x1d8] sm:$0xff] }
  0x7e   :  { %v100_v28 = vld [vmem:[%s2140_s1 + $0x208] sm:$0xff]  ;;  %525 = vmatpush.msrb.mxu0 %v228_v26  ;;  %949 = vmatmul.msk.f32.vlgmr.msra.gmra.mxu3 %vm347_vm0, %v1379_v27  ;;  %v57_v6 = vld [vmem:[%s2140_s1 + $0xb0] sm:$0xff] }
  0x7f   :  { %485 = vmatpush.msra.mxu2 %v100_v28  ;;  %570 = vmatpush.msrb.mxu3 %v161_v29  ;;  %v117_v7 = vld [vmem:[%s2140_s1 + $0x290] sm:$0xff]  ;;  %v98_v28 = vld [vmem:[%s2140_s1 + $0x1f8] sm:$0xff] }
  0x80   :  { %486 = vmatmul.f32.vlgmr.msra.gmra.mxu2 %v1355_v19  ;;  %526 = vmatmul.f32.vlgmr.msrb.gmra.mxu0 %v1333_v12  ;;  %v189_v8 = vld [vmem:[%s2140_s1 + $0x4d0] sm:$0xff] }
  0x81   :  { %550 = vmatpush.msrb.mxu2 %v97_v30  ;;  %571 = vmatpush.msrb.mxu3 %v157_v31  ;;  %v249_v9 = vld [vmem:[%s2140_s1 + $0x6b0] sm:$0xff] }
  0x82   :  { %590 = vmatpush.msra.mxu0 %v225_v35  ;;  %611 = vmatpush.msra.mxu1 %v285_v36  ;;  %v53_v10 = vld [vmem:[%s2140_s1 + $0x90] sm:$0xff]  ;;  %v90_v35 = vld [vmem:[%s2140_s1 + $0x1b8] sm:$0xff] }
  0x83   :  { %551 = vmatpush.msrb.mxu2 %v93_v33  ;;  %572 = vmatpush.msrb.mxu3 %v153_v34  ;;  %v113_v13 = vld [vmem:[%s2140_s1 + $0x270] sm:$0xff] }
  0x84   :  { %591 = vmatpush.msra.mxu0 %v221_v39  ;;  %612 = vmatpush.msra.mxu1 %v281_v40  ;;  %v185_v14 = vld [vmem:[%s2140_s1 + $0x4b0] sm:$0xff]  ;;  %v86_v39 = vld [vmem:[%s2140_s1 + $0x198] sm:$0xff] }
  0x85   :  { %552 = vmatpush.msrb.mxu2 %v89_v37  ;;  %573 = vmatpush.msrb.mxu3 %v149_v38  ;;  %v245_v15 = vld [vmem:[%s2140_s1 + $0x690] sm:$0xff] }
  0x86   :  { %592 = vmatpush.msra.mxu0 %v217_v43  ;;  %613 = vmatpush.msra.mxu1 %v277_v44  ;;  %v49_v16 = vld [vmem:[%s2140_s1 + $0x70] sm:$0xff]  ;;  %v162_v43 = vld [vmem:[%s2140_s1 + $0x3f8] sm:$0xff] }
  0x87   :  { %553 = vmatpush.msrb.mxu2 %v85_v41  ;;  %574 = vmatpush.msrb.mxu3 %v145_v42  ;;  %v109_v17 = vld [vmem:[%s2140_s1 + $0x250] sm:$0xff]  ;;  %v82_v42 = vld [vmem:[%s2140_s1 + $0x178] sm:$0xff] }
  0x88   :  { %593 = vmatpush.msra.mxu0 %v213_v47  ;;  %614 = vmatpush.msra.mxu1 %v273_v48  ;;  %v181_v18 = vld [vmem:[%s2140_s1 + $0x490] sm:$0xff]  ;;  %v226_v47 = vld [vmem:[%s2140_s1 + $0x5f8] sm:$0xff] }
  0x89   :  { %554 = vmatpush.msrb.mxu2 %v81_v45  ;;  %575 = vmatpush.msrb.mxu3 %v141_v46  ;;  %v241_v20 = vld [vmem:[%s2140_s1 + $0x670] sm:$0xff]  ;;  %v78_v45 = vld [vmem:[%s2140_s1 + $0x158] sm:$0xff] }
  0x8a   :  { %594 = vmatpush.msra.mxu0 %v209_v51  ;;  %615 = vmatpush.msra.mxu1 %v269_v52  ;;  %v45_v21 = vld [vmem:[%s2140_s1 + $0x50] sm:$0xff]  ;;  %v158_v46 = vld [vmem:[%s2140_s1 + $0x3d8] sm:$0xff] }
  0x8b   :  { %555 = vmatpush.msrb.mxu2 %v77_v49  ;;  %576 = vmatpush.msrb.mxu3 %v137_v50  ;;  %v105_v22 = vld [vmem:[%s2140_s1 + $0x230] sm:$0xff]  ;;  %v74_v49 = vld [vmem:[%s2140_s1 + $0x138] sm:$0xff] }
  0x8c   :  { %595 = vmatpush.msra.mxu0 %v205_v55  ;;  %616 = vmatpush.msra.mxu1 %v265_v56  ;;  %v177_v23 = vld [vmem:[%s2140_s1 + $0x470] sm:$0xff]  ;;  %v154_v50 = vld [vmem:[%s2140_s1 + $0x3b8] sm:$0xff] }
  0x8d   :  { %556 = vmatpush.msrb.mxu2 %v73_v53  ;;  %577 = vmatpush.msrb.mxu3 %v133_v54  ;;  %v237_v24 = vld [vmem:[%s2140_s1 + $0x650] sm:$0xff]  ;;  %v222_v51 = vld [vmem:[%s2140_s1 + $0x5d8] sm:$0xff] }
  0x8e   :  { %596 = vmatpush.msra.mxu0 %v201_v59  ;;  %617 = vmatpush.msra.mxu1 %v261_v60  ;;  %v41_v25 = vld [vmem:[%s2140_s1 + $0x30] sm:$0xff]  ;;  %v70_v53 = vld [vmem:[%s2140_s1 + $0x118] sm:$0xff] }
  0x8f   :  { %557 = vmatpush.msrb.mxu2 %v69_v57  ;;  %578 = vmatpush.msrb.mxu3 %v129_v58  ;;  %v101_v26 = vld [vmem:[%s2140_s1 + $0x210] sm:$0xff]  ;;  %v150_v54 = vld [vmem:[%s2140_s1 + $0x398] sm:$0xff] }
  0x90   :  { %597 = vmatpush.msra.mxu0 %v197_v0  ;;  %618 = vmatpush.msra.mxu1 %v257_v1  ;;  %v173_v29 = vld [vmem:[%s2140_s1 + $0x450] sm:$0xff]  ;;  %v218_v55 = vld [vmem:[%s2140_s1 + $0x5b8] sm:$0xff] }
  0x91   :  { %558 = vmatpush.msrb.mxu2 %v65_v61  ;;  %579 = vmatpush.msrb.mxu3 %v125_v62  ;;  %v37_v30 = vld [vmem:[%s2140_s1 + $0x10] sm:$0xff]  ;;  %v66_v57 = vld [vmem:[%s2140_s1 + $0xf8] sm:$0xff] }
  0x92   :  { %598 = vmatpush.msra.mxu0 %v193_v4  ;;  %619 = vmatpush.msra.mxu1 %v253_v5  ;;  %v321_v31 = vld [vmem:[%s2140_s1 + $0x8f0] sm:$0xff]  ;;  %v146_v58 = vld [vmem:[%s2140_s1 + $0x378] sm:$0xff] }
  0x93   :  { %559 = vmatpush.msrb.mxu2 %v61_v2  ;;  %580 = vmatpush.msrb.mxu3 %v121_v3  ;;  %v169_v33 = vld [vmem:[%s2140_s1 + $0x430] sm:$0xff]  ;;  %v290_v59 = vld [vmem:[%s2140_s1 + $0x7f8] sm:$0xff] }
  0x94   :  { %599 = vmatpush.msra.mxu0 %v189_v8  ;;  %620 = vmatpush.msra.mxu1 %v249_v9  ;;  %v317_v34 = vld [vmem:[%s2140_s1 + $0x8d0] sm:$0xff]  ;;  %v62_v60 = vld [vmem:[%s2140_s1 + $0xd8] sm:$0xff] }
  0x95   :  { %560 = vmatpush.msrb.mxu2 %v57_v6  ;;  %581 = vmatpush.msrb.mxu3 %v117_v7  ;;  %v165_v36 = vld [vmem:[%s2140_s1 + $0x410] sm:$0xff]  ;;  %v214_v61 = vld [vmem:[%s2140_s1 + $0x598] sm:$0xff] }
  0x96   :  { %600 = vmatpush.msra.mxu0 %v185_v14  ;;  %621 = vmatpush.msra.mxu1 %v245_v15  ;;  %v233_v37 = vld [vmem:[%s2140_s1 + $0x630] sm:$0xff]  ;;  %v142_v62 = vld [vmem:[%s2140_s1 + $0x358] sm:$0xff] }
  0x97   :  { %561 = vmatpush.msrb.mxu2 %v53_v10  ;;  %582 = vmatpush.msrb.mxu3 %v113_v13  ;;  %v313_v38 = vld [vmem:[%s2140_s1 + $0x8b0] sm:$0xff]  ;;  %v286_v0 = vld [vmem:[%s2140_s1 + $0x7d8] sm:$0xff] }
  0x98   :  { %601 = vmatpush.msra.mxu0 %v181_v18  ;;  %622 = vmatpush.msra.mxu1 %v241_v20  ;;  %v229_v40 = vld [vmem:[%s2140_s1 + $0x610] sm:$0xff]  ;;  %v58_v1 = vld [vmem:[%s2140_s1 + $0xb8] sm:$0xff] }
  0x99   :  { %562 = vmatpush.msrb.mxu2 %v49_v16  ;;  %583 = vmatpush.msrb.mxu3 %v109_v17  ;;  %v309_v41 = vld [vmem:[%s2140_s1 + $0x890] sm:$0xff]  ;;  %v210_v2 = vld [vmem:[%s2140_s1 + $0x578] sm:$0xff] }
  0x9a   :  { %602 = vmatpush.msra.mxu0 %v177_v23  ;;  %623 = vmatpush.msra.mxu1 %v237_v24  ;;  %v305_v44 = vld [vmem:[%s2140_s1 + $0x870] sm:$0xff]  ;;  %v138_v3 = vld [vmem:[%s2140_s1 + $0x338] sm:$0xff] }
  0x9b   :  { %563 = vmatpush.msrb.mxu2 %v45_v21  ;;  %584 = vmatpush.msrb.mxu3 %v105_v22  ;;  %v301_v48 = vld [vmem:[%s2140_s1 + $0x850] sm:$0xff]  ;;  %v282_v4 = vld [vmem:[%s2140_s1 + $0x7b8] sm:$0xff] }
  0x9c   :  { %603 = vmatpush.msra.mxu0 %v173_v29  ;;  %624 = vmatpush.msra.mxu1 %v233_v37  ;;  %v297_v52 = vld [vmem:[%s2140_s1 + $0x830] sm:$0xff]  ;;  %v54_v5 = vld [vmem:[%s2140_s1 + $0x98] sm:$0xff] }
  0x9d   :  { %564 = vmatpush.msrb.mxu2 %v41_v25  ;;  %585 = vmatpush.msrb.mxu3 %v101_v26  ;;  %v293_v56 = vld [vmem:[%s2140_s1 + $0x810] sm:$0xff]  ;;  %v206_v6 = vld [vmem:[%s2140_s1 + $0x558] sm:$0xff] }
  0x9e   :  { %586 = vmatmul.f32.vlgmr.msrb.gmra.mxu3 %v1355_v19  ;;  %604 = vmatpush.msra.mxu0 %v169_v33  ;;  %v134_v7 = vld [vmem:[%s2140_s1 + $0x318] sm:$0xff] }
  0x9f   :  { %650 = vmatpush.msra.mxu3 %v98_v28  ;;  %565 = vmatpush.msrb.mxu2 %v37_v30  ;;  %v278_v8 = vld [vmem:[%s2140_s1 + $0x798] sm:$0xff] }
  0xa0   :  { %566 = vmatmul.f32.vlgmr.msrb.gmra.mxu2 %v1331_v11  ;;  %605 = vmatpush.msra.mxu0 %v165_v36  ;;  %v50_v9 = vld [vmem:[%s2140_s1 + $0x78] sm:$0xff] }
  0xa1   :  { %638 = vmatpush.msra.mxu2 %v321_v31  ;;  %651 = vmatpush.msra.mxu3 %v94_v32  ;;  %v202_v10 = vld [vmem:[%s2140_s1 + $0x538] sm:$0xff] }
  0xa2   :  { %606 = vmatmul.f32.vlgmr.msra.gmra.mxu0 %v1295_v63  ;;  %625 = vmatpush.msra.mxu1 %v229_v40  ;;  %v130_v13 = vld [vmem:[%s2140_s1 + $0x2f8] sm:$0xff] }
  0xa3   :  { %639 = vmatpush.msra.mxu2 %v317_v34  ;;  %652 = vmatpush.msra.mxu3 %v90_v35  ;;  %v274_v14 = vld [vmem:[%s2140_s1 + $0x778] sm:$0xff] }
  0xa4   :  { %670 = vmatpush.msrb.mxu0 %v162_v43  ;;  %626 = vmatmul.f32.vlgmr.msra.gmra.mxu1 %v1333_v12  ;;  %v46_v15 = vld [vmem:[%s2140_s1 + $0x58] sm:$0xff] }
  0xa5   :  { %640 = vmatpush.msra.mxu2 %v313_v38  ;;  %653 = vmatpush.msra.mxu3 %v86_v39  ;;  %v198_v16 = vld [vmem:[%s2140_s1 + $0x518] sm:$0xff] }
  0xa6   :  { %671 = vmatpush.msrb.mxu0 %v158_v46  ;;  %690 = vmatpush.msrb.mxu1 %v226_v47  ;;  %v126_v17 = vld [vmem:[%s2140_s1 + $0x2d8] sm:$0xff] }
  0xa7   :  { %641 = vmatpush.msra.mxu2 %v309_v41  ;;  %654 = vmatpush.msra.mxu3 %v82_v42  ;;  %v270_v18 = vld [vmem:[%s2140_s1 + $0x758] sm:$0xff] }
  0xa8   :  { %672 = vmatpush.msrb.mxu0 %v154_v50  ;;  %691 = vmatpush.msrb.mxu1 %v222_v51  ;;  %v42_v20 = vld [vmem:[%s2140_s1 + $0x38] sm:$0xff] }
  0xa9   :  { %642 = vmatpush.msra.mxu2 %v305_v44  ;;  %655 = vmatpush.msra.mxu3 %v78_v45  ;;  %v194_v21 = vld [vmem:[%s2140_s1 + $0x4f8] sm:$0xff] }
  0xaa   :  { %673 = vmatpush.msrb.mxu0 %v150_v54  ;;  %692 = vmatpush.msrb.mxu1 %v218_v55  ;;  %v122_v22 = vld [vmem:[%s2140_s1 + $0x2b8] sm:$0xff] }
  0xab   :  { %643 = vmatpush.msra.mxu2 %v301_v48  ;;  %656 = vmatpush.msra.mxu3 %v74_v49  ;;  %v266_v23 = vld [vmem:[%s2140_s1 + $0x738] sm:$0xff] }
  0xac   :  { %674 = vmatpush.msrb.mxu0 %v146_v58  ;;  %693 = vmatpush.msrb.mxu1 %v214_v61  ;;  %v38_v24 = vld [vmem:[%s2140_s1 + $0x18] sm:$0xff] }
  0xad   :  { %644 = vmatpush.msra.mxu2 %v297_v52  ;;  %657 = vmatpush.msra.mxu3 %v70_v53  ;;  %v322_v25 = vld [vmem:[%s2140_s1 + $0x8f8] sm:$0xff] }
  0xae   :  { %675 = vmatpush.msrb.mxu0 %v142_v62  ;;  %694 = vmatpush.msrb.mxu1 %v210_v2  ;;  %v190_v26 = vld [vmem:[%s2140_s1 + $0x4d8] sm:$0xff] }
  0xaf   :  { %645 = vmatpush.msra.mxu2 %v293_v56  ;;  %658 = vmatpush.msra.mxu3 %v66_v57  ;;  %v262_v28 = vld [vmem:[%s2140_s1 + $0x718] sm:$0xff] }
  0xb0   :  { %950 = vmatmul.msk.f32.vlgmr.msra.gmra.mxu2 %vm347_vm0, %v1379_v27  ;;  %676 = vmatpush.msrb.mxu0 %v138_v3  ;;  %v118_v29 = vld [vmem:[%s2140_s1 + $0x298] sm:$0xff]  ;;  %v819_v3 = vld [vmem:[%s2144_s5 + $0x70] sm:$0xff] }
  0xb1   :  { %710 = vmatpush.msrb.mxu2 %v290_v59  ;;  %659 = vmatpush.msra.mxu3 %v62_v60  ;;  %v318_v30 = vld [vmem:[%s2140_s1 + $0x8d8] sm:$0xff] }
  0xb2   :  { %695 = vmatpush.msrb.mxu1 %v206_v6  ;;  %677 = vmatpush.msrb.mxu0 %v134_v7  ;;  %v186_v31 = vld [vmem:[%s2140_s1 + $0x4b8] sm:$0xff]  ;;  %v818_v6 = vld [vmem:[%s2144_s5 + $0x68] sm:$0xff] }
  0xb3   :  { %711 = vmatpush.msrb.mxu2 %v286_v0  ;;  %660 = vmatpush.msra.mxu3 %v58_v1  ;;  %v258_v32 = vld [vmem:[%s2140_s1 + $0x6f8] sm:$0xff] }
  0xb4   :  { %696 = vmatpush.msrb.mxu1 %v202_v10  ;;  %678 = vmatpush.msrb.mxu0 %v130_v13  ;;  %v314_v33 = vld [vmem:[%s2140_s1 + $0x8b8] sm:$0xff]  ;;  %v817_v13 = vld [vmem:[%s2144_s5 + $0x60] sm:$0xff] }
  0xb5   :  { %712 = vmatpush.msrb.mxu2 %v282_v4  ;;  %661 = vmatpush.msra.mxu3 %v54_v5  ;;  %v114_v34 = vld [vmem:[%s2140_s1 + $0x278] sm:$0xff] }
  0xb6   :  { %697 = vmatpush.msrb.mxu1 %v198_v16  ;;  %679 = vmatpush.msrb.mxu0 %v126_v17  ;;  %v254_v35 = vld [vmem:[%s2140_s1 + $0x6d8] sm:$0xff] }
  0xb7   :  { %713 = vmatpush.msrb.mxu2 %v278_v8  ;;  %662 = vmatpush.msra.mxu3 %v50_v9  ;;  %v182_v36 = vld [vmem:[%s2140_s1 + $0x498] sm:$0xff] }
  0xb8   :  { %698 = vmatpush.msrb.mxu1 %v194_v21  ;;  %680 = vmatpush.msrb.mxu0 %v122_v22  ;;  %v310_v37 = vld [vmem:[%s2140_s1 + $0x898] sm:$0xff]  ;;  %v814_v21 = vld [vmem:[%s2144_s5 + $0x48] sm:$0xff] }
  0xb9   :  { %714 = vmatpush.msrb.mxu2 %v274_v14  ;;  %663 = vmatpush.msra.mxu3 %v46_v15  ;;  %v110_v38 = vld [vmem:[%s2140_s1 + $0x258] sm:$0xff] }
  0xba   :  { %699 = vmatpush.msrb.mxu1 %v190_v26  ;;  %681 = vmatpush.msrb.mxu0 %v118_v29  ;;  %v250_v39 = vld [vmem:[%s2140_s1 + $0x6b8] sm:$0xff]  ;;  %v787_v29 = vld [vmem:[%s2142_s3] sm:$0x3]  ;;  %s908_s3 = sshll.u32 %s2146_s7, 4  ;;  %s909_s3 = int_to_ptr.hbm [resolvable:$true] %s908_s3 }
  0xbb   :  { %715 = vmatpush.msrb.mxu2 %v270_v18  ;;  %664 = vmatpush.msra.mxu3 %v42_v20  ;;  %v178_v40 = vld [vmem:[%s2140_s1 + $0x478] sm:$0xff]  ;;  %v815_v18 = vld [vmem:[%s2144_s5 + $0x50] sm:$0xff] }
  0xbc   :  { %700 = vmatpush.msrb.mxu1 %v186_v31  ;;  %682 = vmatpush.msrb.mxu0 %v114_v34  ;;  %v106_v41 = vld [vmem:[%s2140_s1 + $0x238] sm:$0xff]  ;;  %v789_v31 = vperm.slane %v787_v29, 0 }
  0xbd   :  { %716 = vmatpush.msrb.mxu2 %v266_v23  ;;  %665 = vmatpush.msra.mxu3 %v38_v24  ;;  %v246_v42 = vld [vmem:[%s2140_s1 + $0x698] sm:$0xff] }
  0xbe   :  { %666 = vmatmul.f32.vlgmr.msra.gmra.mxu3 %v1331_v11  ;;  %701 = vmatpush.msrb.mxu1 %v182_v36  ;;  %v306_v11 = vld [vmem:[%s2140_s1 + $0x878] sm:$0xff]  ;;  %v811_v36 = vld [vmem:[%s2144_s5 + $0x30] sm:$0xff] }
  0xbf   :  { %738 = vmatpush.msrb.mxu3 %v322_v25  ;;  %717 = vmatpush.msrb.mxu2 %v262_v28  ;;  %v174_v43 = vld [vmem:[%s2140_s1 + $0x458] sm:$0xff] }
  0xc0   :  { %683 = vmatpush.msrb.mxu0 %v110_v38  ;;  %702 = vmatpush.msrb.mxu1 %v178_v40  ;;  %v302_v44 = vld [vmem:[%s2140_s1 + $0x858] sm:$0xff] }
  0xc1   :  { %739 = vmatpush.msrb.mxu3 %v318_v30  ;;  %718 = vmatpush.msrb.mxu2 %v258_v32  ;;  %v102_v45 = vld [vmem:[%s2140_s1 + $0x218] sm:$0xff]  ;;  %v407_v58 = vpop.f32.mrf.mxu2  ;;  %v813_v30 = vld [vmem:[%s2144_s5 + $0x40] sm:$0xff] }
  0xc2   :  { %v242_v46 = vld [vmem:[%s2140_s1 + $0x678] sm:$0xff]  ;;  %684 = vmatpush.msrb.mxu0 %v106_v41  ;;  %703 = vmatpush.msrb.mxu1 %v174_v43  ;;  %v427_v60 = vpop.f32.mrf.mxu3 }
  0xc3   :  { %740 = vmatpush.msrb.mxu3 %v314_v33  ;;  %719 = vmatpush.msrb.mxu2 %v254_v35  ;;  %v170_v47 = vld [vmem:[%s2140_s1 + $0x438] sm:$0xff]  ;;  %v790_v35 = vperm.slane %v787_v29, 1 }
  0xc4   :  { %v298_v48 = vld [vmem:[%s2140_s1 + $0x838] sm:$0xff]  ;;  %685 = vmatpush.msrb.mxu0 %v102_v45  ;;  %704 = vmatpush.msrb.mxu1 %v170_v47  ;;  %v807_v45 = vld [vmem:[%s2144_s5 + $0x10] sm:$0xff]  ;;  %v806_v47 = vld [vmem:[%s2144_s5 + $0x8] sm:$0xff] }
  0xc5   :  { %741 = vmatpush.msrb.mxu3 %v310_v37  ;;  %720 = vmatpush.msrb.mxu2 %v250_v39  ;;  %v238_v49 = vld [vmem:[%s2140_s1 + $0x658] sm:$0xff]  ;;  %v367_v55 = vpop.f32.mrf.mxu0  ;;  %v810_v39 = vld [vmem:[%s2144_s5 + $0x28] sm:$0xff] }
  0xc6   :  { %v166_v50 = vld [vmem:[%s2140_s1 + $0x418] sm:$0xff]  ;;  %686 = vmatmul.f32.vlgmr.msrb.gmra.mxu0 %v1355_v19  ;;  %v2016_v19 = vld [vmem:[%s2141_s2] sm:$0xf] }
  0xc7   :  { %742 = vmatpush.msrb.mxu3 %v306_v11  ;;  %721 = vmatpush.msrb.mxu2 %v246_v42  ;;  %v294_v51 = vld [vmem:[%s2140_s1 + $0x818] sm:$0xff]  ;;  %v325_v54 = vperm.slane %v2016_v19, 0  ;;  %v326_v0 = vperm.slane %v2016_v19, 1  ;;  %v809_v11 = vld [vmem:[%s2144_s5 + $0x20] sm:$0xff] }
  0xc8   :  { %v234_v52 = vld [vmem:[%s2140_s1 + $0x638] sm:$0xff]  ;;  %705 = vmatpush.msrb.mxu1 %v166_v50  ;;  %v387_v57 = vpop.f32.mrf.mxu1 }
  0xc9   :  { %743 = vmatpush.msrb.mxu3 %v302_v44  ;;  %722 = vmatpush.msrb.mxu2 %v242_v46  ;;  %v230_v53 = vld [vmem:[%s2140_s1 + $0x618] sm:$0xff]  ;;  %v368_v56 = vadd.f32 %v367_v55, %v325_v54  ;;  %v834_v55 = vld [vmem:[%s2144_s5 + $0xe8] sm:$0xff]  ;;  %s930_s1 = sshll.u32 %s2148_s9, 4  ;;  %s931_s1 = int_to_ptr.hbm [resolvable:$true] %s930_s1 }
  0xca   :  { %706 = vmatmul.f32.vlgmr.msrb.gmra.mxu1 %v1295_v63  ;;  %v820_v2 = vld [vmem:[%s2144_s5 + $0x78] sm:$0xff] }
  0xcb   :  { %744 = vmatpush.msrb.mxu3 %v298_v48  ;;  %723 = vmatpush.msrb.mxu2 %v238_v49  ;;  %v388_v59 = vadd.f32 %v387_v57, %v368_v56  ;;  %v816_v16 = vld [vmem:[%s2144_s5 + $0x58] sm:$0xff]  ;;  %v805_v48 = vld [vmem:[%s2144_s5] sm:$0xff]  ;;  %v327_v49 = vperm.slane %v2016_v19, 2 }
  0xcc   :  { %841 = vmatpush.msra.mxu0 %v820_v2  ;;  %v812_v32 = vld [vmem:[%s2144_s5 + $0x38] sm:$0xff]  ;;  %v833_v57 = vld [vmem:[%s2144_s5 + $0xe0] sm:$0xff] }
  0xcd   :  { %745 = vmatpush.msrb.mxu3 %v294_v51  ;;  %724 = vmatpush.msrb.mxu2 %v234_v52  ;;  %v408_v63 = vadd.f32 %v407_v58, %v388_v59  ;;  %v808_v42 = vld [vmem:[%s2144_s5 + $0x18] sm:$0xff]  ;;  %v835_v51 = vld [vmem:[%s2144_s5 + $0xf0] sm:$0xff] }
  0xce   :  { %951 = vmatmul.msk.f32.vlgmr.msrb.gmra.mxu3 %vm347_vm0, %v1379_v27  ;;  %842 = vmatpush.msra.mxu0 %v819_v3  ;;  %v836_v50 = vld [vmem:[%s2144_s5 + $0xf8] sm:$0xff] }
  0xcf   :  { %725 = vmatpush.msrb.mxu2 %v230_v53  ;;  %v428_v61 = vadd.f32 %v427_v60, %v408_v63  ;;  %861 = vmatpush.msra.mxu1 %v836_v50  ;;  %v832_v59 = vld [vmem:[%s2144_s5 + $0xd8] sm:$0xff]  ;;  %v831_v60 = vld [vmem:[%s2144_s5 + $0xd0] sm:$0xff] }
  0xd0   :  { %726 = vmatmul.f32.vlgmr.msrb.gmra.mxu2 %v1333_v12  ;;  %843 = vmatpush.msra.mxu0 %v818_v6  ;;  %v828_v3 = vld [vmem:[%s2144_s5 + $0xb8] sm:$0xff]  ;;  %v826_v6 = vld [vmem:[%s2144_s5 + $0xa8] sm:$0xff] }
  0xd1   :  { %862 = vmatpush.msra.mxu1 %v835_v51 }
  0xd2   :  { %844 = vmatpush.msra.mxu0 %v817_v13  ;;  %v822_v13 = vld [vmem:[%s2144_s5 + $0x88] sm:$0xff] }
  0xd3   :  { %v447_v62 = vpop.f32.mrf.mxu2  ;;  %863 = vmatpush.msra.mxu1 %v834_v55 }
  0xd4   :  { %v448_v27 = vadd.f32 %v447_v62, %v428_v61  ;;  %845 = vmatpush.msra.mxu0 %v816_v16 }
  0xd5   :  { %864 = vmatpush.msra.mxu1 %v833_v57 }
  0xd6   :  { %v765_v4 = vmin.f32 %v448_v27, 0.0  ;;  %846 = vmatpush.msra.mxu0 %v815_v18  ;;  %vm763_vm2 = vcmp.gt.f32.partialorder %v448_v27, 0.0 }
  0xd7   :  { %865 = vmatpush.msra.mxu1 %v832_v59 }
  0xd8   :  { %v767_v8 = vmul.f32 1.442695, %v765_v4  ;;  %847 = vmatpush.msra.mxu0 %v814_v21 }
  0xd9   :  { %866 = vmatpush.msra.mxu1 %v831_v60 }
  0xda   :  { %965 = vpow2.f32 %v767_v8  ;;  %848 = vmatpush.msra.mxu0 %v813_v30  ;;  %v824_v8 = vld [vmem:[%s2144_s5 + $0x98] sm:$0xff] }
  0xdc   :  { %849 = vmatpush.msra.mxu0 %v812_v32 }
  0xde   :  { %850 = vmatpush.msra.mxu0 %v811_v36  ;;  %v1051_v36 = vmov 0  }
  0xdf   :  { %961 = vset.pattern.permute.xlu1 %v1051_v36  ;;  %962 = vset.pattern.permute.xlu0 %v1051_v36 }
  0xe0   :  { %v966_v24 = vpop.eup %965  ;;  %851 = vmatpush.msra.mxu0 %v810_v39 }
  0xe1   :  { %v952_v28 = vadd.f32 -1.0, %v966_v24 }
  0xe2   :  { %852 = vmatpush.msra.mxu0 %v809_v11 }
  0xe3   :  { %v773_v33 = vsel %vm763_vm2, %v448_v27, %v952_v28 }
  0xe4   :  { %v793_v38 = vmul.f32 %v789_v31, %v773_v33  ;;  %853 = vmatpush.msra.mxu0 %v808_v42 }
  0xe6   :  { %v507_v1 = vpop.f32.mrf.mxu3  ;;  %v795_v43 = vsel %vm753_vm1, %v793_v38, 0.0  ;;  %854 = vmatpush.msra.mxu0 %v807_v45  ;;  %v1054_v45 = vmov 6.0  }
  0xe8   :  { %855 = vmatpush.msra.mxu0 %v806_v47 }
  0xea   :  { %856 = vmatpush.msra.mxu0 %v805_v48 }
  0xf9   :  { %v467_v12 = vpop.f32.mrf.mxu1 }
  0xfa   :  { %v468_v5 = vadd.f32 %v467_v12, %v326_v0 }
  0xfd   :  { %v527_v10 = vpop.f32.mrf.mxu0 }
 0x101   :  { %v547_v15 = vpop.f32.mrf.mxu3 }
 0x103   :  { %v487_v7 = vpop.f32.mrf.mxu2 }
 0x104   :  { %v488_v9 = vadd.f32 %v487_v7, %v468_v5  ;;  %v827_v5 = vld [vmem:[%s2144_s5 + $0xb0] sm:$0xff]  ;;  %v825_v7 = vld [vmem:[%s2144_s5 + $0xa0] sm:$0xff] }
 0x106   :  { %v508_v14 = vadd.f32 %v507_v1, %v488_v9  ;;  %v829_v1 = vld [vmem:[%s2144_s5 + $0xc0] sm:$0xff]  ;;  %v823_v9 = vld [vmem:[%s2144_s5 + $0x90] sm:$0xff] }
 0x108   :  { %v528_v17 = vadd.f32 %v527_v10, %v508_v14 }
 0x10a   :  { %v548_v20 = vadd.f32 %v547_v15, %v528_v17  ;;  %v821_v15 = vld [vmem:[%s2144_s5 + $0x80] sm:$0xff]  ;;  %v328_v17 = vperm.slane %v2016_v19, 3 }
 0x10c   :  { %v766_v22 = vmin.f32 %v548_v20, 0.0  ;;  %v752_v23 = vrot.slane %v548_v20, 6  ;;  %vm764_vm3 = vcmp.gt.f32.partialorder %v548_v20, 0.0 }
 0x10e   :  { %v769_v25 = vmul.f32 1.442695, %v766_v22  ;;  %v754_v26 = vsel %vm753_vm1, %v448_v27, %v752_v23  ;;  %v830_v27 = vld [vmem:[%s2144_s5 + $0xc8] sm:$0xff] }
 0x10f   :  { %756 = vst [vmem:[#allocation3] sm:$0xf] %v754_v26  ;;  %867 = vmatpush.msra.mxu1 %v830_v27 }
 0x110   :  { %967 = vpow2.f32 %v769_v25  ;;  %911 = dma.vmem_to_hbm [thread:$0]  %s907_s0, 64, %s909_s3, [#allocation4]  }
 0x111   :  { %868 = vmatpush.msra.mxu1 %v829_v1 }
 0x113   :  { %869 = vmatpush.msra.mxu1 %v828_v3 }
 0x115   :  { %870 = vmatpush.msra.mxu1 %v827_v5 }
 0x116   :  { %v968_v34 = vpop.eup %967 }
 0x117   :  { %v953_v37 = vadd.f32 -1.0, %v968_v34  ;;  %871 = vmatpush.msra.mxu1 %v826_v6 }
 0x119   :  { %v774_v40 = vsel %vm764_vm3, %v548_v20, %v953_v37  ;;  %872 = vmatpush.msra.mxu1 %v825_v7  ;;  %v963_v37 = vld [vmem:[#allocation2] ss:$0 sm:$0xff] }
 0x11a   :  { %v794_v41 = vmul.f32 %v790_v35, %v774_v40  ;;  %v964_v40 = vld [vmem:[%s2145_s6] ss:$0 sm:$0xff]  ;;  %s1055_s6 = smov [#allocation7]  }
 0x11b   :  { %873 = vmatpush.msra.mxu1 %v824_v8  ;;  %s928_s7 = sshll.u32 %s1055_s6, 4  ;;  %s929_s7 = int_to_ptr.vmem [resolvable:$true] %s928_s7 }
 0x11c   :  { %v796_v44 = vsel %vm753_vm1, %v794_v41, 0.0 }
 0x11d   :  { %v797_v46 = vadd.f32 %v796_v44, %v795_v43  ;;  %874 = vmatpush.msra.mxu1 %v823_v9 }
 0x11f   :  { %798 = vadd.xlane.f32.xlu0 %v797_v46  ;;  %v607_v58 = vpop.f32.mrf.mxu0  ;;  %875 = vmatpush.msra.mxu1 %v822_v13 }
 0x121   :  { %v587_v53 = vpop.f32.mrf.mxu3  ;;  %v627_v61 = vpop.f32.mrf.mxu1  ;;  %876 = vmatpush.msra.mxu1 %v821_v15 }
 0x123   :  { %v567_v52 = vpop.f32.mrf.mxu2 }
 0x124   :  { %v568_v54 = vadd.f32 %v567_v52, %v327_v49 }
 0x126   :  { %v588_v56 = vadd.f32 %v587_v53, %v568_v54 }
 0x128   :  { %v608_v63 = vadd.f32 %v607_v58, %v588_v56 }
 0x12a   :  { %v628_v62 = vadd.f32 %v627_v61, %v608_v63 }
 0x133   :  { %v647_v0 = vpop.f32.mrf.mxu2 }
 0x134   :  { %v648_v12 = vadd.f32 %v647_v0, %v628_v62 }
 0x136   :  { %v777_v2 = vmin.f32 %v648_v12, 0.0  ;;  %vm775_vm4 = vcmp.gt.f32.partialorder %v648_v12, 0.0 }
 0x138   :  { %v779_v4 = vmul.f32 1.442695, %v777_v2 }
 0x13a   :  { %969 = vpow2.f32 %v779_v4 }
 0x140   :  { %v970_v10 = vpop.eup %969 }
 0x141   :  { %v954_v14 = vadd.f32 -1.0, %v970_v10  ;;  %v667_v18 = vpop.f32.mrf.mxu3 }
 0x142   :  { %v668_v20 = vadd.f32 %v667_v18, %v328_v17 }
 0x143   :  { %v785_v16 = vsel %vm775_vm4, %v648_v12, %v954_v14  ;;  %v687_v21 = vpop.f32.mrf.mxu0 }
 0x144   :  { %857 = vmatmul.f32.vlgmr.msra.gmra.mxu0 %v785_v16  ;;  %v688_v22 = vadd.f32 %v687_v21, %v668_v20 }
 0x147   :  { %v707_v23 = vpop.f32.mrf.mxu1 }
 0x148   :  { %v708_v24 = vadd.f32 %v707_v23, %v688_v22 }
 0x151   :  { %v747_v26 = vpop.f32.mrf.mxu3 }
 0x153   :  { %v727_v25 = vpop.f32.mrf.mxu2 }
 0x154   :  { %v728_v28 = vadd.f32 %v727_v25, %v708_v24 }
 0x156   :  { %v748_v29 = vadd.f32 %v747_v26, %v728_v28 }
 0x158   :  { %v778_v30 = vmin.f32 %v748_v29, 0.0  ;;  %v759_v31 = vrot.slane %v748_v29, 6  ;;  %vm776_vm5 = vcmp.gt.f32.partialorder %v748_v29, 0.0 }
 0x15a   :  { %v781_v32 = vmul.f32 1.442695, %v778_v30  ;;  %v760_v33 = vsel %vm753_vm1, %v648_v12, %v759_v31 }
 0x15b   :  { %762 = vst [vmem:[#allocation5] sm:$0xf] %v760_v33 }
 0x15c   :  { %971 = vpow2.f32 %v781_v32  ;;  %922 = dma.vmem_to_hbm [thread:$0]  %s918_s14, 64, %s920_s17, [#allocation6]  }
 0x15d   :  { %973 = vrcp.f32 %v1054_v45 }
 0x162   :  { %v972_v34 = vpop.eup %971 }
 0x163   :  { %v955_v19 = vadd.f32 -1.0, %v972_v34  ;;  %v974_v46 = vpop.eup %973 }
 0x164   :  { %v886_v47 = vmul.f32 6.0, %v974_v46  ;;  %vm890_vm7 = vweird.f32 %v974_v46 }
 0x165   :  { %v786_v35 = vsel %vm776_vm5, %v748_v29, %v955_v19 }
 0x166   :  { %877 = vmatmul.f32.vlgmr.msra.gmra.mxu1 %v786_v35  ;;  %v887_v48 = vsub.f32 1.0, %v886_v47 }
 0x168   :  { %v888_v49 = vmul.f32 %v974_v46, %v887_v48 }
 0x16a   :  { %v889_v50 = vadd.f32 %v974_v46, %v888_v49 }
 0x16c   :  { %v891_v51 = vsel %vm890_vm7, %v974_v46, %v889_v50 }
 0x192   :  { %v799_v38 = vpop.xlane.xlu0 %798 }
 0x193   :  { %v804_v39 = vadd.f32 %v963_v37, %v799_v38 }
 0x195   :  { %896 = vperm.xlu1 %961, %v804_v39  }
 0x1c1   :  { %v858_v11 = vpop.f32.mrf.mxu0 }
 0x1c2   :  { %v859_v41 = vadd.f32 %v964_v40, %v858_v11 }
 0x1e3   :  { %v878_v42 = vpop.f32.mrf.mxu1 }
 0x1e4   :  { %v879_v43 = vadd.f32 %v878_v42, %v859_v41 }
 0x1e6   :  { %v882_v44 = vsel %vm881_vm6, %v879_v43, 0.0 }
 0x1e7   :  { %883 = vadd.xlane.f32.xlu0 %v882_v44 }
 0x207   :  { %v897_v55 = vpop.permute.xlu1 %896 }
 0x25a   :  { %v884_v52 = vpop.xlane.xlu0 %883 }
 0x25b   :  { %v892_v53 = vmul.f32 %v891_v51, %v884_v52 }
 0x25d   :  { %v893_v54 = vsub.f32 %v879_v43, %v892_v53 }
 0x25f   :  { %v899_v56 = vadd.f32 %v897_v55, %v893_v54 }
 0x261   :  { %900 = vst.msk [vmem:[#allocation7] sm:$0x3] %vm881_vm6, %v899_v56 }
 0x262   :  { %933 = dma.vmem_to_hbm [thread:$0]  %s929_s7, 32, %s931_s1, [#allocation6]  }
 0x263   :  { %1047 = dma.done.wait [#allocation4], 64  }
 0x264   :  { %1048 = vsyncadd [#allocation4], 4294967232 }
 0x265   :  { %1049 = dma.done.wait [#allocation6], 96  }
 0x266   :  { %1050 = vsyncadd [#allocation6], 4294967200 }
 0x267   :  { %946 = vsyncpa [#allocation4], 1 }
 0x268   :  { %947 = vsyncpa [#allocation6], 1 }

</bundles_post_ra>
